<compile_context>
chip_gen: v6e
topology: v6e:2x2x1
jax: 0.10.0
libtpu: 0.0.40
codegen_flags: <defaults>
</compile_context>

<pallas_src>
import jax
import jax.numpy as jnp
from jax import lax
from jax.experimental import pallas as pl
from jax.experimental.pallas import tpu as pltpu


# ---------------------------------------------------------------------------
# Helpers
# ---------------------------------------------------------------------------

def _silu_f32(y):
    # y * sigmoid(y); the reciprocal lowers to the EUP slot (approx mode).
    return y * pl.reciprocal(1.0 + jnp.exp(-y), approx=True)


def _largest_divisor_tile(n, target):
    t = max(1, min(int(target), int(n)))
    while n % t:
        t -= 1
    return t


_VMEM_LIMIT = 48 * 1024 * 1024  # explicit scoped-VMEM cap (fits v7x's 64 MiB)


# ---------------------------------------------------------------------------
# Kernel 1: cv1 = 3x3 conv (BN folded) + SiLU, im2col -> one MXU matmul
# ---------------------------------------------------------------------------

def _make_cv1_kernel(W, th, c1, c_):
    def kernel(a_ref, up_ref, dn_ref, w_ref, bias_ref, o_ref):
        # a_ref : (1, th, W+2, c1)  main row tile (columns already zero-padded)
        # up_ref: (1, 1,  W+2, c1)  row above the tile (clamped; zeroed at r==0)
        # dn_ref: (1, 1,  W+2, c1)  row below the tile (clamped; zeroed at r==last)
        # w_ref : (9*c1, c_)        im2col-packed folded weights (bf16)
        # bias  : (1, c_)           folded BN bias (f32)
        # o_ref : (1, th, W+2, c_)  output row tile, zero-padded columns
        r = pl.program_id(1)
        last = pl.num_programs(1) - 1
        top = jnp.where(r == 0, jnp.zeros_like(up_ref[0]), up_ref[0])
        bot = jnp.where(r == last, jnp.zeros_like(dn_ref[0]), dn_ref[0])
        win = jnp.concatenate([top, a_ref[0], bot], axis=0)       # (th+2, W+2, c1)

        # im2col: (th*W, 9*c1) patch matrix -> single matmul (K = 9*c1).
        cols = [win[dy:dy + th, dx:dx + W, :].reshape(th * W, c1)
                for dy in range(3) for dx in range(3)]
        patch = jnp.concatenate(cols, axis=-1)                     # (th*W, 9*c1)
        y = jnp.dot(patch, w_ref[...], preferred_element_type=jnp.float32)
        y = _silu_f32(y + bias_ref[...])
        y = y.reshape(th, W, c_).astype(o_ref.dtype)

        # Store interior + zero column pads (so the next kernel needs no wrapper pad).
        o_ref[0, :, 1:W + 1, :] = y
        zc = jnp.zeros((th, 1, c_), o_ref.dtype)
        o_ref[0, :, 0:1, :] = zc
        o_ref[0, :, W + 1:W + 2, :] = zc

    return kernel


def conv1_bn_silu(xp, w_mat, bias, th):
    """xp: (N,H,W+2,c1) column-padded NHWC bf16 input -> (N,H,W+2,c_) bf16."""
    N, H, Wp2, c1 = xp.shape
    W = Wp2 - 2
    c_ = w_mat.shape[-1]
    nt = H // th
    flops = 2 * N * H * W * 9 * c1 * c_
    bytes_acc = 2 * (N * H * Wp2 * c1 + 9 * c1 * c_ + N * H * Wp2 * c_) + 4 * c_
    return pl.pallas_call(
        _make_cv1_kernel(W, th, c1, c_),
        out_shape=jax.ShapeDtypeStruct((N, H, Wp2, c_), xp.dtype),
        grid=(N, nt),
        in_specs=[
            pl.BlockSpec((1, th, Wp2, c1), lambda n, r: (n, r, 0, 0)),
            pl.BlockSpec((1, 1, Wp2, c1),
                         lambda n, r: (n, jnp.maximum(r * th - 1, 0), 0, 0)),
            pl.BlockSpec((1, 1, Wp2, c1),
                         lambda n, r: (n, jnp.minimum((r + 1) * th, H - 1), 0, 0)),
            pl.BlockSpec((9 * c1, c_), lambda n, r: (0, 0)),
            pl.BlockSpec((1, c_), lambda n, r: (0, 0)),
        ],
        out_specs=pl.BlockSpec((1, th, Wp2, c_), lambda n, r: (n, r, 0, 0)),
        compiler_params=pltpu.CompilerParams(
            dimension_semantics=("parallel", "parallel"),
            vmem_limit_bytes=_VMEM_LIMIT),
        cost_estimate=pl.CostEstimate(flops=int(flops),
                                      transcendentals=int(N * H * W * c_),
                                      bytes_accessed=int(bytes_acc)),
    )(xp, xp, xp, w_mat, bias)


# ---------------------------------------------------------------------------
# Kernel 2: fused [2x nearest upsample + cv2 (3x3) + cv3 (1x1)], BN folded, SiLU
#   Exact parity decomposition: output pixel (2i+pu, 2j+pv) is a 2x2 conv on the
#   pre-upsample grid with class-specific pre-summed weights (16 (c_,c_) matrices).
# ---------------------------------------------------------------------------

def _make_up_cv2_cv3_kernel(W, th, c_, c2, tap_offsets):
    def kernel(a_ref, up_ref, dn_ref, w2_ref, b2_ref, w3_ref, b3_ref, o_ref):
        # a_ref : (1, th, W+2, c_)   pre-upsample row tile (zero-padded columns)
        # up/dn : (1, 1,  W+2, c_)   halo rows (clamped; zeroed at image borders)
        # w2_ref: (16, c_, c_)       effective cv2 weights, class-major (bf16)
        # b2    : (1, c_)  f32 ; w3: (c_, c2) bf16 ; b3: (1, c2) f32
        # o_ref : (1, th, 2, W, 2*c2) f32  -> (i, pu, j, pv*c2 + c)
        r = pl.program_id(1)
        last = pl.num_programs(1) - 1
        top = jnp.where(r == 0, jnp.zeros_like(up_ref[0]), up_ref[0])
        bot = jnp.where(r == last, jnp.zeros_like(dn_ref[0]), dn_ref[0])
        win = jnp.concatenate([top, a_ref[0], bot], axis=0)       # (th+2, W+2, c_)

        patches = {}
        for ro in range(3):
            for co in range(3):
                patches[(ro, co)] = win[ro:ro + th, co:co + W, :].reshape(th * W, c_)

        outs = []
        for cls in range(4):                       # class order: (0,0),(0,1),(1,0),(1,1)
            acc = jnp.zeros((th * W, c_), jnp.float32)
            for t, (ro, co) in enumerate(tap_offsets[cls]):
                acc = acc + jnp.dot(patches[(ro, co)], w2_ref[cls * 4 + t],
                                    preferred_element_type=jnp.float32)
            y = _silu_f32(acc + b2_ref[...])                       # cv2 epilogue (f32)
            z = jnp.dot(y.astype(w3_ref.dtype), w3_ref[...],       # fused cv3 (1x1)
                        preferred_element_type=jnp.float32)
            z = _silu_f32(z + b3_ref[...])
            outs.append(z.reshape(th, W, c2))

        row_even = jnp.concatenate([outs[0], outs[1]], axis=-1)    # pu=0: (th, W, 2*c2)
        row_odd = jnp.concatenate([outs[2], outs[3]], axis=-1)     # pu=1
        o_ref[0, :, 0, :, :] = row_even.astype(o_ref.dtype)
        o_ref[0, :, 1, :, :] = row_odd.astype(o_ref.dtype)

    return kernel


def upsample_conv2_conv3(y1p, w2eff, b2, w3, b3, tap_offsets, th, out_dtype):
    """y1p: (N,H,W+2,c_) bf16 -> packed output (N,H,2,W,2*c2) f32."""
    N, H, Wp2, c_ = y1p.shape
    W = Wp2 - 2
    c2 = w3.shape[-1]
    nt = H // th
    flops = 2 * N * H * W * c_ * (16 * c_ + 4 * c2)
    bytes_acc = 2 * (N * H * Wp2 * c_ + 16 * c_ * c_ + c_ * c2) \
        + 4 * N * H * 2 * W * 2 * c2
    return pl.pallas_call(
        _make_up_cv2_cv3_kernel(W, th, c_, c2, tap_offsets),
        out_shape=jax.ShapeDtypeStruct((N, H, 2, W, 2 * c2), out_dtype),
        grid=(N, nt),
        in_specs=[
            pl.BlockSpec((1, th, Wp2, c_), lambda n, r: (n, r, 0, 0)),
            pl.BlockSpec((1, 1, Wp2, c_),
                         lambda n, r: (n, jnp.maximum(r * th - 1, 0), 0, 0)),
            pl.BlockSpec((1, 1, Wp2, c_),
                         lambda n, r: (n, jnp.minimum((r + 1) * th, H - 1), 0, 0)),
            pl.BlockSpec((16, c_, c_), lambda n, r: (0, 0, 0)),
            pl.BlockSpec((1, c_), lambda n, r: (0, 0)),
            pl.BlockSpec((c_, c2), lambda n, r: (0, 0)),
            pl.BlockSpec((1, c2), lambda n, r: (0, 0)),
        ],
        out_specs=pl.BlockSpec((1, th, 2, W, 2 * c2),
                               lambda n, r: (n, r, 0, 0, 0)),
        compiler_params=pltpu.CompilerParams(
            dimension_semantics=("parallel", "parallel"),
            vmem_limit_bytes=_VMEM_LIMIT),
        cost_estimate=pl.CostEstimate(
            flops=int(flops),
            transcendentals=int(4 * N * H * W * (c_ + c2)),
            bytes_accessed=int(bytes_acc)),
    )(y1p, y1p, y1p, w2eff, b2, w3, b3)


# ---------------------------------------------------------------------------
# Module
# ---------------------------------------------------------------------------

class Proto:
    """JAX/Pallas inference-mode equivalent of the PyTorch Proto module."""

    def __init__(self, c1, c_=256, c2=32, *, key=None, eps=1e-3,
                 tile_h1=16, tile_h2=8):
        if key is None:
            key = jax.random.PRNGKey(0)
        self.eps = eps
        self.tile_h1 = tile_h1
        self.tile_h2 = tile_h2
        k1, k2, k3 = jax.random.split(key, 3)
        self.cv1 = self._init_conv_bn(k1, c1, c_, 3)
        self.cv2 = self._init_conv_bn(k2, c_, c_, 3)
        self.cv3 = self._init_conv_bn(k3, c_, c2, 1)
        self._prepare_folded()

    @staticmethod
    def _init_conv_bn(key, cin, cout, k):
        kw, kg, kb, km, kv = jax.random.split(key, 5)
        fan_in = cin * k * k
        w = jax.random.normal(kw, (cout, cin, k, k), jnp.float32) / jnp.sqrt(fan_in)
        return dict(
            w=w, k=k,
            gamma=1.0 + 0.1 * jax.random.normal(kg, (cout,), jnp.float32),
            beta=0.1 * jax.random.normal(kb, (cout,), jnp.float32),
            mean=0.1 * jax.random.normal(km, (cout,), jnp.float32),
            var=jnp.abs(jax.random.normal(kv, (cout,), jnp.float32)) + 0.5,
        )

    def _fold(self, p):
        # Fold BatchNorm (eval / running-stats mode) into conv weight + bias (f32).
        scale = p["gamma"] / jnp.sqrt(p["var"] + self.eps)            # (Cout,)
        wf = p["w"] * scale[:, None, None, None]                      # (Cout,Cin,K,K)
        bias = (p["beta"] - p["mean"] * scale).reshape(1, -1)         # (1,Cout)
        return wf, bias

    def _prepare_folded(self):
        # ---- cv1: im2col-packed weight (9*c1, c_), bf16 -----------------------
        w1f, b1 = self._fold(self.cv1)
        c_out, c1 = w1f.shape[0], w1f.shape[1]
        self.w1_mat = jnp.transpose(w1f, (2, 3, 1, 0)).reshape(
            9 * c1, c_out).astype(jnp.bfloat16)
        self.b1 = b1                                                   # (1,c_) f32

        # ---- cv2: 16 effective weights for the 4 upsample-parity classes ------
        w2f, b2 = self._fold(self.cv2)
        taps = jnp.transpose(w2f, (2, 3, 1, 0))                        # (3,3,Cin,Cout)

        def pmap(p):  # parity -> {kernel index d: window slice offset}
            return {0: 0, 1: 1, 2: 1} if p == 0 else {0: 1, 1: 1, 2: 2}

        eff, offsets = [], []
        for pu in (0, 1):
            for pv in (0, 1):
                rm, cm = pmap(pu), pmap(pv)
                groups = {}
                for dy in range(3):
                    for dx in range(3):
                        groups.setdefault((rm[dy], cm[dx]), []).append((dy, dx))
                cls_off = []
                for off in sorted(groups):
                    wsum = sum(taps[dy, dx] for dy, dx in groups[off])  # (Cin,Cout) f32
                    eff.append(wsum)
                    cls_off.append(off)
                offsets.append(tuple(cls_off))
        self.w2_eff = jnp.stack(eff, axis=0).astype(jnp.bfloat16)      # (16,c_,c_)
        self.tap_offsets = tuple(offsets)                              # static metadata
        self.b2 = b2                                                   # (1,c_) f32

        # ---- cv3: 1x1 ----------------------------------------------------------
        w3f, b3 = self._fold(self.cv3)
        self.w3_mat = jnp.transpose(
            w3f.reshape(w3f.shape[0], w3f.shape[1]), (1, 0)).astype(jnp.bfloat16)
        self.b3 = b3                                                   # (1,c2) f32

    def __call__(self, x_nchw):
        N, c1, H, W = x_nchw.shape
        th1 = _largest_divisor_tile(H, self.tile_h1)
        th2 = _largest_divisor_tile(H, self.tile_h2)

        # NCHW -> NHWC (lane-dense channels), bf16.  Column pad only the tiny
        # c1-channel network input; all other padding is produced in-kernel.
        x = jnp.transpose(x_nchw, (0, 2, 3, 1)).astype(jnp.bfloat16)
        x = jnp.pad(x, ((0, 0), (0, 0), (1, 1), (0, 0)))               # (N,H,W+2,c1)

        y1 = conv1_bn_silu(x, self.w1_mat, self.b1, th1)               # (N,H,W+2,c_) bf16
        packed = upsample_conv2_conv3(y1, self.w2_eff, self.b2, self.w3_mat,
                                      self.b3, self.tap_offsets, th2,
                                      jnp.float32)                     # (N,H,2,W,2*c2)
        out = packed.reshape(N, 2 * H, 2 * W, -1)                      # pure reshape
        return jnp.transpose(out, (0, 3, 1, 2))                        # NHWC -> NCHW

    # Pure-JAX/XLA reference with matching bf16 quantization points (weights and
    # inter-layer activations), f32 accumulation.
    def reference(self, x_nchw):
        f32 = jnp.float32

        def q(a):
            return a.astype(jnp.bfloat16).astype(f32)

        def conv_bn_silu(x, p):
            scale = p["gamma"] / jnp.sqrt(p["var"] + self.eps)
            wq = q(p["w"] * scale[:, None, None, None])
            bias = p["beta"] - p["mean"] * scale
            w_hwio = jnp.transpose(wq, (2, 3, 1, 0))
            pad = p["k"] // 2
            y = lax.conv_general_dilated(
                q(x), w_hwio, window_strides=(1, 1),
                padding=[(pad, pad), (pad, pad)],
                dimension_numbers=("NHWC", "HWIO", "NHWC"),
                precision=lax.Precision.HIGHEST)
            y = y + bias
            return y / (1.0 + jnp.exp(-y))

        x = jnp.transpose(x_nchw, (0, 2, 3, 1)).astype(f32)
        x = conv_bn_silu(x, self.cv1)
        x = jnp.repeat(jnp.repeat(x, 2, axis=1), 2, axis=2)            # nearest 2x
        x = conv_bn_silu(x, self.cv2)
        x = conv_bn_silu(x, self.cv3)
        return jnp.transpose(x, (0, 3, 1, 2))


if __name__ == "__main__":
    key = jax.random.PRNGKey(0)
    kx, kp = jax.random.split(key)

    # Small shapes: batch=2, c1=4 input channels, 16x16 spatial; c_=32, c2=32.
    N, c1, H, W = 2, 4, 16, 16
    c_, c2 = 32, 32
    x = jax.random.normal(kx, (N, c1, H, W), dtype=jnp.float32)

    # Small row tiles so the test exercises first / interior / last halo paths.
    model = Proto(c1, c_=c_, c2=c2, key=kp, tile_h1=8, tile_h2=4)

    forward = jax.jit(model.__call__)
    out = jax.block_until_ready(forward(x))
    ref = jax.block_until_ready(model.reference(x))

    assert out.shape == (N, c2, 2 * H, 2 * W), out.shape
    assert out.dtype == jnp.float32
    max_err = float(jnp.max(jnp.abs(out - ref)))
    assert bool(jnp.allclose(out, ref, atol=3e-2, rtol=3e-2)), max_err

    print("KERNEL_OK")
</pallas_src>

<mosaic_0001>
module attributes {stable_mosaic.version = 11 : i64} {
  func.func @kernel(%arg0: i32, %arg1: i32, %arg2: memref<1x8x18x4xbf16, #tpu.memory_space<vmem>>, %arg3: memref<1x1x18x4xbf16, #tpu.memory_space<vmem>>, %arg4: memref<1x1x18x4xbf16, #tpu.memory_space<vmem>>, %arg5: memref<36x32xbf16, #tpu.memory_space<vmem>>, %arg6: memref<1x32xf32, #tpu.memory_space<vmem>>, %arg7: memref<1x8x18x32xbf16, #tpu.memory_space<vmem>>) attributes {dimension_semantics = [#tpu.dimension_semantics<parallel>, #tpu.dimension_semantics<parallel>], iteration_bounds = array<i64: 2, 2>, scalar_prefetch = 0 : i64, scratch_operands = 0 : i64, tpu.core_type = #tpu.core_type<tc>, window_params = [{transform_indices = @transform_0, window_bounds = array<i64: 1, 8, 18, 4>}, {transform_indices = @transform_1, window_bounds = array<i64: 1, 1, 18, 4>}, {transform_indices = @transform_2, window_bounds = array<i64: 1, 1, 18, 4>}, {pipeline_mode = #tpu.pipeline_mode<synchronous>, transform_indices = @transform_3, window_bounds = array<i64: 36, 32>}, {pipeline_mode = #tpu.pipeline_mode<synchronous>, transform_indices = @transform_4, window_bounds = array<i64: 1, 32>}, {transform_indices = @transform_5, window_bounds = array<i64: 1, 8, 18, 32>}]} {
    %c0_i32 = arith.constant 0 : i32
    %0 = arith.cmpi eq, %arg1, %c0_i32 : i32
    %cst = arith.constant 0.000000e+00 : bf16
    %1 = vector.broadcast %cst : bf16 to vector<1x18x4xbf16>
    %c0 = arith.constant 0 : index
    %c0_0 = arith.constant 0 : index
    %c0_1 = arith.constant 0 : index
    %c0_2 = arith.constant 0 : index
    %2 = vector.load %arg3[%c0, %c0_0, %c0_1, %c0_2] : memref<1x1x18x4xbf16, #tpu.memory_space<vmem>>, vector<1x1x18x4xbf16>
    %3 = vector.shape_cast %2 : vector<1x1x18x4xbf16> to vector<1x18x4xbf16>
    %4 = arith.select %0, %1, %3 : vector<1x18x4xbf16>
    %c1_i32 = arith.constant 1 : i32
    %5 = arith.cmpi eq, %arg1, %c1_i32 : i32
    %cst_3 = arith.constant 0.000000e+00 : bf16
    %6 = vector.broadcast %cst_3 : bf16 to vector<1x18x4xbf16>
    %c0_4 = arith.constant 0 : index
    %c0_5 = arith.constant 0 : index
    %c0_6 = arith.constant 0 : index
    %c0_7 = arith.constant 0 : index
    %7 = vector.load %arg4[%c0_4, %c0_5, %c0_6, %c0_7] : memref<1x1x18x4xbf16, #tpu.memory_space<vmem>>, vector<1x1x18x4xbf16>
    %8 = vector.shape_cast %7 : vector<1x1x18x4xbf16> to vector<1x18x4xbf16>
    %9 = arith.select %5, %6, %8 : vector<1x18x4xbf16>
    %c0_8 = arith.constant 0 : index
    %c0_9 = arith.constant 0 : index
    %c0_10 = arith.constant 0 : index
    %c0_11 = arith.constant 0 : index
    %10 = vector.load %arg2[%c0_8, %c0_9, %c0_10, %c0_11] : memref<1x8x18x4xbf16, #tpu.memory_space<vmem>>, vector<1x8x18x4xbf16>
    %11 = vector.shape_cast %10 : vector<1x8x18x4xbf16> to vector<8x18x4xbf16>
    %12 = tpu.concatenate %4, %11, %9 in 0 : vector<1x18x4xbf16>, vector<8x18x4xbf16>, vector<1x18x4xbf16> -> vector<10x18x4xbf16>
    %13 = vector.extract_strided_slice %12 {offsets = [0, 0, 0], sizes = [8, 16, 4], strides = [1, 1, 1]} : vector<10x18x4xbf16> to vector<8x16x4xbf16>
    %14 = vector.shape_cast %13 : vector<8x16x4xbf16> to vector<128x4xbf16>
    %15 = vector.extract_strided_slice %12 {offsets = [0, 1, 0], sizes = [8, 16, 4], strides = [1, 1, 1]} : vector<10x18x4xbf16> to vector<8x16x4xbf16>
    %16 = vector.shape_cast %15 : vector<8x16x4xbf16> to vector<128x4xbf16>
    %17 = vector.extract_strided_slice %12 {offsets = [0, 2, 0], sizes = [8, 16, 4], strides = [1, 1, 1]} : vector<10x18x4xbf16> to vector<8x16x4xbf16>
    %18 = vector.shape_cast %17 : vector<8x16x4xbf16> to vector<128x4xbf16>
    %19 = vector.extract_strided_slice %12 {offsets = [1, 0, 0], sizes = [8, 16, 4], strides = [1, 1, 1]} : vector<10x18x4xbf16> to vector<8x16x4xbf16>
    %20 = vector.shape_cast %19 : vector<8x16x4xbf16> to vector<128x4xbf16>
    %21 = vector.extract_strided_slice %12 {offsets = [1, 1, 0], sizes = [8, 16, 4], strides = [1, 1, 1]} : vector<10x18x4xbf16> to vector<8x16x4xbf16>
    %22 = vector.shape_cast %21 : vector<8x16x4xbf16> to vector<128x4xbf16>
    %23 = vector.extract_strided_slice %12 {offsets = [1, 2, 0], sizes = [8, 16, 4], strides = [1, 1, 1]} : vector<10x18x4xbf16> to vector<8x16x4xbf16>
    %24 = vector.shape_cast %23 : vector<8x16x4xbf16> to vector<128x4xbf16>
    %25 = vector.extract_strided_slice %12 {offsets = [2, 0, 0], sizes = [8, 16, 4], strides = [1, 1, 1]} : vector<10x18x4xbf16> to vector<8x16x4xbf16>
    %26 = vector.shape_cast %25 : vector<8x16x4xbf16> to vector<128x4xbf16>
    %27 = vector.extract_strided_slice %12 {offsets = [2, 1, 0], sizes = [8, 16, 4], strides = [1, 1, 1]} : vector<10x18x4xbf16> to vector<8x16x4xbf16>
    %28 = vector.shape_cast %27 : vector<8x16x4xbf16> to vector<128x4xbf16>
    %29 = vector.extract_strided_slice %12 {offsets = [2, 2, 0], sizes = [8, 16, 4], strides = [1, 1, 1]} : vector<10x18x4xbf16> to vector<8x16x4xbf16>
    %30 = vector.shape_cast %29 : vector<8x16x4xbf16> to vector<128x4xbf16>
    %31 = tpu.concatenate %14, %16, %18, %20, %22, %24, %26, %28, %30 in 1 : vector<128x4xbf16>, vector<128x4xbf16>, vector<128x4xbf16>, vector<128x4xbf16>, vector<128x4xbf16>, vector<128x4xbf16>, vector<128x4xbf16>, vector<128x4xbf16>, vector<128x4xbf16> -> vector<128x36xbf16>
    %c0_12 = arith.constant 0 : index
    %c0_13 = arith.constant 0 : index
    %32 = vector.load %arg5[%c0_12, %c0_13] : memref<36x32xbf16, #tpu.memory_space<vmem>>, vector<36x32xbf16>
    %cst_14 = arith.constant dense<0.000000e+00> : vector<128x32xf32>
    %33 = tpu.matmul %31, %32, %cst_14 {dimension_numbers = #tpu.dot_dimension_numbers<[1], [0], [0], [1], [0, 0, 1, 1], [], []>} : vector<128x36xbf16>, vector<36x32xbf16>, vector<128x32xf32> -> vector<128x32xf32>
    %c0_15 = arith.constant 0 : index
    %c0_16 = arith.constant 0 : index
    %34 = vector.load %arg6[%c0_15, %c0_16] : memref<1x32xf32, #tpu.memory_space<vmem>>, vector<1x32xf32>
    %35 = vector.broadcast %34 : vector<1x32xf32> to vector<128x32xf32>
    %36 = arith.addf %33, %35 : vector<128x32xf32>
    %cst_17 = arith.constant 0.000000e+00 : f32
    %37 = vector.broadcast %cst_17 : f32 to vector<128x32xf32>
    %38 = arith.subf %37, %36 : vector<128x32xf32>
    %39 = math.exp %38 : vector<128x32xf32>
    %cst_18 = arith.constant 1.000000e+00 : f32
    %40 = vector.broadcast %cst_18 : f32 to vector<128x32xf32>
    %41 = arith.addf %40, %39 : vector<128x32xf32>
    %42 = tpu.reciprocal %41 {approx = true} : vector<128x32xf32> -> vector<128x32xf32>
    %43 = arith.mulf %36, %42 : vector<128x32xf32>
    %44 = vector.shape_cast %43 : vector<128x32xf32> to vector<8x16x32xf32>
    %45 = arith.truncf %44 : vector<8x16x32xf32> to vector<8x16x32xbf16>
    %c0_19 = arith.constant 0 : index
    %c0_20 = arith.constant 0 : index
    %c1 = arith.constant 1 : index
    %c0_21 = arith.constant 0 : index
    %46 = vector.load %arg7[%c0_19, %c0_20, %c1, %c0_21] : memref<1x8x18x32xbf16, #tpu.memory_space<vmem>>, vector<1x8x16x32xbf16>
    %47 = vector.shape_cast %46 : vector<1x8x16x32xbf16> to vector<8x16x32xbf16>
    %48 = vector.shape_cast %45 : vector<8x16x32xbf16> to vector<1x8x16x32xbf16>
    tpu.vector_store %arg7[%c0_19, %c0_20, %c1, %c0_21], %48 {strides = array<i32>} : memref<1x8x18x32xbf16, #tpu.memory_space<vmem>>, vector<1x8x16x32xbf16>,
    %cst_22 = arith.constant 0.000000e+00 : bf16
    %49 = vector.broadcast %cst_22 : bf16 to vector<8x1x32xbf16>
    %c0_23 = arith.constant 0 : index
    %c0_24 = arith.constant 0 : index
    %c0_25 = arith.constant 0 : index
    %c0_26 = arith.constant 0 : index
    %50 = vector.load %arg7[%c0_23, %c0_24, %c0_25, %c0_26] : memref<1x8x18x32xbf16, #tpu.memory_space<vmem>>, vector<1x8x1x32xbf16>
    %51 = vector.shape_cast %50 : vector<1x8x1x32xbf16> to vector<8x1x32xbf16>
    %52 = vector.shape_cast %49 : vector<8x1x32xbf16> to vector<1x8x1x32xbf16>
    tpu.vector_store %arg7[%c0_23, %c0_24, %c0_25, %c0_26], %52 {strides = array<i32>} : memref<1x8x18x32xbf16, #tpu.memory_space<vmem>>, vector<1x8x1x32xbf16>,
    %c0_27 = arith.constant 0 : index
    %c0_28 = arith.constant 0 : index
    %c17 = arith.constant 17 : index
    %c0_29 = arith.constant 0 : index
    %53 = vector.load %arg7[%c0_27, %c0_28, %c17, %c0_29] : memref<1x8x18x32xbf16, #tpu.memory_space<vmem>>, vector<1x8x1x32xbf16>
    %54 = vector.shape_cast %53 : vector<1x8x1x32xbf16> to vector<8x1x32xbf16>
    %55 = vector.shape_cast %49 : vector<8x1x32xbf16> to vector<1x8x1x32xbf16>
    tpu.vector_store %arg7[%c0_27, %c0_28, %c17, %c0_29], %55 {strides = array<i32>} : memref<1x8x18x32xbf16, #tpu.memory_space<vmem>>, vector<1x8x1x32xbf16>,
    return
  }
  func.func @transform_0(%arg0: i32, %arg1: i32) -> (i32, i32, i32, i32) {
    %c0_i32 = arith.constant 0 : i32
    %c0_i32_0 = arith.constant 0 : i32
    %c0_i32_1 = arith.constant 0 : i32
    return %arg0, %arg1, %c0_i32, %c0_i32_0 : i32, i32, i32, i32
  }
  func.func @transform_1(%arg0: i32, %arg1: i32) -> (i32, i32, i32, i32) {
    %c8_i32 = arith.constant 8 : i32
    %0 = arith.muli %arg1, %c8_i32 : i32
    %c1_i32 = arith.constant 1 : i32
    %1 = arith.subi %0, %c1_i32 : i32
    %c0_i32 = arith.constant 0 : i32
    %2 = arith.maxsi %1, %c0_i32 : i32
    %c0_i32_0 = arith.constant 0 : i32
    %c0_i32_1 = arith.constant 0 : i32
    %c0_i32_2 = arith.constant 0 : i32
    return %arg0, %2, %c0_i32_0, %c0_i32_1 : i32, i32, i32, i32
  }
  func.func @transform_2(%arg0: i32, %arg1: i32) -> (i32, i32, i32, i32) {
    %c1_i32 = arith.constant 1 : i32
    %0 = arith.addi %arg1, %c1_i32 : i32
    %c8_i32 = arith.constant 8 : i32
    %1 = arith.muli %0, %c8_i32 : i32
    %c15_i32 = arith.constant 15 : i32
    %2 = arith.minsi %1, %c15_i32 : i32
    %c0_i32 = arith.constant 0 : i32
    %c0_i32_0 = arith.constant 0 : i32
    %c0_i32_1 = arith.constant 0 : i32
    return %arg0, %2, %c0_i32, %c0_i32_0 : i32, i32, i32, i32
  }
  func.func @transform_3(%arg0: i32, %arg1: i32) -> (i32, i32) {
    %c0_i32 = arith.constant 0 : i32
    %c0_i32_0 = arith.constant 0 : i32
    %c0_i32_1 = arith.constant 0 : i32
    return %c0_i32, %c0_i32_0 : i32, i32
  }
  func.func @transform_4(%arg0: i32, %arg1: i32) -> (i32, i32) {
    %c0_i32 = arith.constant 0 : i32
    %c0_i32_0 = arith.constant 0 : i32
    %c0_i32_1 = arith.constant 0 : i32
    return %c0_i32, %c0_i32_0 : i32, i32
  }
  func.func @transform_5(%arg0: i32, %arg1: i32) -> (i32, i32, i32, i32) {
    %c0_i32 = arith.constant 0 : i32
    %c0_i32_0 = arith.constant 0 : i32
    %c0_i32_1 = arith.constant 0 : i32
    return %arg0, %arg1, %c0_i32, %c0_i32_0 : i32, i32, i32, i32
  }
}

module attributes {stable_mosaic.version = 11 : i64} {
  func.func @kernel(%arg0: i32, %arg1: i32, %arg2: memref<1x4x18x32xbf16, #tpu.memory_space<vmem>>, %arg3: memref<1x1x18x32xbf16, #tpu.memory_space<vmem>>, %arg4: memref<1x1x18x32xbf16, #tpu.memory_space<vmem>>, %arg5: memref<16x32x32xbf16, #tpu.memory_space<vmem>>, %arg6: memref<1x32xf32, #tpu.memory_space<vmem>>, %arg7: memref<32x32xbf16, #tpu.memory_space<vmem>>, %arg8: memref<1x32xf32, #tpu.memory_space<vmem>>, %arg9: memref<1x4x2x16x64xf32, #tpu.memory_space<vmem>>) attributes {dimension_semantics = [#tpu.dimension_semantics<parallel>, #tpu.dimension_semantics<parallel>], iteration_bounds = array<i64: 2, 4>, scalar_prefetch = 0 : i64, scratch_operands = 0 : i64, tpu.core_type = #tpu.core_type<tc>, window_params = [{transform_indices = @transform_0, window_bounds = array<i64: 1, 4, 18, 32>}, {transform_indices = @transform_1, window_bounds = array<i64: 1, 1, 18, 32>}, {transform_indices = @transform_2, window_bounds = array<i64: 1, 1, 18, 32>}, {pipeline_mode = #tpu.pipeline_mode<synchronous>, transform_indices = @transform_3, window_bounds = array<i64: 16, 32, 32>}, {pipeline_mode = #tpu.pipeline_mode<synchronous>, transform_indices = @transform_4, window_bounds = array<i64: 1, 32>}, {pipeline_mode = #tpu.pipeline_mode<synchronous>, transform_indices = @transform_5, window_bounds = array<i64: 32, 32>}, {pipeline_mode = #tpu.pipeline_mode<synchronous>, transform_indices = @transform_6, window_bounds = array<i64: 1, 32>}, {transform_indices = @transform_7, window_bounds = array<i64: 1, 4, 2, 16, 64>}]} {
    %c0_i32 = arith.constant 0 : i32
    %0 = arith.cmpi eq, %arg1, %c0_i32 : i32
    %cst = arith.constant 0.000000e+00 : bf16
    %1 = vector.broadcast %cst : bf16 to vector<1x18x32xbf16>
    %c0 = arith.constant 0 : index
    %c0_0 = arith.constant 0 : index
    %c0_1 = arith.constant 0 : index
    %c0_2 = arith.constant 0 : index
    %2 = vector.load %arg3[%c0, %c0_0, %c0_1, %c0_2] : memref<1x1x18x32xbf16, #tpu.memory_space<vmem>>, vector<1x1x18x32xbf16>
    %3 = vector.shape_cast %2 : vector<1x1x18x32xbf16> to vector<1x18x32xbf16>
    %4 = arith.select %0, %1, %3 : vector<1x18x32xbf16>
    %c3_i32 = arith.constant 3 : i32
    %5 = arith.cmpi eq, %arg1, %c3_i32 : i32
    %cst_3 = arith.constant 0.000000e+00 : bf16
    %6 = vector.broadcast %cst_3 : bf16 to vector<1x18x32xbf16>
    %c0_4 = arith.constant 0 : index
    %c0_5 = arith.constant 0 : index
    %c0_6 = arith.constant 0 : index
    %c0_7 = arith.constant 0 : index
    %7 = vector.load %arg4[%c0_4, %c0_5, %c0_6, %c0_7] : memref<1x1x18x32xbf16, #tpu.memory_space<vmem>>, vector<1x1x18x32xbf16>
    %8 = vector.shape_cast %7 : vector<1x1x18x32xbf16> to vector<1x18x32xbf16>
    %9 = arith.select %5, %6, %8 : vector<1x18x32xbf16>
    %c0_8 = arith.constant 0 : index
    %c0_9 = arith.constant 0 : index
    %c0_10 = arith.constant 0 : index
    %c0_11 = arith.constant 0 : index
    %10 = vector.load %arg2[%c0_8, %c0_9, %c0_10, %c0_11] : memref<1x4x18x32xbf16, #tpu.memory_space<vmem>>, vector<1x4x18x32xbf16>
    %11 = vector.shape_cast %10 : vector<1x4x18x32xbf16> to vector<4x18x32xbf16>
    %12 = tpu.concatenate %4, %11, %9 in 0 : vector<1x18x32xbf16>, vector<4x18x32xbf16>, vector<1x18x32xbf16> -> vector<6x18x32xbf16>
    %13 = vector.extract_strided_slice %12 {offsets = [0, 0, 0], sizes = [4, 16, 32], strides = [1, 1, 1]} : vector<6x18x32xbf16> to vector<4x16x32xbf16>
    %14 = vector.shape_cast %13 : vector<4x16x32xbf16> to vector<64x32xbf16>
    %15 = vector.extract_strided_slice %12 {offsets = [0, 1, 0], sizes = [4, 16, 32], strides = [1, 1, 1]} : vector<6x18x32xbf16> to vector<4x16x32xbf16>
    %16 = vector.shape_cast %15 : vector<4x16x32xbf16> to vector<64x32xbf16>
    %17 = vector.extract_strided_slice %12 {offsets = [0, 2, 0], sizes = [4, 16, 32], strides = [1, 1, 1]} : vector<6x18x32xbf16> to vector<4x16x32xbf16>
    %18 = vector.shape_cast %17 : vector<4x16x32xbf16> to vector<64x32xbf16>
    %19 = vector.extract_strided_slice %12 {offsets = [1, 0, 0], sizes = [4, 16, 32], strides = [1, 1, 1]} : vector<6x18x32xbf16> to vector<4x16x32xbf16>
    %20 = vector.shape_cast %19 : vector<4x16x32xbf16> to vector<64x32xbf16>
    %21 = vector.extract_strided_slice %12 {offsets = [1, 1, 0], sizes = [4, 16, 32], strides = [1, 1, 1]} : vector<6x18x32xbf16> to vector<4x16x32xbf16>
    %22 = vector.shape_cast %21 : vector<4x16x32xbf16> to vector<64x32xbf16>
    %23 = vector.extract_strided_slice %12 {offsets = [1, 2, 0], sizes = [4, 16, 32], strides = [1, 1, 1]} : vector<6x18x32xbf16> to vector<4x16x32xbf16>
    %24 = vector.shape_cast %23 : vector<4x16x32xbf16> to vector<64x32xbf16>
    %25 = vector.extract_strided_slice %12 {offsets = [2, 0, 0], sizes = [4, 16, 32], strides = [1, 1, 1]} : vector<6x18x32xbf16> to vector<4x16x32xbf16>
    %26 = vector.shape_cast %25 : vector<4x16x32xbf16> to vector<64x32xbf16>
    %27 = vector.extract_strided_slice %12 {offsets = [2, 1, 0], sizes = [4, 16, 32], strides = [1, 1, 1]} : vector<6x18x32xbf16> to vector<4x16x32xbf16>
    %28 = vector.shape_cast %27 : vector<4x16x32xbf16> to vector<64x32xbf16>
    %29 = vector.extract_strided_slice %12 {offsets = [2, 2, 0], sizes = [4, 16, 32], strides = [1, 1, 1]} : vector<6x18x32xbf16> to vector<4x16x32xbf16>
    %30 = vector.shape_cast %29 : vector<4x16x32xbf16> to vector<64x32xbf16>
    %cst_12 = arith.constant 0.000000e+00 : f32
    %31 = vector.broadcast %cst_12 : f32 to vector<64x32xf32>
    %c0_13 = arith.constant 0 : index
    %c0_14 = arith.constant 0 : index
    %c0_15 = arith.constant 0 : index
    %32 = vector.load %arg5[%c0_13, %c0_14, %c0_15] : memref<16x32x32xbf16, #tpu.memory_space<vmem>>, vector<1x32x32xbf16>
    %33 = vector.shape_cast %32 : vector<1x32x32xbf16> to vector<32x32xbf16>
    %cst_16 = arith.constant dense<0.000000e+00> : vector<64x32xf32>
    %34 = tpu.matmul %14, %33, %cst_16 {dimension_numbers = #tpu.dot_dimension_numbers<[1], [0], [0], [1], [0, 0, 1, 1], [], []>} : vector<64x32xbf16>, vector<32x32xbf16>, vector<64x32xf32> -> vector<64x32xf32>
    %35 = arith.addf %31, %34 : vector<64x32xf32>
    %c1 = arith.constant 1 : index
    %c0_17 = arith.constant 0 : index
    %c0_18 = arith.constant 0 : index
    %36 = vector.load %arg5[%c1, %c0_17, %c0_18] : memref<16x32x32xbf16, #tpu.memory_space<vmem>>, vector<1x32x32xbf16>
    %37 = vector.shape_cast %36 : vector<1x32x32xbf16> to vector<32x32xbf16>
    %cst_19 = arith.constant dense<0.000000e+00> : vector<64x32xf32>
    %38 = tpu.matmul %16, %37, %cst_19 {dimension_numbers = #tpu.dot_dimension_numbers<[1], [0], [0], [1], [0, 0, 1, 1], [], []>} : vector<64x32xbf16>, vector<32x32xbf16>, vector<64x32xf32> -> vector<64x32xf32>
    %39 = arith.addf %35, %38 : vector<64x32xf32>
    %c2 = arith.constant 2 : index
    %c0_20 = arith.constant 0 : index
    %c0_21 = arith.constant 0 : index
    %40 = vector.load %arg5[%c2, %c0_20, %c0_21] : memref<16x32x32xbf16, #tpu.memory_space<vmem>>, vector<1x32x32xbf16>
    %41 = vector.shape_cast %40 : vector<1x32x32xbf16> to vector<32x32xbf16>
    %cst_22 = arith.constant dense<0.000000e+00> : vector<64x32xf32>
    %42 = tpu.matmul %20, %41, %cst_22 {dimension_numbers = #tpu.dot_dimension_numbers<[1], [0], [0], [1], [0, 0, 1, 1], [], []>} : vector<64x32xbf16>, vector<32x32xbf16>, vector<64x32xf32> -> vector<64x32xf32>
    %43 = arith.addf %39, %42 : vector<64x32xf32>
    %c3 = arith.constant 3 : index
    %c0_23 = arith.constant 0 : index
    %c0_24 = arith.constant 0 : index
    %44 = vector.load %arg5[%c3, %c0_23, %c0_24] : memref<16x32x32xbf16, #tpu.memory_space<vmem>>, vector<1x32x32xbf16>
    %45 = vector.shape_cast %44 : vector<1x32x32xbf16> to vector<32x32xbf16>
    %cst_25 = arith.constant dense<0.000000e+00> : vector<64x32xf32>
    %46 = tpu.matmul %22, %45, %cst_25 {dimension_numbers = #tpu.dot_dimension_numbers<[1], [0], [0], [1], [0, 0, 1, 1], [], []>} : vector<64x32xbf16>, vector<32x32xbf16>, vector<64x32xf32> -> vector<64x32xf32>
    %47 = arith.addf %43, %46 : vector<64x32xf32>
    %c0_26 = arith.constant 0 : index
    %c0_27 = arith.constant 0 : index
    %48 = vector.load %arg6[%c0_26, %c0_27] : memref<1x32xf32, #tpu.memory_space<vmem>>, vector<1x32xf32>
    %49 = vector.broadcast %48 : vector<1x32xf32> to vector<64x32xf32>
    %50 = arith.addf %47, %49 : vector<64x32xf32>
    %cst_28 = arith.constant 0.000000e+00 : f32
    %51 = vector.broadcast %cst_28 : f32 to vector<64x32xf32>
    %52 = arith.subf %51, %50 : vector<64x32xf32>
    %53 = math.exp %52 : vector<64x32xf32>
    %cst_29 = arith.constant 1.000000e+00 : f32
    %54 = vector.broadcast %cst_29 : f32 to vector<64x32xf32>
    %55 = arith.addf %54, %53 : vector<64x32xf32>
    %56 = tpu.reciprocal %55 {approx = true} : vector<64x32xf32> -> vector<64x32xf32>
    %57 = arith.mulf %50, %56 : vector<64x32xf32>
    %58 = arith.truncf %57 : vector<64x32xf32> to vector<64x32xbf16>
    %c0_30 = arith.constant 0 : index
    %c0_31 = arith.constant 0 : index
    %59 = vector.load %arg7[%c0_30, %c0_31] : memref<32x32xbf16, #tpu.memory_space<vmem>>, vector<32x32xbf16>
    %cst_32 = arith.constant dense<0.000000e+00> : vector<64x32xf32>
    %60 = tpu.matmul %58, %59, %cst_32 {dimension_numbers = #tpu.dot_dimension_numbers<[1], [0], [0], [1], [0, 0, 1, 1], [], []>} : vector<64x32xbf16>, vector<32x32xbf16>, vector<64x32xf32> -> vector<64x32xf32>
    %c0_33 = arith.constant 0 : index
    %c0_34 = arith.constant 0 : index
    %61 = vector.load %arg8[%c0_33, %c0_34] : memref<1x32xf32, #tpu.memory_space<vmem>>, vector<1x32xf32>
    %62 = vector.broadcast %61 : vector<1x32xf32> to vector<64x32xf32>
    %63 = arith.addf %60, %62 : vector<64x32xf32>
    %cst_35 = arith.constant 0.000000e+00 : f32
    %64 = vector.broadcast %cst_35 : f32 to vector<64x32xf32>
    %65 = arith.subf %64, %63 : vector<64x32xf32>
    %66 = math.exp %65 : vector<64x32xf32>
    %cst_36 = arith.constant 1.000000e+00 : f32
    %67 = vector.broadcast %cst_36 : f32 to vector<64x32xf32>
    %68 = arith.addf %67, %66 : vector<64x32xf32>
    %69 = tpu.reciprocal %68 {approx = true} : vector<64x32xf32> -> vector<64x32xf32>
    %70 = arith.mulf %63, %69 : vector<64x32xf32>
    %71 = vector.shape_cast %70 : vector<64x32xf32> to vector<4x16x32xf32>
    %cst_37 = arith.constant 0.000000e+00 : f32
    %72 = vector.broadcast %cst_37 : f32 to vector<64x32xf32>
    %c4 = arith.constant 4 : index
    %c0_38 = arith.constant 0 : index
    %c0_39 = arith.constant 0 : index
    %73 = vector.load %arg5[%c4, %c0_38, %c0_39] : memref<16x32x32xbf16, #tpu.memory_space<vmem>>, vector<1x32x32xbf16>
    %74 = vector.shape_cast %73 : vector<1x32x32xbf16> to vector<32x32xbf16>
    %cst_40 = arith.constant dense<0.000000e+00> : vector<64x32xf32>
    %75 = tpu.matmul %16, %74, %cst_40 {dimension_numbers = #tpu.dot_dimension_numbers<[1], [0], [0], [1], [0, 0, 1, 1], [], []>} : vector<64x32xbf16>, vector<32x32xbf16>, vector<64x32xf32> -> vector<64x32xf32>
    %76 = arith.addf %72, %75 : vector<64x32xf32>
    %c5 = arith.constant 5 : index
    %c0_41 = arith.constant 0 : index
    %c0_42 = arith.constant 0 : index
    %77 = vector.load %arg5[%c5, %c0_41, %c0_42] : memref<16x32x32xbf16, #tpu.memory_space<vmem>>, vector<1x32x32xbf16>
    %78 = vector.shape_cast %77 : vector<1x32x32xbf16> to vector<32x32xbf16>
    %cst_43 = arith.constant dense<0.000000e+00> : vector<64x32xf32>
    %79 = tpu.matmul %18, %78, %cst_43 {dimension_numbers = #tpu.dot_dimension_numbers<[1], [0], [0], [1], [0, 0, 1, 1], [], []>} : vector<64x32xbf16>, vector<32x32xbf16>, vector<64x32xf32> -> vector<64x32xf32>
    %80 = arith.addf %76, %79 : vector<64x32xf32>
    %c6 = arith.constant 6 : index
    %c0_44 = arith.constant 0 : index
    %c0_45 = arith.constant 0 : index
    %81 = vector.load %arg5[%c6, %c0_44, %c0_45] : memref<16x32x32xbf16, #tpu.memory_space<vmem>>, vector<1x32x32xbf16>
    %82 = vector.shape_cast %81 : vector<1x32x32xbf16> to vector<32x32xbf16>
    %cst_46 = arith.constant dense<0.000000e+00> : vector<64x32xf32>
    %83 = tpu.matmul %22, %82, %cst_46 {dimension_numbers = #tpu.dot_dimension_numbers<[1], [0], [0], [1], [0, 0, 1, 1], [], []>} : vector<64x32xbf16>, vector<32x32xbf16>, vector<64x32xf32> -> vector<64x32xf32>
    %84 = arith.addf %80, %83 : vector<64x32xf32>
    %c7 = arith.constant 7 : index
    %c0_47 = arith.constant 0 : index
    %c0_48 = arith.constant 0 : index
    %85 = vector.load %arg5[%c7, %c0_47, %c0_48] : memref<16x32x32xbf16, #tpu.memory_space<vmem>>, vector<1x32x32xbf16>
    %86 = vector.shape_cast %85 : vector<1x32x32xbf16> to vector<32x32xbf16>
    %cst_49 = arith.constant dense<0.000000e+00> : vector<64x32xf32>
    %87 = tpu.matmul %24, %86, %cst_49 {dimension_numbers = #tpu.dot_dimension_numbers<[1], [0], [0], [1], [0, 0, 1, 1], [], []>} : vector<64x32xbf16>, vector<32x32xbf16>, vector<64x32xf32> -> vector<64x32xf32>
    %88 = arith.addf %84, %87 : vector<64x32xf32>
    %c0_50 = arith.constant 0 : index
    %c0_51 = arith.constant 0 : index
    %89 = vector.load %arg6[%c0_50, %c0_51] : memref<1x32xf32, #tpu.memory_space<vmem>>, vector<1x32xf32>
    %90 = vector.broadcast %89 : vector<1x32xf32> to vector<64x32xf32>
    %91 = arith.addf %88, %90 : vector<64x32xf32>
    %cst_52 = arith.constant 0.000000e+00 : f32
    %92 = vector.broadcast %cst_52 : f32 to vector<64x32xf32>
    %93 = arith.subf %92, %91 : vector<64x32xf32>
    %94 = math.exp %93 : vector<64x32xf32>
    %cst_53 = arith.constant 1.000000e+00 : f32
    %95 = vector.broadcast %cst_53 : f32 to vector<64x32xf32>
    %96 = arith.addf %95, %94 : vector<64x32xf32>
    %97 = tpu.reciprocal %96 {approx = true} : vector<64x32xf32> -> vector<64x32xf32>
    %98 = arith.mulf %91, %97 : vector<64x32xf32>
    %99 = arith.truncf %98 : vector<64x32xf32> to vector<64x32xbf16>
    %c0_54 = arith.constant 0 : index
    %c0_55 = arith.constant 0 : index
    %100 = vector.load %arg7[%c0_54, %c0_55] : memref<32x32xbf16, #tpu.memory_space<vmem>>, vector<32x32xbf16>
    %cst_56 = arith.constant dense<0.000000e+00> : vector<64x32xf32>
    %101 = tpu.matmul %99, %100, %cst_56 {dimension_numbers = #tpu.dot_dimension_numbers<[1], [0], [0], [1], [0, 0, 1, 1], [], []>} : vector<64x32xbf16>, vector<32x32xbf16>, vector<64x32xf32> -> vector<64x32xf32>
    %c0_57 = arith.constant 0 : index
    %c0_58 = arith.constant 0 : index
    %102 = vector.load %arg8[%c0_57, %c0_58] : memref<1x32xf32, #tpu.memory_space<vmem>>, vector<1x32xf32>
    %103 = vector.broadcast %102 : vector<1x32xf32> to vector<64x32xf32>
    %104 = arith.addf %101, %103 : vector<64x32xf32>
    %cst_59 = arith.constant 0.000000e+00 : f32
    %105 = vector.broadcast %cst_59 : f32 to vector<64x32xf32>
    %106 = arith.subf %105, %104 : vector<64x32xf32>
    %107 = math.exp %106 : vector<64x32xf32>
    %cst_60 = arith.constant 1.000000e+00 : f32
    %108 = vector.broadcast %cst_60 : f32 to vector<64x32xf32>
    %109 = arith.addf %108, %107 : vector<64x32xf32>
    %110 = tpu.reciprocal %109 {approx = true} : vector<64x32xf32> -> vector<64x32xf32>
    %111 = arith.mulf %104, %110 : vector<64x32xf32>
    %112 = vector.shape_cast %111 : vector<64x32xf32> to vector<4x16x32xf32>
    %cst_61 = arith.constant 0.000000e+00 : f32
    %113 = vector.broadcast %cst_61 : f32 to vector<64x32xf32>
    %c8 = arith.constant 8 : index
    %c0_62 = arith.constant 0 : index
    %c0_63 = arith.constant 0 : index
    %114 = vector.load %arg5[%c8, %c0_62, %c0_63] : memref<16x32x32xbf16, #tpu.memory_space<vmem>>, vector<1x32x32xbf16>
    %115 = vector.shape_cast %114 : vector<1x32x32xbf16> to vector<32x32xbf16>
    %cst_64 = arith.constant dense<0.000000e+00> : vector<64x32xf32>
    %116 = tpu.matmul %20, %115, %cst_64 {dimension_numbers = #tpu.dot_dimension_numbers<[1], [0], [0], [1], [0, 0, 1, 1], [], []>} : vector<64x32xbf16>, vector<32x32xbf16>, vector<64x32xf32> -> vector<64x32xf32>
    %117 = arith.addf %113, %116 : vector<64x32xf32>
    %c9 = arith.constant 9 : index
    %c0_65 = arith.constant 0 : index
    %c0_66 = arith.constant 0 : index
    %118 = vector.load %arg5[%c9, %c0_65, %c0_66] : memref<16x32x32xbf16, #tpu.memory_space<vmem>>, vector<1x32x32xbf16>
    %119 = vector.shape_cast %118 : vector<1x32x32xbf16> to vector<32x32xbf16>
    %cst_67 = arith.constant dense<0.000000e+00> : vector<64x32xf32>
    %120 = tpu.matmul %22, %119, %cst_67 {dimension_numbers = #tpu.dot_dimension_numbers<[1], [0], [0], [1], [0, 0, 1, 1], [], []>} : vector<64x32xbf16>, vector<32x32xbf16>, vector<64x32xf32> -> vector<64x32xf32>
    %121 = arith.addf %117, %120 : vector<64x32xf32>
    %c10 = arith.constant 10 : index
    %c0_68 = arith.constant 0 : index
    %c0_69 = arith.constant 0 : index
    %122 = vector.load %arg5[%c10, %c0_68, %c0_69] : memref<16x32x32xbf16, #tpu.memory_space<vmem>>, vector<1x32x32xbf16>
    %123 = vector.shape_cast %122 : vector<1x32x32xbf16> to vector<32x32xbf16>
    %cst_70 = arith.constant dense<0.000000e+00> : vector<64x32xf32>
    %124 = tpu.matmul %26, %123, %cst_70 {dimension_numbers = #tpu.dot_dimension_numbers<[1], [0], [0], [1], [0, 0, 1, 1], [], []>} : vector<64x32xbf16>, vector<32x32xbf16>, vector<64x32xf32> -> vector<64x32xf32>
    %125 = arith.addf %121, %124 : vector<64x32xf32>
    %c11 = arith.constant 11 : index
    %c0_71 = arith.constant 0 : index
    %c0_72 = arith.constant 0 : index
    %126 = vector.load %arg5[%c11, %c0_71, %c0_72] : memref<16x32x32xbf16, #tpu.memory_space<vmem>>, vector<1x32x32xbf16>
    %127 = vector.shape_cast %126 : vector<1x32x32xbf16> to vector<32x32xbf16>
    %cst_73 = arith.constant dense<0.000000e+00> : vector<64x32xf32>
    %128 = tpu.matmul %28, %127, %cst_73 {dimension_numbers = #tpu.dot_dimension_numbers<[1], [0], [0], [1], [0, 0, 1, 1], [], []>} : vector<64x32xbf16>, vector<32x32xbf16>, vector<64x32xf32> -> vector<64x32xf32>
    %129 = arith.addf %125, %128 : vector<64x32xf32>
    %c0_74 = arith.constant 0 : index
    %c0_75 = arith.constant 0 : index
    %130 = vector.load %arg6[%c0_74, %c0_75] : memref<1x32xf32, #tpu.memory_space<vmem>>, vector<1x32xf32>
    %131 = vector.broadcast %130 : vector<1x32xf32> to vector<64x32xf32>
    %132 = arith.addf %129, %131 : vector<64x32xf32>
    %cst_76 = arith.constant 0.000000e+00 : f32
    %133 = vector.broadcast %cst_76 : f32 to vector<64x32xf32>
    %134 = arith.subf %133, %132 : vector<64x32xf32>
    %135 = math.exp %134 : vector<64x32xf32>
    %cst_77 = arith.constant 1.000000e+00 : f32
    %136 = vector.broadcast %cst_77 : f32 to vector<64x32xf32>
    %137 = arith.addf %136, %135 : vector<64x32xf32>
    %138 = tpu.reciprocal %137 {approx = true} : vector<64x32xf32> -> vector<64x32xf32>
    %139 = arith.mulf %132, %138 : vector<64x32xf32>
    %140 = arith.truncf %139 : vector<64x32xf32> to vector<64x32xbf16>
    %c0_78 = arith.constant 0 : index
    %c0_79 = arith.constant 0 : index
    %141 = vector.load %arg7[%c0_78, %c0_79] : memref<32x32xbf16, #tpu.memory_space<vmem>>, vector<32x32xbf16>
    %cst_80 = arith.constant dense<0.000000e+00> : vector<64x32xf32>
    %142 = tpu.matmul %140, %141, %cst_80 {dimension_numbers = #tpu.dot_dimension_numbers<[1], [0], [0], [1], [0, 0, 1, 1], [], []>} : vector<64x32xbf16>, vector<32x32xbf16>, vector<64x32xf32> -> vector<64x32xf32>
    %c0_81 = arith.constant 0 : index
    %c0_82 = arith.constant 0 : index
    %143 = vector.load %arg8[%c0_81, %c0_82] : memref<1x32xf32, #tpu.memory_space<vmem>>, vector<1x32xf32>
    %144 = vector.broadcast %143 : vector<1x32xf32> to vector<64x32xf32>
    %145 = arith.addf %142, %144 : vector<64x32xf32>
    %cst_83 = arith.constant 0.000000e+00 : f32
    %146 = vector.broadcast %cst_83 : f32 to vector<64x32xf32>
    %147 = arith.subf %146, %145 : vector<64x32xf32>
    %148 = math.exp %147 : vector<64x32xf32>
    %cst_84 = arith.constant 1.000000e+00 : f32
    %149 = vector.broadcast %cst_84 : f32 to vector<64x32xf32>
    %150 = arith.addf %149, %148 : vector<64x32xf32>
    %151 = tpu.reciprocal %150 {approx = true} : vector<64x32xf32> -> vector<64x32xf32>
    %152 = arith.mulf %145, %151 : vector<64x32xf32>
    %153 = vector.shape_cast %152 : vector<64x32xf32> to vector<4x16x32xf32>
    %cst_85 = arith.constant 0.000000e+00 : f32
    %154 = vector.broadcast %cst_85 : f32 to vector<64x32xf32>
    %c12 = arith.constant 12 : index
    %c0_86 = arith.constant 0 : index
    %c0_87 = arith.constant 0 : index
    %155 = vector.load %arg5[%c12, %c0_86, %c0_87] : memref<16x32x32xbf16, #tpu.memory_space<vmem>>, vector<1x32x32xbf16>
    %156 = vector.shape_cast %155 : vector<1x32x32xbf16> to vector<32x32xbf16>
    %cst_88 = arith.constant dense<0.000000e+00> : vector<64x32xf32>
    %157 = tpu.matmul %22, %156, %cst_88 {dimension_numbers = #tpu.dot_dimension_numbers<[1], [0], [0], [1], [0, 0, 1, 1], [], []>} : vector<64x32xbf16>, vector<32x32xbf16>, vector<64x32xf32> -> vector<64x32xf32>
    %158 = arith.addf %154, %157 : vector<64x32xf32>
    %c13 = arith.constant 13 : index
    %c0_89 = arith.constant 0 : index
    %c0_90 = arith.constant 0 : index
    %159 = vector.load %arg5[%c13, %c0_89, %c0_90] : memref<16x32x32xbf16, #tpu.memory_space<vmem>>, vector<1x32x32xbf16>
    %160 = vector.shape_cast %159 : vector<1x32x32xbf16> to vector<32x32xbf16>
    %cst_91 = arith.constant dense<0.000000e+00> : vector<64x32xf32>
    %161 = tpu.matmul %24, %160, %cst_91 {dimension_numbers = #tpu.dot_dimension_numbers<[1], [0], [0], [1], [0, 0, 1, 1], [], []>} : vector<64x32xbf16>, vector<32x32xbf16>, vector<64x32xf32> -> vector<64x32xf32>
    %162 = arith.addf %158, %161 : vector<64x32xf32>
    %c14 = arith.constant 14 : index
    %c0_92 = arith.constant 0 : index
    %c0_93 = arith.constant 0 : index
    %163 = vector.load %arg5[%c14, %c0_92, %c0_93] : memref<16x32x32xbf16, #tpu.memory_space<vmem>>, vector<1x32x32xbf16>
    %164 = vector.shape_cast %163 : vector<1x32x32xbf16> to vector<32x32xbf16>
    %cst_94 = arith.constant dense<0.000000e+00> : vector<64x32xf32>
    %165 = tpu.matmul %28, %164, %cst_94 {dimension_numbers = #tpu.dot_dimension_numbers<[1], [0], [0], [1], [0, 0, 1, 1], [], []>} : vector<64x32xbf16>, vector<32x32xbf16>, vector<64x32xf32> -> vector<64x32xf32>
    %166 = arith.addf %162, %165 : vector<64x32xf32>
    %c15 = arith.constant 15 : index
    %c0_95 = arith.constant 0 : index
    %c0_96 = arith.constant 0 : index
    %167 = vector.load %arg5[%c15, %c0_95, %c0_96] : memref<16x32x32xbf16, #tpu.memory_space<vmem>>, vector<1x32x32xbf16>
    %168 = vector.shape_cast %167 : vector<1x32x32xbf16> to vector<32x32xbf16>
    %cst_97 = arith.constant dense<0.000000e+00> : vector<64x32xf32>
    %169 = tpu.matmul %30, %168, %cst_97 {dimension_numbers = #tpu.dot_dimension_numbers<[1], [0], [0], [1], [0, 0, 1, 1], [], []>} : vector<64x32xbf16>, vector<32x32xbf16>, vector<64x32xf32> -> vector<64x32xf32>
    %170 = arith.addf %166, %169 : vector<64x32xf32>
    %c0_98 = arith.constant 0 : index
    %c0_99 = arith.constant 0 : index
    %171 = vector.load %arg6[%c0_98, %c0_99] : memref<1x32xf32, #tpu.memory_space<vmem>>, vector<1x32xf32>
    %172 = vector.broadcast %171 : vector<1x32xf32> to vector<64x32xf32>
    %173 = arith.addf %170, %172 : vector<64x32xf32>
    %cst_100 = arith.constant 0.000000e+00 : f32
    %174 = vector.broadcast %cst_100 : f32 to vector<64x32xf32>
    %175 = arith.subf %174, %173 : vector<64x32xf32>
    %176 = math.exp %175 : vector<64x32xf32>
    %cst_101 = arith.constant 1.000000e+00 : f32
    %177 = vector.broadcast %cst_101 : f32 to vector<64x32xf32>
    %178 = arith.addf %177, %176 : vector<64x32xf32>
    %179 = tpu.reciprocal %178 {approx = true} : vector<64x32xf32> -> vector<64x32xf32>
    %180 = arith.mulf %173, %179 : vector<64x32xf32>
    %181 = arith.truncf %180 : vector<64x32xf32> to vector<64x32xbf16>
    %c0_102 = arith.constant 0 : index
    %c0_103 = arith.constant 0 : index
    %182 = vector.load %arg7[%c0_102, %c0_103] : memref<32x32xbf16, #tpu.memory_space<vmem>>, vector<32x32xbf16>
    %cst_104 = arith.constant dense<0.000000e+00> : vector<64x32xf32>
    %183 = tpu.matmul %181, %182, %cst_104 {dimension_numbers = #tpu.dot_dimension_numbers<[1], [0], [0], [1], [0, 0, 1, 1], [], []>} : vector<64x32xbf16>, vector<32x32xbf16>, vector<64x32xf32> -> vector<64x32xf32>
    %c0_105 = arith.constant 0 : index
    %c0_106 = arith.constant 0 : index
    %184 = vector.load %arg8[%c0_105, %c0_106] : memref<1x32xf32, #tpu.memory_space<vmem>>, vector<1x32xf32>
    %185 = vector.broadcast %184 : vector<1x32xf32> to vector<64x32xf32>
    %186 = arith.addf %183, %185 : vector<64x32xf32>
    %cst_107 = arith.constant 0.000000e+00 : f32
    %187 = vector.broadcast %cst_107 : f32 to vector<64x32xf32>
    %188 = arith.subf %187, %186 : vector<64x32xf32>
    %189 = math.exp %188 : vector<64x32xf32>
    %cst_108 = arith.constant 1.000000e+00 : f32
    %190 = vector.broadcast %cst_108 : f32 to vector<64x32xf32>
    %191 = arith.addf %190, %189 : vector<64x32xf32>
    %192 = tpu.reciprocal %191 {approx = true} : vector<64x32xf32> -> vector<64x32xf32>
    %193 = arith.mulf %186, %192 : vector<64x32xf32>
    %194 = vector.shape_cast %193 : vector<64x32xf32> to vector<4x16x32xf32>
    %195 = tpu.concatenate %71, %112 in 2 : vector<4x16x32xf32>, vector<4x16x32xf32> -> vector<4x16x64xf32>
    %196 = tpu.concatenate %153, %194 in 2 : vector<4x16x32xf32>, vector<4x16x32xf32> -> vector<4x16x64xf32>
    %c0_109 = arith.constant 0 : index
    %c0_110 = arith.constant 0 : index
    %c0_111 = arith.constant 0 : index
    %c0_112 = arith.constant 0 : index
    %c0_113 = arith.constant 0 : index
    %197 = vector.load %arg9[%c0_109, %c0_110, %c0_111, %c0_112, %c0_113] : memref<1x4x2x16x64xf32, #tpu.memory_space<vmem>>, vector<1x4x1x16x64xf32>
    %198 = vector.shape_cast %197 : vector<1x4x1x16x64xf32> to vector<4x16x64xf32>
    %199 = vector.shape_cast %195 : vector<4x16x64xf32> to vector<1x4x1x16x64xf32>
    tpu.vector_store %arg9[%c0_109, %c0_110, %c0_111, %c0_112, %c0_113], %199 {strides = array<i32>} : memref<1x4x2x16x64xf32, #tpu.memory_space<vmem>>, vector<1x4x1x16x64xf32>,
    %c0_114 = arith.constant 0 : index
    %c0_115 = arith.constant 0 : index
    %c1_116 = arith.constant 1 : index
    %c0_117 = arith.constant 0 : index
    %c0_118 = arith.constant 0 : index
    %200 = vector.load %arg9[%c0_114, %c0_115, %c1_116, %c0_117, %c0_118] : memref<1x4x2x16x64xf32, #tpu.memory_space<vmem>>, vector<1x4x1x16x64xf32>
    %201 = vector.shape_cast %200 : vector<1x4x1x16x64xf32> to vector<4x16x64xf32>
    %202 = vector.shape_cast %196 : vector<4x16x64xf32> to vector<1x4x1x16x64xf32>
    tpu.vector_store %arg9[%c0_114, %c0_115, %c1_116, %c0_117, %c0_118], %202 {strides = array<i32>} : memref<1x4x2x16x64xf32, #tpu.memory_space<vmem>>, vector<1x4x1x16x64xf32>,
    return
  }
  func.func @transform_0(%arg0: i32, %arg1: i32) -> (i32, i32, i32, i32) {
    %c0_i32 = arith.constant 0 : i32
    %c0_i32_0 = arith.constant 0 : i32
    %c0_i32_1 = arith.constant 0 : i32
    return %arg0, %arg1, %c0_i32, %c0_i32_0 : i32, i32, i32, i32
  }
  func.func @transform_1(%arg0: i32, %arg1: i32) -> (i32, i32, i32, i32) {
    %c4_i32 = arith.constant 4 : i32
    %0 = arith.muli %arg1, %c4_i32 : i32
    %c1_i32 = arith.constant 1 : i32
    %1 = arith.subi %0, %c1_i32 : i32
    %c0_i32 = arith.constant 0 : i32
    %2 = arith.maxsi %1, %c0_i32 : i32
    %c0_i32_0 = arith.constant 0 : i32
    %c0_i32_1 = arith.constant 0 : i32
    %c0_i32_2 = arith.constant 0 : i32
    return %arg0, %2, %c0_i32_0, %c0_i32_1 : i32, i32, i32, i32
  }
  func.func @transform_2(%arg0: i32, %arg1: i32) -> (i32, i32, i32, i32) {
    %c1_i32 = arith.constant 1 : i32
    %0 = arith.addi %arg1, %c1_i32 : i32
    %c4_i32 = arith.constant 4 : i32
    %1 = arith.muli %0, %c4_i32 : i32
    %c15_i32 = arith.constant 15 : i32
    %2 = arith.minsi %1, %c15_i32 : i32
    %c0_i32 = arith.constant 0 : i32
    %c0_i32_0 = arith.constant 0 : i32
    %c0_i32_1 = arith.constant 0 : i32
    return %arg0, %2, %c0_i32, %c0_i32_0 : i32, i32, i32, i32
  }
  func.func @transform_3(%arg0: i32, %arg1: i32) -> (i32, i32, i32) {
    %c0_i32 = arith.constant 0 : i32
    %c0_i32_0 = arith.constant 0 : i32
    %c0_i32_1 = arith.constant 0 : i32
    %c0_i32_2 = arith.constant 0 : i32
    return %c0_i32, %c0_i32_0, %c0_i32_1 : i32, i32, i32
  }
  func.func @transform_4(%arg0: i32, %arg1: i32) -> (i32, i32) {
    %c0_i32 = arith.constant 0 : i32
    %c0_i32_0 = arith.constant 0 : i32
    %c0_i32_1 = arith.constant 0 : i32
    return %c0_i32, %c0_i32_0 : i32, i32
  }
  func.func @transform_5(%arg0: i32, %arg1: i32) -> (i32, i32) {
    %c0_i32 = arith.constant 0 : i32
    %c0_i32_0 = arith.constant 0 : i32
    %c0_i32_1 = arith.constant 0 : i32
    return %c0_i32, %c0_i32_0 : i32, i32
  }
  func.func @transform_6(%arg0: i32, %arg1: i32) -> (i32, i32) {
    %c0_i32 = arith.constant 0 : i32
    %c0_i32_0 = arith.constant 0 : i32
    %c0_i32_1 = arith.constant 0 : i32
    return %c0_i32, %c0_i32_0 : i32, i32
  }
  func.func @transform_7(%arg0: i32, %arg1: i32) -> (i32, i32, i32, i32, i32) {
    %c0_i32 = arith.constant 0 : i32
    %c0_i32_0 = arith.constant 0 : i32
    %c0_i32_1 = arith.constant 0 : i32
    %c0_i32_2 = arith.constant 0 : i32
    return %arg0, %arg1, %c0_i32, %c0_i32_0, %c0_i32_1 : i32, i32, i32, i32, i32
  }
}

</mosaic_0001>

<bundles_post_ra>
// kernel: a_call__.2
= control target key start
LH: loop header
LB: loop body
LE: loop exit
PB: predicated region body
PF: predicated region fallthrough
CT: control target
= control target key end

     0   :  { %s2218_s18 = smov 0   ;;  %s2220_s19 = smov 0   ;;  %s3171_s0 = inlined_call_operand.vmem [shape: bf16[2,16,18,4], index: 0, kind: input, shape index: {}, may-alias: {0,1,2}]   ;;  %s3172_s1 = inlined_call_operand.vmem [shape: bf16[2,16,18,4], index: 1, kind: input, shape index: {}, may-alias: {0,1,2}]   ;;  %s3173_s2 = inlined_call_operand.vmem [shape: bf16[2,16,18,4], index: 2, kind: input, shape index: {}, may-alias: {0,1,2}]   ;;  %s3174_s3 = inlined_call_operand.vmem [shape: bf16[36,32], index: 3, kind: input, shape index: {}]   ;;  %s3175_s4 = inlined_call_operand.vmem [shape: f32[1,32], index: 4, kind: input, shape index: {}]   ;;  %s3176_s5 = inlined_call_operand.vmem [shape: bf16[2,16,18,32], index: 5, kind: output, shape index: {}]  }
   0x1   :  { %s2222_s20 = smov 0   ;;  %s2224_s21 = smov 0  }
   0x2   :  { %s2226_s22 = smov 0  }
   0x3 LB: > { %s24_s23 = sadd.s32 1, %s2170_s20  ;;  %s27_s24 = sadd.s32 1, %s2174_s21  ;;  %s2178_s22 = sphi %s2226_s22, %s15_s22   ;;  %s2174_s21 = sphi %s2224_s21, %s3195_s21   ;;  %s2170_s20 = sphi %s2222_s20, %s3194_s20   ;;  %s2166_s19 = sphi %s2220_s19, %s3193_s19   ;;  %s2162_s18 = sphi %s2218_s18, %s3192_s18  }
   0x4   : > { %p25_p0 = scmp.ge.s32.totalorder %s24_s23, 2  ;;  %p1860_p1 = scmp.ge.s32.totalorder %s2178_s22, 1 }
   0x5   : > { %p273_p2 = scmp.lt.s32.totalorder %s2178_s22, 5 }
   0x6   : > { %s3197_s23 = smov (%p25_p0, %s24_s23), 0  ;;  %s3199_s24 = smov (!%p25_p0, %s27_s24), %s2174_s21 }
   0x7   : > { %p274_p3 = pnand %p1860_p1, %p273_p2  ;;  %p29_p4 = scmp.ge.s32.totalorder %s3199_s24, 2 }
   0x8   : > { %s2251_s25 = sshll.u32 (!%p274_p3), %s2162_s18, 3  ;;  %p338_p5 = scmp.lt.s32.totalorder (!%p274_p3), %s2166_s19, 1 }
   0x9   : > { %s3201_s24 = smov (%p29_p4, %s3199_s24), 0  ;;  %277 = sbr.rel (%p274_p3) target bundleno = 540 (0x21c), region = 40 }
   0xa   : > { %p340_p6 = scmp.lt.s32.totalorder (!%p274_p3), %s2251_s25, 15  ;;  %s2258_s29 = sadd.s32 (!%p274_p3), 4294967295, %s2251_s25 }
   0xb   : > { %p350_p7 = scmp.gt.s32.totalorder (!%p274_p3), %s2258_s29, 0  ;;  %p1865_p8 = scmp.lt.s32.totalorder (!%p274_p3), %s2258_s29, 15 }
   0xc   : > { %s2180_s11 = smov (!%p274_p3), 12   ;;  %p394_p9 = scmp.eq.s32.totalorder (!%p274_p3), %s2162_s18, 0 }
   0xd   : > { %s2181_s16 = smov (!%p274_p3), 8   ;;  %p404_p11 = scmp.eq.s32.totalorder (!%p274_p3), %s2162_s18, 1 }
   0xe   : > { %s3203_s19 = smov (!%p338_p5, %s2166_s19), 1  ;;  %vm657_vm0 = vcmask 1042432   ;;  %vm658_vm1 = vcmask 1046532   ;;  %vm438_vm3 = vsmask.f32 3328  ;;  %s2186_s18 = smov 28  }
   0xf   : > { %s341_s26 = scalar_select %p340_p6, %s2251_s25, 15  ;;  %vm2324_vm2 = vmor %vm657_vm0, %vm658_vm1  ;;  %vm439_vm4 = vsmask.f32 7440  ;;  %vm1190_vm8 = vcmask 1041408   ;;  %vm1002_vm9 = vcmask 31744   ;;  %vm1027_vm10 = vcmask 64512  }
  0x10   : > { %s2255_s27 = smul.u32 48, %s3203_s19  ;;  %vm2403_vm6 = vmor %vm438_vm3, %vm439_vm4  ;;  %s2185_s19 = smov 24   ;;  %vm1044_vm11 = vcmask 97280   ;;  %vm1078_vm12 = vcmask 162816   ;;  %vm1061_vm13 = vcmask 130048   ;;  %vm1095_vm14 = vcmask 195584  }
  0x11   : > { %s2013_s28 = smul.u32 3, %s341_s26  ;;  %vm1112_vm15 = vcmask 228352   ;;  %vm1129_vm0 = vcmask 261120   ;;  %vm1173_vm1 = vcmask 293888   ;;  %vm1599_vm3 = vsmask.f32 7938 }
  0x12   : > { %s351_s10 = scalar_select %p350_p7, %s2258_s29, 0  ;;  %vm1435_vm4 = vsmask.f32 256 }
  0x13   : > { %s2261_s30 = sadd.s32 %s2255_s27, %s2013_s28  ;;  %s1955_s28 = sadd.s32 8, %s2251_s25 }
  0x14   : > { %s1862_s6 = sshll.u32 %s2261_s30, 2  ;;  %s3205_s10 = smov (!%p1865_p8, %s351_s10), 15 }
  0x15   : > { %s2270_s9 = scalar_lea.vmem %s3171_s0, %s1862_s6  ;;  %s2015_s12 = smul.u32 3, %s3205_s10 }
  0x16   : > { %v2274_v0 = vld [vmem:[%s2270_s9 + $0x30] sm:$0xf]  ;;  %v2277_v1 = vld [vmem:[%s2270_s9 + $0x34] sm:$0xf]  ;;  %v414_v2 = vld [vmem:[%s2270_s9] sm:$0xf] }
  0x17   : > { %v575_v3 = vshrl.u32 %v2277_v1, 16  ;;  %v2283_v4 = vcombine.low %v2274_v0, %v2277_v1  ;;  %v562_v5 = vshrl.u32 %v2274_v0, 16  ;;  %v565_v6 = vshll.u32 %v2274_v0, 16  ;;  %v2288_v7 = vld [vmem:[%s2270_s9 + $0x4] sm:$0xf]  ;;  %s358_s14 = sadd.s32 %s2015_s12, %s2255_s27  ;;  %p2433_p10 = scmp.lt.s32.totalorder %s1955_s28, 15 }
  0x18   : > { %v475_v8 = vshll.u32 %v2288_v7, 16  ;;  %v479_v9 = vshrl.u32 %v2288_v7, 16  ;;  %v2296_v10 = vcombine.low %v414_v2, %v2288_v7  ;;  %v466_v11 = vshrl.u32 %v414_v2, 16  ;;  %v2299_v12 = vld [vmem:[%s2270_s9 + $0x3c] sm:$0xf]  ;;  %s1870_s15 = sshll.u32 %s358_s14, 2 }
  0x19   : > { %899 = vrot.lane.b32.xlu1 %v2283_v4, %s2180_s11  ;;  %v469_v13 = vshll.u32 %v414_v2, 16  ;;  %v2304_v14 = vld [vmem:[%s2270_s9 + $0x40] sm:$0xf]  ;;  %v586_v15 = vshrl.u32 %v2299_v12, 16  ;;  %v589_v16 = vshll.u32 %v2299_v12, 16  ;;  %v1879_v17 = vrot.slane %v414_v2, 9  ;;  %s360_s26 = scalar_lea.vmem %s3172_s1, %s1870_s15 }
  0x1a   : > { %v2308_v18 = vrot.slane %v479_v9, 4  ;;  %891 = vrot.lane.b32.xlu0 %v2296_v10, %s2180_s11  ;;  %v2312_v19 = vrot.slane %v466_v11, 4  ;;  %v599_v20 = vshrl.u32 %v2304_v14, 16  ;;  %v2317_v21 = vcombine.low %v2299_v12, %v2304_v14  ;;  %v2320_v22 = vld [vmem:[%s2270_s9 + $0xc] sm:$0xf]  ;;  %s3207_s28 = smov (!%p2433_p10, %s1955_s28), 15 }
  0x1b   : > { %v471_v24 = vrot.slane %v469_v13, 5  ;;  %v2330_v25 = vld [vmem:[%s2270_s9 + $0x10] sm:$0xf]  ;;  %v490_v26 = vshrl.u32 %v2320_v22, 16  ;;  %v669_v27 = vrot.slane %v2288_v7, 5  ;;  %v493_v28 = vshll.u32 %v2320_v22, 16 }
  0x1c   : > { %v2341_v29 = vcombine.low %v2320_v22, %v2330_v25  ;;  %v2344_v30 = vld [vmem:[%s2270_s9 + $0x24] sm:$0xf]  ;;  %v2347_v31 = vld [vmem:[%s2270_s9 + $0x28] sm:$0xf]  ;;  %v1883_v32 = vrot.slane %v2274_v0, 9  ;;  %v697_v43 = vrot.slane %v2277_v1, 5 }
  0x1d   : > { %901 = vrot.lane.b32.xlu1 %v2317_v21, %s2180_s11  ;;  %v425_v33 = vld [vmem:[%s2270_s9 + $0x2c] sm:$0x1]  ;;  %v1882_v34 = vrot.slane %v2344_v30, 9  ;;  %v690_v35 = vrot.slane %v2347_v31, 5  ;;  %v2356_v36 = vld [vmem:[%s2270_s9 + $0x8] sm:$0x1]  ;;  %v670_v37 = vsel %vm2324_vm2, %v1879_v17, %v669_v27  ;;  %v472_v38 = vor.u32 %v471_v24, %v2312_v19 }
  0x1e   : > { %893 = vrot.lane.b32.xlu0 %v2341_v29, %s2180_s11  ;;  %v693_v39 = vrot.slane %v425_v33, 5  ;;  %v671_v40 = vrot.slane %v669_v27, 4  ;;  %v672_v41 = vrot.slane %v2356_v36, 5  ;;  %v2365_v42 = vld [vmem:[%s2270_s9 + $0x38] sm:$0x1]  ;;  %v538_v47 = vshrl.u32 %v2344_v30, 16 }
  0x1f   : > { %v691_v44 = vsel %vm2324_vm2, %v1882_v34, %v690_v35  ;;  %v692_v45 = vrot.slane %v690_v35, 4  ;;  %v700_v46 = vrot.slane %v2365_v42, 5  ;;  %v698_v49 = vsel %vm2324_vm2, %v1883_v32, %v697_v43  ;;  %s398_s13 = scalar_select %p394_p9, 1, 0  ;;  %v395_v13 = vld [vmem:[%s360_s26] sm:$0xf] }
  0x20   : > { %v673_v48 = vsel %vm2324_vm2, %v671_v40, %v672_v41  ;;  %v699_v50 = vrot.slane %v697_v43, 4  ;;  %v541_v51 = vshll.u32 %v2344_v30, 16  ;;  %v540_v54 = vrot.slane %v538_v47, 4  ;;  %v396_v17 = vld [vmem:[%s360_s26 + $0x4] sm:$0xf]  ;;  %s2182_s25 = smov 4  }
  0x21   : > { %v694_v52 = vsel %vm2324_vm2, %v692_v45, %v693_v39  ;;  %v2382_v53 = vcombine.low %v670_v37, %v673_v48  ;;  %v547_v55 = vshll.u32 %v2347_v31, 16  ;;  %v551_v59 = vshrl.u32 %v2347_v31, 16  ;;  %v397_v27 = vld [vmem:[%s360_s26 + $0x8] sm:$0x1]  ;;  %s3209_s28 = smov (!%p2433_p10, %s3207_s28), 15  ;;  %s2183_s10 = smov 16  }
  0x22   : > { %v2386_v56 = vcombine.low %v691_v44, %v694_v52  ;;  %v701_v57 = vsel %vm2324_vm2, %v699_v50, %v700_v46  ;;  %v543_v58 = vrot.slane %v541_v51, 5  ;;  %v503_v60 = vshrl.u32 %v2330_v25, 16  ;;  %s2466_s7 = smul.u32 3, %s3209_s28  ;;  %s2184_s12 = smov 20  }
  0x23   : > { %874 = vrot.lane.b32.xlu0 %v2382_v53, %s2181_s16  ;;  %v549_v61 = vrot.slane %v547_v55, 5  ;;  %v557_v62 = vshll.u32 %v425_v33, 16  ;;  %v399_v63 = vstv %s398_s13  ;;  %v2399_v2 = vcombine.low %v698_v49, %v701_v57  ;;  %s408_s17 = scalar_select %p404_p11, 1, 0 }
  0x24   : > { %880 = vrot.lane.b32.xlu1 %v2386_v56, %s2181_s16  ;;  %v544_v9 = vor.u32 %v543_v58, %v540_v54  ;;  %v553_v11 = vrot.slane %v551_v59, 4  ;;  %vm400_vm5 = vcmp.eq.s32.totalorder %v399_v63, 1  ;;  %v473_v34 = vrot.slane %v472_v38, 4  ;;  %s375_s8 = sadd.s32 %s2466_s7, %s2255_s27  ;;  %s2187_s7 = smov 32  }
  0x25   : > { %v559_v24 = vrot.slane %v557_v62, 5  ;;  %v2407_v32 = vsel %vm400_vm5, 0, %v395_v13  ;;  %v2409_v33 = vsel %vm400_vm5, 0, %v396_v17  ;;  %v403_v39 = vsel %vm400_vm5, 0, %v397_v27  ;;  %s1875_s13 = sshll.u32 %s375_s8, 2 }
  0x26   : > { %v545_v35 = vrot.slane %v544_v9, 4  ;;  %v554_v37 = vor.u32 %v553_v11, %v549_v61  ;;  %v1878_v40 = vrot.slane %v2407_v32, 9  ;;  %v662_v41 = vrot.slane %v2409_v33, 5  ;;  %s2587_s15 = scalar_lea.vmem %s3173_s2, %s1875_s13 }
  0x27   : > { %v665_v43 = vrot.slane %v403_v39, 5  ;;  %v477_v44 = vrot.slane %v475_v8, 5  ;;  %v485_v45 = vshll.u32 %v2356_v36, 16  ;;  %v564_v47 = vrot.slane %v562_v5, 4 }
  0x28   : > { %882 = vrot.lane.b32.xlu1 %v2399_v2, %s2181_s16  ;;  %v550_v38 = vsel %vm2403_vm6, %v545_v35, %v549_v61  ;;  %v555_v46 = vrot.slane %v554_v37, 4  ;;  %v567_v48 = vrot.slane %v565_v6, 5  ;;  %v663_v49 = vsel %vm2324_vm2, %v1878_v40, %v662_v41 }
  0x29   : > { %v664_v7 = vrot.slane %v662_v41, 4  ;;  %v478_v8 = vsel %vm2403_vm6, %v473_v34, %v477_v44  ;;  %v482_v36 = vor.u32 %v2308_v18, %v477_v44  ;;  %v487_v51 = vrot.slane %v485_v45, 5  ;;  %v2459_v34 = vld [vmem:[%s2270_s9 + $0x14] sm:$0x1] }
  0x2a   : > { %v560_v50 = vsel %vm2403_vm6, %v555_v46, %v559_v24  ;;  %v568_v52 = vor.u32 %v567_v48, %v564_v47  ;;  %v571_v5 = vshll.u32 %v2277_v1, 16  ;;  %v577_v18 = vrot.slane %v575_v3, 4 }
  0x2b   : > { %v2437_v0 = vcombine.low %v550_v38, %v560_v50  ;;  %v666_v6 = vsel %vm2324_vm2, %v664_v7, %v665_v43  ;;  %v483_v54 = vrot.slane %v482_v36, 4  ;;  %v581_v59 = vshll.u32 %v2365_v42, 16 }
  0x2c   : > { %v1904_v55 = vcombine.low %v663_v49, %v666_v6  ;;  %v569_v57 = vrot.slane %v568_v52, 4  ;;  %v573_v58 = vrot.slane %v571_v5, 5  ;;  %v442_v62 = vshrl.u32 %v2407_v32, 16 }
  0x2d   : > { %840 = vrot.lane.b32.xlu0 %v2437_v0, %s2182_s25  ;;  %v488_v61 = vsel %vm2403_vm6, %v483_v54, %v487_v51  ;;  %v445_v1 = vshll.u32 %v2407_v32, 16  ;;  %v451_v3 = vshll.u32 %v2409_v33, 16  ;;  %v583_v11 = vrot.slane %v581_v59, 5 }
  0x2e   : > { %v1897_v63 = vcombine.low %v478_v8, %v488_v61  ;;  %v574_v42 = vsel %vm2403_vm6, %v569_v57, %v573_v58  ;;  %v578_v9 = vor.u32 %v577_v18, %v573_v58  ;;  %v444_v13 = vrot.slane %v442_v62, 4  ;;  %v431_v8 = vld [vmem:[%s2270_s9 + $0x44] sm:$0x1] }
  0x2f   : > { %v447_v17 = vrot.slane %v445_v1, 5  ;;  %v453_v24 = vrot.slane %v451_v3, 5  ;;  %v455_v27 = vshrl.u32 %v2409_v33, 16  ;;  %v461_v37 = vshll.u32 %v403_v39, 16  ;;  %v2498_v3 = vld [vmem:[%s2270_s9 + $0x18] sm:$0xf] }
  0x30   : > { %834 = vrot.lane.b32.xlu1 %v1897_v63, %s2182_s25  ;;  %v579_v35 = vrot.slane %v578_v9, 4  ;;  %v492_v40 = vrot.slane %v490_v26, 4  ;;  %v495_v41 = vrot.slane %v493_v28, 5  ;;  %v499_v45 = vshll.u32 %v2330_v25, 16 }
  0x31   : > { %872 = vrot.lane.b32.xlu0 %v1904_v55, %s2181_s16  ;;  %v448_v43 = vor.u32 %v447_v17, %v444_v13  ;;  %v457_v44 = vrot.slane %v455_v27, 4  ;;  %v505_v38 = vrot.slane %v503_v60, 4  ;;  %v463_v26 = vrot.slane %v461_v37, 5  ;;  %v2509_v13 = vld [vmem:[%s2270_s9 + $0x48] sm:$0xf] }
  0x32   : > { %v584_v39 = vsel %vm2403_vm6, %v579_v35, %v583_v11  ;;  %v496_v46 = vor.u32 %v495_v41, %v492_v40  ;;  %v509_v28 = vshll.u32 %v2459_v34, 16  ;;  %v501_v7 = vrot.slane %v499_v45, 5  ;;  %v2506_v11 = vld [vmem:[%s2270_s9 + $0x1c] sm:$0xf]  ;;  %v2521_v41 = vld [vmem:[%s2270_s9 + $0x4c] sm:$0xf] }
  0x33   : > { %v2477_v47 = vcombine.low %v574_v42, %v584_v39  ;;  %v449_v48 = vrot.slane %v448_v43, 4  ;;  %v458_v49 = vor.u32 %v457_v44, %v453_v24  ;;  %v588_v51 = vrot.slane %v586_v15, 4 }
  0x34   : > { %v497_v36 = vrot.slane %v496_v46, 4  ;;  %v511_v50 = vrot.slane %v509_v28, 5  ;;  %v591_v60 = vrot.slane %v589_v16, 5  ;;  %v506_v6 = vor.u32 %v505_v38, %v501_v7 }
  0x35   : > { %910 = vrot.lane.b32.xlu0 %v1897_v63, %s2183_s10  ;;  %842 = vrot.lane.b32.xlu1 %v2477_v47, %s2182_s25  ;;  %v454_v52 = vsel %vm2403_vm6, %v449_v48, %v453_v24  ;;  %v459_v5 = vrot.slane %v458_v49, 4  ;;  %v595_v54 = vshll.u32 %v2304_v14, 16  ;;  %v601_v15 = vrot.slane %v599_v20, 4 }
  0x36   : > { %v592_v18 = vor.u32 %v591_v60, %v588_v51  ;;  %v605_v16 = vshll.u32 %v431_v8, 16  ;;  %v502_v57 = vsel %vm2403_vm6, %v497_v36, %v501_v7  ;;  %v507_v58 = vrot.slane %v506_v6, 4 }
  0x37   : > { %v464_v55 = vsel %vm2403_vm6, %v459_v5, %v463_v26  ;;  %v597_v59 = vrot.slane %v595_v54, 5  ;;  %v676_v1 = vrot.slane %v2330_v25, 5  ;;  %v1880_v9 = vrot.slane %v2320_v22, 9 }
  0x38   : > { %v1896_v61 = vcombine.low %v454_v52, %v464_v55  ;;  %v593_v62 = vrot.slane %v592_v18, 4  ;;  %v512_v20 = vsel %vm2403_vm6, %v507_v58, %v511_v50  ;;  %v607_v42 = vrot.slane %v605_v16, 5  ;;  %v2545_v50 = vld [vmem:[%s2270_s9 + $0x50] sm:$0x1] }
  0x39   : > { %918 = vrot.lane.b32.xlu1 %v2477_v47, %s2183_s10  ;;  %v602_v63 = vor.u32 %v601_v15, %v597_v59  ;;  %v2512_v25 = vcombine.low %v502_v57, %v512_v20  ;;  %v678_v17 = vrot.slane %v676_v1, 4  ;;  %v679_v24 = vrot.slane %v2459_v34, 5 }
  0x3a   : > { %832 = vrot.lane.b32.xlu0 %v1896_v61, %s2182_s25  ;;  %v1884_v27 = vrot.slane %v2299_v12, 9  ;;  %v598_v35 = vsel %vm2403_vm6, %v593_v62, %v597_v59  ;;  %v704_v22 = vrot.slane %v2304_v14, 5  ;;  %v514_v40 = vshrl.u32 %v2498_v3, 16  ;;  %v2531_v14 = vld [vmem:[%s2270_s9 + $0x20] sm:$0x1] }
  0x3b   : > { %v603_v37 = vrot.slane %v602_v63, 4  ;;  %v707_v43 = vrot.slane %v431_v8, 5  ;;  %v517_v44 = vshll.u32 %v2498_v3, 16  ;;  %v527_v45 = vshrl.u32 %v2506_v11, 16 }
  0x3c   : > { %v610_v34 = vshrl.u32 %v2509_v13, 16  ;;  %v677_v38 = vsel %vm2324_vm2, %v1880_v9, %v676_v1  ;;  %v706_v39 = vrot.slane %v704_v22, 4  ;;  %v680_v46 = vsel %vm2324_vm2, %v678_v17, %v679_v24  ;;  %v2569_v17 = vld [vmem:[%s2270_s9 + $0x54] sm:$0xf] }
  0x3d   : > { %v608_v12 = vsel %vm2403_vm6, %v603_v37, %v607_v42  ;;  %v613_v28 = vshll.u32 %v2509_v13, 16  ;;  %v623_v48 = vshrl.u32 %v2521_v41, 16  ;;  %v705_v49 = vsel %vm2324_vm2, %v1884_v27, %v704_v22  ;;  %v2580_v22 = vld [vmem:[%s2270_s9 + $0x58] sm:$0xf] }
  0x3e   : > { %912 = vrot.lane.b32.xlu0 %v2512_v25, %s2183_s10  ;;  %v2535_v26 = vcombine.low %v598_v35, %v608_v12  ;;  %v516_v7 = vrot.slane %v514_v40, 4  ;;  %v519_v8 = vrot.slane %v517_v44, 5  ;;  %v523_v36 = vshll.u32 %v2506_v11, 16  ;;  %v437_v44 = vld [vmem:[%s2270_s9 + $0x5c] sm:$0x1] }
  0x3f   : > { %v708_v51 = vsel %vm2324_vm2, %v706_v39, %v707_v43  ;;  %v529_v60 = vrot.slane %v527_v45, 4  ;;  %v533_v52 = vshll.u32 %v2531_v14, 16  ;;  %v612_v5 = vrot.slane %v610_v34, 4 }
  0x40   : > { %920 = vrot.lane.b32.xlu1 %v2535_v26, %s2183_s10  ;;  %v520_v6 = vor.u32 %v519_v8, %v516_v7  ;;  %v525_v54 = vrot.slane %v523_v36, 5  ;;  %v615_v18 = vrot.slane %v613_v28, 5  ;;  %v619_v15 = vshll.u32 %v2521_v41, 16 }
  0x41   : > { %v2555_v16 = vcombine.low %v677_v38, %v680_v46  ;;  %v535_v55 = vrot.slane %v533_v52, 5  ;;  %v625_v57 = vrot.slane %v623_v48, 4  ;;  %v629_v58 = vshll.u32 %v2545_v50, 16 }
  0x42   : > { %929 = vrot.lane.b32.xlu0 %v2382_v53, %s2184_s12  ;;  %v521_v59 = vrot.slane %v520_v6, 4  ;;  %v530_v61 = vor.u32 %v529_v60, %v525_v54  ;;  %v616_v62 = vor.u32 %v615_v18, %v612_v5  ;;  %v621_v1 = vrot.slane %v619_v15, 5  ;;  %v406_v60 = vld [vmem:[%s2587_s15 + $0x4] sm:$0xf] }
  0x43   : > { %v2560_v20 = vcombine.low %v705_v49, %v708_v51  ;;  %v631_v9 = vrot.slane %v629_v58, 5  ;;  %v2577_v37 = vcombine.low %v2344_v30, %v2347_v31  ;;  %v2591_v40 = vcombine.low %v2498_v3, %v2506_v11  ;;  %v405_v49 = vld [vmem:[%s2587_s15] sm:$0xf] }
  0x44   : > { %937 = vrot.lane.b32.xlu1 %v2399_v2, %s2184_s12  ;;  %v531_v63 = vrot.slane %v530_v61, 4  ;;  %v626_v42 = vor.u32 %v625_v57, %v621_v1  ;;  %v617_v53 = vrot.slane %v616_v62, 4  ;;  %v526_v24 = vsel %vm2403_vm6, %v521_v59, %v525_v54 }
  0x45   : > { %v2595_v43 = vcombine.low %v2509_v13, %v2521_v41  ;;  %v717_v30 = vshrl.u32 %v2569_v17, 16  ;;  %v720_v31 = vshll.u32 %v2569_v17, 16  ;;  %v683_v12 = vrot.slane %v2506_v11, 5  ;;  %v2075_v11 = vld [vmem:[%s3174_s3] sm:$0xff]  }
  0x46   : > { %931 = vrot.lane.b32.xlu0 %v2555_v16, %s2184_s12  ;;  %v536_v27 = vsel %vm2403_vm6, %v531_v63, %v535_v55  ;;  %v627_v35 = vrot.slane %v626_v42, 4  ;;  %v622_v34 = vsel %vm2403_vm6, %v617_v53, %v621_v1  ;;  %v730_v38 = vshrl.u32 %v2580_v22, 16  ;;  %v407_v1 = vld [vmem:[%s2587_s15 + $0x8] sm:$0x1] }
  0x47   : > { %v2604_v45 = vcombine.low %v526_v24, %v536_v27  ;;  %v719_v46 = vrot.slane %v717_v30, 4  ;;  %v722_v28 = vrot.slane %v720_v31, 5  ;;  %v726_v48 = vshll.u32 %v2580_v22, 16 }
  0x48   : > { %939 = vrot.lane.b32.xlu1 %v2560_v20, %s2184_s12  ;;  %v632_v39 = vsel %vm2403_vm6, %v627_v35, %v631_v9  ;;  %v732_v7 = vrot.slane %v730_v38, 4  ;;  %v736_v8 = vshll.u32 %v437_v44, 16  ;;  %v1886_v36 = vrot.slane %v2569_v17, 9 }
  0x49   : > { %v745_v51 = vrot.slane %v2580_v22, 5  ;;  %v723_v52 = vor.u32 %v722_v28, %v719_v46  ;;  %v728_v5 = vrot.slane %v726_v48, 5  ;;  %v748_v6 = vrot.slane %v437_v44, 5 }
  0x4a   : > { %948 = vrot.lane.b32.xlu0 %v2341_v29, %s2185_s19  ;;  %v409_v54 = vstv %s408_s17  ;;  %v738_v18 = vrot.slane %v736_v8, 5  ;;  %v2643_v24 = vcombine.low %v622_v34, %v632_v39  ;;  %v686_v57 = vrot.slane %v2531_v14, 5 }
  0x4b   : > { %v746_v15 = vsel %vm2324_vm2, %v1886_v36, %v745_v51  ;;  %v747_v55 = vrot.slane %v745_v51, 4  ;;  %vm2623_vm7 = vcmp.eq.s32.totalorder %v409_v54, 1  ;;  %v724_v58 = vrot.slane %v723_v52, 4 }
  0x4c   : > { %956 = vrot.lane.b32.xlu1 %v2317_v21, %s2185_s19  ;;  %v733_v59 = vor.u32 %v732_v7, %v728_v5  ;;  %v2629_v61 = vsel %vm2623_vm7, 0, %v405_v49  ;;  %v2633_v62 = vsel %vm2623_vm7, 0, %v406_v60  ;;  %v413_v31 = vsel %vm2623_vm7, 0, %v407_v1 }
  0x4d   : > { %v749_v63 = vsel %vm2324_vm2, %v747_v55, %v748_v6  ;;  %v751_v42 = vshrl.u32 %v2629_v61, 16  ;;  %v754_v53 = vshll.u32 %v2629_v61, 16  ;;  %v764_v9 = vshrl.u32 %v2633_v62, 16 }
  0x4e   : > { %950 = vrot.lane.b32.xlu0 %v2591_v40, %s2185_s19  ;;  %v729_v27 = vsel %vm2403_vm6, %v724_v58, %v728_v5  ;;  %v734_v35 = vrot.slane %v733_v59, 4  ;;  %v2647_v30 = vcombine.low %v746_v15, %v749_v63  ;;  %v760_v46 = vshll.u32 %v2633_v62, 16  ;;  %v2073_v15 = vld [vmem:[%s3174_s3 + $0x10] ss:$0 sps:$4 sm:$0x33]  }
  0x4f   : > { %v753_v44 = vrot.slane %v751_v42, 4  ;;  %v756_v38 = vrot.slane %v754_v53, 5  ;;  %v766_v39 = vrot.slane %v764_v9, 4  ;;  %v770_v28 = vshll.u32 %v413_v31, 16  ;;  %v2074_v9 = vld [vmem:[%s3174_s3 + $0x8] sm:$0xff]   ;;  %2011 = vmatprep.subr.msk.bf16.mxu0 %vm1190_vm8, %v2073_v15  ;;  %2012 = vmatprep.subr.msk.bf16.mxu1 %vm1190_vm8, %v2073_v15 }
  0x50   : > { %958 = vrot.lane.b32.xlu1 %v2595_v43, %s2185_s19  ;;  %v739_v34 = vsel %vm2403_vm6, %v734_v35, %v738_v18  ;;  %v1887_v48 = vrot.slane %v2629_v61, 9  ;;  %v762_v8 = vrot.slane %v760_v46, 5  ;;  %v779_v36 = vrot.slane %v2633_v62, 5 }
  0x51   : > { %v2659_v49 = vcombine.low %v729_v27, %v739_v34  ;;  %v757_v7 = vor.u32 %v756_v38, %v753_v44  ;;  %v711_v51 = vrot.slane %v2521_v41, 5  ;;  %v772_v60 = vrot.slane %v770_v28, 5 }
  0x52   : > { %967 = vrot.lane.b32.xlu0 %v2512_v25, %s2186_s18  ;;  %v782_v52 = vrot.slane %v413_v31, 5  ;;  %v767_v6 = vor.u32 %v766_v39, %v762_v8  ;;  %v2667_v54 = vsel %vm2324_vm2, %v1887_v48, %v779_v36  ;;  %v781_v18 = vrot.slane %v779_v36, 4 }
  0x53   : > { %v758_v5 = vrot.slane %v757_v7, 4  ;;  %v1881_v55 = vrot.slane %v2498_v3, 9  ;;  %v685_v41 = vrot.slane %v683_v12, 4  ;;  %v1888_v58 = vcombine.low %v2407_v32, %v2409_v33 }
  0x54   : > { %975 = vrot.lane.b32.xlu1 %v2535_v26, %s2186_s18  ;;  %v1885_v59 = vrot.slane %v2509_v13, 9  ;;  %v768_v63 = vrot.slane %v767_v6, 4  ;;  %v2685_v3 = vsel %vm2324_vm2, %v781_v18, %v782_v52  ;;  %v713_v42 = vrot.slane %v711_v51, 4 }
  0x55   : > { %v763_v1 = vsel %vm2403_vm6, %v758_v5, %v762_v8  ;;  %v714_v53 = vrot.slane %v2545_v50, 5  ;;  %v1917_v14 = vcombine.low %v2667_v54, %v2685_v3  ;;  %v1192_v27 = vsel %vm1190_vm8, %v2073_v15, 0 }
  0x56   : > { %969 = vrot.lane.b32.xlu0 %v2604_v45, %s2186_s18  ;;  %v773_v13 = vsel %vm2403_vm6, %v768_v63, %v772_v60  ;;  %v684_v50 = vsel %vm2324_vm2, %v1881_v55, %v683_v12  ;;  %v687_v35 = vsel %vm2324_vm2, %v685_v41, %v686_v57  ;;  %1984 = vmatpush3.bf16.msra.mxu0 %v1192_v27  ;;  %vm1606_vm6 = vcmask 253952  }
  0x57   : > { %v1916_v31 = vcombine.low %v763_v1, %v773_v13  ;;  %2008 = vmatpush3.bf16.msra.mxu1 %v1192_v27  ;;  %v712_v19 = vsel %vm2324_vm2, %v1885_v59, %v711_v51  ;;  %v715_v44 = vsel %vm2324_vm2, %v713_v42, %v714_v53  ;;  %1985 = vmatprep.subr.bf16.mxu0 %v2074_v9  ;;  %vm1598_vm2 = vcmask 257024   ;;  %vm2931_vm8 = vmand %vm1606_vm6, %vm1435_vm4 }
  0x58   : > { %977 = vrot.lane.b32.xlu1 %v2643_v24, %s2186_s18  ;;  %2006 = vmatprep.subr.bf16.mxu1 %v2074_v9  ;;  %v1907_v12 = vcombine.low %v684_v50, %v687_v35  ;;  %v1911_v38 = vcombine.low %v712_v19, %v715_v44  ;;  %v1912_v23 = vcombine.low %v2569_v17, %v2580_v22  ;;  %vm2915_vm5 = vmand %vm1598_vm2, %vm1599_vm3  ;;  %vm1436_vm7 = vsmask.f32 4368 }
  0x5a   : > { %986 = vrot.lane.b32.xlu0 %v2555_v16, %s2187_s7  ;;  %1986 = vmatpush3.bf16.msra.mxu0 %v2074_v9 }
  0x5b   : > { %2009 = vmatpush3.bf16.msra.mxu1 %v2074_v9  ;;  %1987 = vmatprep.subr.bf16.mxu0 %v2075_v11 }
  0x5c   : > { %994 = vrot.lane.b32.xlu1 %v2560_v20, %s2187_s7  ;;  %2007 = vmatprep.subr.bf16.mxu1 %v2075_v11 }
  0x5e   : > { %836 = vrot.lane.b32.xlu0 %v2512_v25, %s2182_s25  ;;  %1988 = vmatpush3.bf16.msra.mxu0 %v2075_v11 }
  0x5f   : > { %2010 = vmatpush3.bf16.msra.mxu1 %v2075_v11 }
  0x60   : > { %844 = vrot.lane.b32.xlu1 %v2535_v26, %s2182_s25  ;;  %v1915_v26 = vcombine.low %v2629_v61, %v2633_v62 }
  0x62   : > { %988 = vrot.lane.b32.xlu0 %v1907_v12, %s2187_s7 }
  0x64   : > { %996 = vrot.lane.b32.xlu1 %v1911_v38, %s2187_s7 }
  0x66   : > { %838 = vrot.lane.b32.xlu0 %v2604_v45, %s2182_s25 }
  0x68   : > { %846 = vrot.lane.b32.xlu1 %v2643_v24, %s2182_s25 }
  0x6a   : > { %876 = vrot.lane.b32.xlu0 %v2555_v16, %s2181_s16 }
  0x6c   : > { %884 = vrot.lane.b32.xlu1 %v2560_v20, %s2181_s16 }
  0x6e   : > { %878 = vrot.lane.b32.xlu0 %v1907_v12, %s2181_s16 }
  0x70   : > { %886 = vrot.lane.b32.xlu1 %v1911_v38, %s2181_s16 }
  0x72   : > { %895 = vrot.lane.b32.xlu0 %v2591_v40, %s2180_s11 }
  0x74   : > { %903 = vrot.lane.b32.xlu1 %v2595_v43, %s2180_s11 }
  0x76   : > { %897 = vrot.lane.b32.xlu0 %v2577_v37, %s2180_s11 }
  0x78   : > { %905 = vrot.lane.b32.xlu1 %v1912_v23, %s2180_s11 }
  0x7a   : > { %914 = vrot.lane.b32.xlu0 %v2604_v45, %s2183_s10 }
  0x7c   : > { %922 = vrot.lane.b32.xlu1 %v2643_v24, %s2183_s10 }
  0x7e   : > { %916 = vrot.lane.b32.xlu0 %v2437_v0, %s2183_s10 }
  0x80   : > { %924 = vrot.lane.b32.xlu1 %v2659_v49, %s2183_s10 }
  0x82   : > { %933 = vrot.lane.b32.xlu0 %v1907_v12, %s2184_s12 }
  0x84   : > { %941 = vrot.lane.b32.xlu1 %v1911_v38, %s2184_s12 }
  0x86   : > { %935 = vrot.lane.b32.xlu0 %v2386_v56, %s2184_s12 }
  0x88   : > { %943 = vrot.lane.b32.xlu1 %v2647_v30, %s2184_s12  ;;  %s2909_s12 = scalar_lea.vmem %s3176_s5, %s1862_s6 }
  0x8a   : > { %952 = vrot.lane.b32.xlu0 %v2577_v37, %s2185_s19 }
  0x8b   : > { %v900_v25 = vpop.permute.xlu1 %899 }
  0x8c   : > { %960 = vrot.lane.b32.xlu1 %v1912_v23, %s2185_s19  ;;  %v892_v16 = vpop.permute.xlu0 %891 }
  0x8e   : > { %954 = vrot.lane.b32.xlu0 %v2283_v4, %s2185_s19 }
  0x8f   : > { %v2759_v20 = vpop.permute.xlu1 %901 }
  0x90   : > { %962 = vrot.lane.b32.xlu1 %v1915_v26, %s2185_s19  ;;  %v2763_v17 = vpop.permute.xlu0 %893 }
  0x92   : > { %971 = vrot.lane.b32.xlu0 %v2437_v0, %s2186_s18 }
  0x94   : > { %979 = vrot.lane.b32.xlu1 %v2659_v49, %s2186_s18 }
  0x95   : > { %v875_v45 = vpop.permute.xlu0 %874 }
  0x96   : > { %973 = vrot.lane.b32.xlu0 %v2477_v47, %s2186_s18  ;;  %v881_v22 = vpop.permute.xlu1 %880 }
  0x98   : > { %981 = vrot.lane.b32.xlu1 %v1916_v31, %s2186_s18 }
  0x9a   : > { %990 = vrot.lane.b32.xlu0 %v2386_v56, %s2187_s7  ;;  %v883_v61 = vpop.permute.xlu1 %882 }
  0x9c   : > { %998 = vrot.lane.b32.xlu1 %v2647_v30, %s2187_s7 }
  0x9e   : > { %992 = vrot.lane.b32.xlu0 %v2399_v2, %s2187_s7 }
  0x9f   : > { %v841_v0 = vpop.permute.xlu0 %840 }
  0xa0   : > { %1000 = vrot.lane.b32.xlu1 %v1917_v14, %s2187_s7  ;;  %v1017_v5 = vsel %vm1002_vm9, %v2577_v37, %v841_v0 }
  0xa1   : > { %v1037_v15 = vsel %vm1027_vm10, %v1017_v5, %v881_v22 }
  0xa2   : > { %v835_v47 = vpop.permute.xlu1 %834  ;;  %v1054_v41 = vsel %vm1044_vm11, %v1037_v15, %v900_v25 }
  0xa3   : > { %v873_v62 = vpop.permute.xlu0 %872  ;;  %v1008_v55 = vsel %vm1002_vm9, %v2296_v10, %v835_v47 }
  0xa4   : > { %v1031_v10 = vsel %vm1027_vm10, %v1008_v55, %v875_v45 }
  0xa5   : > { %v1048_v50 = vsel %vm1044_vm11, %v1031_v10, %v2763_v17 }
  0xa7   : > { %v911_v24 = vpop.permute.xlu0 %910  ;;  %v843_v46 = vpop.permute.xlu1 %842 }
  0xa8   : > { %v1020_v1 = vsel %vm1002_vm9, %v2283_v4, %v843_v46 }
  0xa9   : > { %v1039_v27 = vsel %vm1027_vm10, %v1020_v1, %v883_v61 }
  0xaa   : > { %v1056_v19 = vsel %vm1044_vm11, %v1039_v27, %v2759_v20 }
  0xab   : > { %v919_v39 = vpop.permute.xlu1 %918 }
  0xac   : > { %v833_v34 = vpop.permute.xlu0 %832 }
  0xad   : > { %v1005_v36 = vsel %vm1002_vm9, %v1888_v58, %v833_v34  ;;  %v1071_v58 = vsel %vm1061_vm13, %v1054_v41, %v919_v39 }
  0xae   : > { %v1029_v52 = vsel %vm1027_vm10, %v1005_v36, %v873_v62 }
  0xaf   : > { %v1046_v54 = vsel %vm1044_vm11, %v1029_v52, %v892_v16 }
  0xb0   : > { %v913_v56 = vpop.permute.xlu0 %912  ;;  %v1063_v33 = vsel %vm1061_vm13, %v1046_v54, %v911_v24 }
  0xb1   : > { %v1065_v31 = vsel %vm1061_vm13, %v1048_v50, %v913_v56 }
  0xb2   : > { %v921_v28 = vpop.permute.xlu1 %920 }
  0xb3   : > { %v1073_v12 = vsel %vm1061_vm13, %v1056_v19, %v921_v28 }
  0xb4   : > { %v930_v48 = vpop.permute.xlu0 %929 }
  0xb5   : > { %v1080_v37 = vsel %vm1078_vm12, %v1063_v33, %v930_v48 }
  0xb6   : > { %v938_v30 = vpop.permute.xlu1 %937 }
  0xb7   : > { %v1088_v63 = vsel %vm1078_vm12, %v1071_v58, %v938_v30 }
  0xb8   : > { %v932_v49 = vpop.permute.xlu0 %931 }
  0xb9   : > { %v1082_v44 = vsel %vm1078_vm12, %v1065_v31, %v932_v49 }
  0xba   : > { %v940_v7 = vpop.permute.xlu1 %939 }
  0xbb   : > { %v1090_v23 = vsel %vm1078_vm12, %v1073_v12, %v940_v7 }
  0xbc   : > { %v949_v8 = vpop.permute.xlu0 %948 }
  0xbd   : > { %v1097_v59 = vsel %vm1095_vm14, %v1080_v37, %v949_v8 }
  0xbe   : > { %v957_v2 = vpop.permute.xlu1 %956 }
  0xbf   : > { %v1105_v53 = vsel %vm1095_vm14, %v1088_v63, %v957_v2 }
  0xc0   : > { %v951_v51 = vpop.permute.xlu0 %950 }
  0xc1   : > { %v1099_v38 = vsel %vm1095_vm14, %v1082_v44, %v951_v51 }
  0xc2   : > { %v959_v60 = vpop.permute.xlu1 %958 }
  0xc3   : > { %v1107_v16 = vsel %vm1095_vm14, %v1090_v23, %v959_v60 }
  0xc4   : > { %v968_v6 = vpop.permute.xlu0 %967 }
  0xc5   : > { %v1114_v3 = vsel %vm1112_vm15, %v1097_v59, %v968_v6 }
  0xc6   : > { %v976_v18 = vpop.permute.xlu1 %975 }
  0xc7   : > { %v1122_v9 = vsel %vm1112_vm15, %v1105_v53, %v976_v18 }
  0xc8   : > { %v970_v32 = vpop.permute.xlu0 %969 }
  0xc9   : > { %v1116_v25 = vsel %vm1112_vm15, %v1099_v38, %v970_v32 }
  0xca   : > { %v978_v57 = vpop.permute.xlu1 %977 }
  0xcb   : > { %v1124_v22 = vsel %vm1112_vm15, %v1107_v16, %v978_v57 }
  0xcc   : > { %v987_v42 = vpop.permute.xlu0 %986 }
  0xcd   : > { %v1131_v14 = vsel %vm1129_vm0, %v1114_v3, %v987_v42 }
  0xce   : > { %v995_v13 = vpop.permute.xlu1 %994  ;;  %1989 = vmatprep.mubr.msk.bf16.mxu0 %vm1173_vm1, %v1131_v14 }
  0xcf   : > { %v1139_v4 = vsel %vm1129_vm0, %v1122_v9, %v995_v13 }
  0xd0   : > { %1997 = vmatprep.mubr.msk.bf16.mxu1 %vm1173_vm1, %v1139_v4  ;;  %v837_v35 = vpop.permute.xlu0 %836 }
  0xd1   : > { %v1011_v18 = vsel %vm1002_vm9, %v2341_v29, %v837_v35 }
  0xd2   : > { %v845_v11 = vpop.permute.xlu1 %844 }
  0xd3   : > { %v1023_v33 = vsel %vm1002_vm9, %v2317_v21, %v845_v11 }
  0xd4   : > { %v989_v26 = vpop.permute.xlu0 %988 }
  0xd5   : > { %v1133_v17 = vsel %vm1129_vm0, %v1116_v25, %v989_v26 }
  0xd6   : > { %v997_v45 = vpop.permute.xlu1 %996  ;;  %1990 = vmatmul.mubr.msk.bf16.vlgmr.msra.gmra.mxu0 %vm1173_vm1, %v1133_v17 }
  0xd7   : > { %v1141_v20 = vsel %vm1129_vm0, %v1124_v22, %v997_v45  ;;  %v2867_v45 = vld [vmem:[%s3175_s4] ss:$0 sm:$0xff] }
  0xd8   : > { %1998 = vmatmul.mubr.msk.bf16.vlgmr.msra.gmra.mxu1 %vm1173_vm1, %v1141_v20  ;;  %v839_v61 = vpop.permute.xlu0 %838 }
  0xd9   : > { %v1014_v58 = vsel %vm1002_vm9, %v2591_v40, %v839_v61 }
  0xda   : > { %v847_v0 = vpop.permute.xlu1 %846 }
  0xdb   : > { %v1026_v42 = vsel %vm1002_vm9, %v2595_v43, %v847_v0  ;;  %vm2943_vm9 = vmor %vm1435_vm4, %vm1436_vm7 }
  0xdc   : > { %v877_v47 = vpop.permute.xlu0 %876 }
  0xdd   : > { %v1033_v32 = vsel %vm1027_vm10, %v1011_v18, %v877_v47 }
  0xde   : > { %v885_v62 = vpop.permute.xlu1 %884 }
  0xdf   : > { %v1041_v37 = vsel %vm1027_vm10, %v1023_v33, %v885_v62 }
  0xe0   : > { %v879_v24 = vpop.permute.xlu0 %878 }
  0xe1   : > { %v1035_v63 = vsel %vm1027_vm10, %v1014_v58, %v879_v24 }
  0xe2   : > { %v887_v46 = vpop.permute.xlu1 %886 }
  0xe3   : > { %v1043_v9 = vsel %vm1027_vm10, %v1026_v42, %v887_v46  ;;  %vm2981_vm10 = vmand %vm1606_vm6, %vm1599_vm3 }
  0xe4   : > { %v896_v34 = vpop.permute.xlu0 %895 }
  0xe5   : > { %v1050_v55 = vsel %vm1044_vm11, %v1033_v32, %v896_v34 }
  0xe6   : > { %v904_v39 = vpop.permute.xlu1 %903 }
  0xe7   : > { %v1058_v59 = vsel %vm1044_vm11, %v1041_v37, %v904_v39 }
  0xe8   : > { %v898_v56 = vpop.permute.xlu0 %897 }
  0xe9   : > { %v1052_v10 = vsel %vm1044_vm11, %v1035_v63, %v898_v56 }
  0xea   : > { %v906_v28 = vpop.permute.xlu1 %905 }
  0xeb   : > { %v1060_v50 = vsel %vm1044_vm11, %v1043_v9, %v906_v28 }
  0xec   : > { %v915_v48 = vpop.permute.xlu0 %914 }
  0xed   : > { %v1067_v57 = vsel %vm1061_vm13, %v1050_v55, %v915_v48 }
  0xee   : > { %v923_v30 = vpop.permute.xlu1 %922 }
  0xef   : > { %v1075_v3 = vsel %vm1061_vm13, %v1058_v59, %v923_v30 }
  0xf0   : > { %v917_v49 = vpop.permute.xlu0 %916 }
  0xf1   : > { %v1069_v13 = vsel %vm1061_vm13, %v1052_v10, %v917_v49 }
  0xf2   : > { %v925_v7 = vpop.permute.xlu1 %924 }
  0xf3   : > { %v1077_v19 = vsel %vm1061_vm13, %v1060_v50, %v925_v7 }
  0xf4   : > { %v934_v8 = vpop.permute.xlu0 %933 }
  0xf5   : > { %v1084_v29 = vsel %vm1078_vm12, %v1067_v57, %v934_v8 }
  0xf6   : > { %v942_v2 = vpop.permute.xlu1 %941 }
  0xf7   : > { %v1092_v53 = vsel %vm1078_vm12, %v1075_v3, %v942_v2 }
  0xf8   : > { %v936_v36 = vpop.permute.xlu0 %935 }
  0xf9   : > { %v1086_v35 = vsel %vm1078_vm12, %v1069_v13, %v936_v36 }
  0xfa   : > { %v944_v51 = vpop.permute.xlu1 %943 }
  0xfb   : > { %v1094_v12 = vsel %vm1078_vm12, %v1077_v19, %v944_v51 }
  0xfc   : > { %v953_v60 = vpop.permute.xlu0 %952 }
  0xfd   : > { %v1101_v21 = vsel %vm1095_vm14, %v1084_v29, %v953_v60 }
  0xfe   : > { %v961_v52 = vpop.permute.xlu1 %960 }
  0xff   : > { %v1109_v27 = vsel %vm1095_vm14, %v1092_v53, %v961_v52 }
 0x100   : > { %v955_v5 = vpop.permute.xlu0 %954 }
 0x101   : > { %v1103_v44 = vsel %vm1095_vm14, %v1086_v35, %v955_v5 }
 0x102   : > { %v963_v6 = vpop.permute.xlu1 %962 }
 0x103   : > { %v1111_v25 = vsel %vm1095_vm14, %v1094_v12, %v963_v6 }
 0x104   : > { %v972_v54 = vpop.permute.xlu0 %971 }
 0x105   : > { %v1118_v40 = vsel %vm1112_vm15, %v1101_v21, %v972_v54 }
 0x106   : > { %v980_v15 = vpop.permute.xlu1 %979 }
 0x107   : > { %v1126_v43 = vsel %vm1112_vm15, %v1109_v27, %v980_v15 }
 0x108   : > { %v974_v41 = vpop.permute.xlu0 %973 }
 0x109   : > { %v1120_v38 = vsel %vm1112_vm15, %v1103_v44, %v974_v41 }
 0x10a   : > { %v982_v1 = vpop.permute.xlu1 %981 }
 0x10b   : > { %v1128_v16 = vsel %vm1112_vm15, %v1111_v25, %v982_v1 }
 0x10c   : > { %v991_v14 = vpop.permute.xlu0 %990 }
 0x10d   : > { %v1135_v4 = vsel %vm1129_vm0, %v1118_v40, %v991_v14 }
 0x10e   : > { %v999_v31 = vpop.permute.xlu1 %998  ;;  %1993 = vmatprep.mubr.msk.bf16.mxu0 %vm1173_vm1, %v1135_v4 }
 0x10f   : > { %v1143_v11 = vsel %vm1129_vm0, %v1126_v43, %v999_v31 }
 0x110   : > { %2001 = vmatprep.mubr.msk.bf16.mxu1 %vm1173_vm1, %v1143_v11  ;;  %v993_v23 = vpop.permute.xlu0 %992 }
 0x111   : > { %v1137_v26 = vsel %vm1129_vm0, %v1120_v38, %v993_v23 }
 0x112   : > { %v1001_v17 = vpop.permute.xlu1 %1000  ;;  %1994 = vmatmul.mubr.msk.bf16.gmra.mxu0 %vm1173_vm1, %v1137_v26 }
 0x113   : > { %v1145_v22 = vsel %vm1129_vm0, %v1128_v16, %v1001_v17 }
 0x114   : > { %2002 = vmatmul.mubr.msk.bf16.gmra.mxu1 %vm1173_vm1, %v1145_v22 }
 0x196   : > { %v1991_v20 = vpop.f32.mrf.mxu0 }
 0x197   : > { %v2870_v61 = vadd.f32 %v1991_v20, %v2867_v45 }
 0x198   : > { %v1999_v0 = vpop.f32.mrf.mxu1  ;;  %v1228_v47 = vpop.f32.mrf.mxu0 }
 0x199   : > { %v1293_v62 = vsub.f32 0.0, %v2870_v61  ;;  %v2874_v24 = vadd.f32 %v1999_v0, %v2867_v45  ;;  %v2877_v46 = vadd.f32 %v2867_v45, %v1228_v47 }
 0x19a   : > { %v1260_v34 = vpop.f32.mrf.mxu1  ;;  %v1992_v39 = vpop.f32.mrf.mxu0 }
 0x19b   : > { %v1311_v56 = vmul.f32 1.442695, %v1293_v62  ;;  %v1301_v28 = vsub.f32 0.0, %v2874_v24  ;;  %v1291_v48 = vsub.f32 0.0, %v2877_v46  ;;  %v2882_v30 = vadd.f32 %v2867_v45, %v1260_v34 }
 0x19c   : > { %v2885_v49 = vadd.f32 %v1992_v39, %v2867_v45  ;;  %v2000_v7 = vpop.f32.mrf.mxu1  ;;  %v1231_v8 = vpop.f32.mrf.mxu0 }
 0x19d   : > { %2076 = vpow2.f32 %v1311_v56  ;;  %v1327_v2 = vmul.f32 1.442695, %v1301_v28  ;;  %v1307_v36 = vmul.f32 1.442695, %v1291_v48  ;;  %v1299_v51 = vsub.f32 0.0, %v2882_v30 }
 0x19e   : > { %v1294_v60 = vsub.f32 0.0, %v2885_v49  ;;  %v2890_v52 = vadd.f32 %v2000_v7, %v2867_v45  ;;  %v2893_v5 = vadd.f32 %v2867_v45, %v1231_v8  ;;  %v1263_v6 = vpop.f32.mrf.mxu1 }
 0x19f   : > { %2078 = vpow2.f32 %v1327_v2  ;;  %v1323_v54 = vmul.f32 1.442695, %v1299_v51  ;;  %v2896_v18 = vadd.f32 %v2867_v45, %v1263_v6  ;;  %v1601_v6 = vld [vmem:[%s2909_s12] sm:$0xf] }
 0x1a0   : > { %2080 = vpow2.f32 %v1307_v36  ;;  %v1313_v15 = vmul.f32 1.442695, %v1294_v60  ;;  %v1302_v32 = vsub.f32 0.0, %v2890_v52  ;;  %v1292_v33 = vsub.f32 0.0, %v2893_v5 }
 0x1a1   : > { %2082 = vpow2.f32 %v1323_v54  ;;  %v1300_v55 = vsub.f32 0.0, %v2896_v18 }
 0x1a2   : > { %2084 = vpow2.f32 %v1313_v15  ;;  %v1329_v41 = vmul.f32 1.442695, %v1302_v32  ;;  %v1309_v37 = vmul.f32 1.442695, %v1292_v33 }
 0x1a3   : > { %v1325_v57 = vmul.f32 1.442695, %v1300_v55  ;;  %v1632_v55 = vld [vmem:[%s2909_s12 + $0x30] sm:$0xf] }
 0x1a4   : > { %2086 = vpow2.f32 %v1329_v41 }
 0x1a5   : > { %2088 = vpow2.f32 %v1309_v37 }
 0x1a6   : > { %2090 = vpow2.f32 %v1325_v57 }
 0x1aa   : > { %v2077_v58 = vpop.eup %2076 }
 0x1ab   : > { %v1341_v59 = vadd.f32 1.0, %v2077_v58 }
 0x1ac   : > { %v2079_v29 = vpop.eup %2078 }
 0x1ad   : > { %v2081_v1 = vpop.eup %2080  ;;  %2092 = vrcp.f32 %v1341_v59  ;;  %v1349_v63 = vadd.f32 1.0, %v2079_v29 }
 0x1ae   : > { %v2083_v3 = vpop.eup %2082  ;;  %v1339_v21 = vadd.f32 1.0, %v2081_v1 }
 0x1af   : > { %v2085_v42 = vpop.eup %2084  ;;  %2094 = vrcp.f32 %v1349_v63  ;;  %v1347_v10 = vadd.f32 1.0, %v2083_v3  ;;  %v1615_v63 = vld [vmem:[%s2909_s12 + $0x14] sm:$0x1] }
 0x1b0   : > { %2096 = vrcp.f32 %v1339_v21  ;;  %v1342_v53 = vadd.f32 1.0, %v2085_v42 }
 0x1b1   : > { %v2087_v40 = vpop.eup %2086  ;;  %2098 = vrcp.f32 %v1347_v10 }
 0x1b2   : > { %v2089_v14 = vpop.eup %2088  ;;  %2100 = vrcp.f32 %v1342_v53  ;;  %v1350_v9 = vadd.f32 1.0, %v2087_v40 }
 0x1b3   : > { %v2091_v13 = vpop.eup %2090  ;;  %v1340_v27 = vadd.f32 1.0, %v2089_v14 }
 0x1b4   : > { %2102 = vrcp.f32 %v1350_v9  ;;  %v1348_v4 = vadd.f32 1.0, %v2091_v13 }
 0x1b5   : > { %2104 = vrcp.f32 %v1340_v27 }
 0x1b6   : > { %2106 = vrcp.f32 %v1348_v4 }
 0x1ba   : > { %v2093_v50 = vpop.eup %2092 }
 0x1bb   : > { %v1373_v35 = vmul.f32 %v2093_v50, %v2870_v61  ;;  %v1643_v50 = vld [vmem:[%s2909_s12 + $0x44] sm:$0x1] }
 0x1bc   : > { %v2095_v43 = vpop.eup %2094 }
 0x1bd   : > { %v2097_v31 = vpop.eup %2096  ;;  %v1958_v19 = vpack.c.bf16 %v1373_v35, %v1373_v35  ;;  %v1381_v44 = vmul.f32 %v2095_v43, %v2874_v24  ;;  %v1611_v24 = vld [vmem:[%s2909_s12 + $0xc] sm:$0xf] }
 0x1be   : > { %v2099_v11 = vpop.eup %2098  ;;  %v1371_v12 = vmul.f32 %v2097_v31, %v2877_v46 }
 0x1bf   : > { %v2101_v38 = vpop.eup %2100  ;;  %v1456_v23 = vshrl.u32 %v1958_v19, 16  ;;  %v1966_v25 = vpack.c.bf16 %v1381_v44, %v1381_v44  ;;  %v1379_v26 = vmul.f32 %v2099_v11, %v2882_v30  ;;  %v1459_v61 = vshll.u32 %v1958_v19, 16  ;;  %v1639_v30 = vld [vmem:[%s2909_s12 + $0x3c] sm:$0xf] }
 0x1c0   : > { %v1956_v16 = vpack.c.bf16 %v1371_v12, %v1371_v12  ;;  %v1374_v17 = vmul.f32 %v2101_v38, %v2885_v49 }
 0x1c1   : > { %v2103_v22 = vpop.eup %2102  ;;  %v1458_v20 = vrot.slane %v1456_v23, 7  ;;  %v1524_v0 = vshrl.u32 %v1966_v25, 16  ;;  %v1964_v47 = vpack.c.bf16 %v1379_v26, %v1379_v26  ;;  %v1527_v48 = vshll.u32 %v1966_v25, 16 }
 0x1c2   : > { %v1439_v46 = vshrl.u32 %v1956_v16, 16  ;;  %v1959_v34 = vpack.c.bf16 %v1374_v17, %v1374_v17  ;;  %v1382_v39 = vmul.f32 %v2103_v22, %v2890_v52  ;;  %v2105_v7 = vpop.eup %2104  ;;  %v1442_v2 = vshll.u32 %v1956_v16, 16  ;;  %v1608_v17 = vld [vmem:[%s2909_s12 + $0x8] sm:$0x1] }
 0x1c3   : > { %v1461_v56 = vor.u32 %v1459_v61, %v1458_v20  ;;  %v1526_v28 = vrot.slane %v1524_v0, 7  ;;  %v1507_v49 = vshrl.u32 %v1964_v47, 16  ;;  %v1510_v54 = vshll.u32 %v1964_v47, 16  ;;  %v2107_v15 = vpop.eup %2106 }
 0x1c4   : > { %v2922_v8 = vrot.slane %v1439_v46, 7  ;;  %v1464_v36 = vshrl.u32 %v1959_v34, 16  ;;  %v1467_v37 = vshll.u32 %v1959_v34, 16  ;;  %v1967_v57 = vpack.c.bf16 %v1382_v39, %v1382_v39 }
 0x1c5   : > { %v1612_v51 = vsel %vm2915_vm5, %v1461_v56, %v1611_v24  ;;  %v1529_v60 = vor.u32 %v1527_v48, %v1526_v28  ;;  %v2927_v52 = vrot.slane %v1507_v49, 7  ;;  %v1462_v58 = vrot.slane %v1458_v20, 4 }
 0x1c6   : > { %1613 = vst [vmem:[%s2909_s12 + $0xc] sm:$0xf] %v1612_v51  ;;  %v1444_v33 = vor.u32 %v1442_v2, %v2922_v8  ;;  %v1466_v41 = vrot.slane %v1464_v36, 7  ;;  %v1372_v3 = vmul.f32 %v2105_v7, %v2893_v5  ;;  %v1532_v53 = vshrl.u32 %v1967_v57, 16  ;;  %v1636_v7 = vld [vmem:[%s2909_s12 + $0x38] sm:$0x1] }
 0x1c7   : > { %v1640_v59 = vsel %vm2915_vm5, %v1529_v60, %v1639_v30  ;;  %v1512_v29 = vor.u32 %v1510_v54, %v2927_v52  ;;  %v1380_v9 = vmul.f32 %v2107_v15, %v2896_v18  ;;  %v1535_v4 = vshll.u32 %v1967_v57, 16 }
 0x1c8   : > { %1641 = vst [vmem:[%s2909_s12 + $0x3c] sm:$0xf] %v1640_v59  ;;  %v1602_v21 = vsel %vm2915_vm5, %v1444_v33, %v1601_v6  ;;  %v1469_v42 = vor.u32 %v1467_v37, %v1466_v41  ;;  %v1471_v10 = vrot.slane %v1466_v41, 4  ;;  %v1957_v14 = vpack.c.bf16 %v1372_v3, %v1372_v3 }
 0x1c9   : > { %1603 = vst [vmem:[%s2909_s12] sm:$0xf] %v1602_v21  ;;  %v1633_v40 = vsel %vm2915_vm5, %v1512_v29, %v1632_v55  ;;  %v1534_v27 = vrot.slane %v1532_v53, 7  ;;  %v1965_v43 = vpack.c.bf16 %v1380_v9, %v1380_v9  ;;  %v1530_v18 = vrot.slane %v1526_v28, 4 }
 0x1ca   : > { %1634 = vst [vmem:[%s2909_s12 + $0x30] sm:$0xf] %v1633_v40  ;;  %v1470_v5 = vsel %vm2943_vm9, %v1462_v58, %v1469_v42  ;;  %v1616_v13 = vsel %vm2931_vm8, %v1471_v10, %v1615_v63  ;;  %v1447_v35 = vshrl.u32 %v1957_v14, 16  ;;  %v1450_v12 = vshll.u32 %v1957_v14, 16 }
 0x1cb   : > { %1614 = vst.msk [vmem:[%s2909_s12 + $0x10] sm:$0xf] %vm1598_vm2, %v1470_v5  ;;  %1617 = vst [vmem:[%s2909_s12 + $0x14] sm:$0x1] %v1616_v13  ;;  %v1537_v31 = vor.u32 %v1535_v4, %v1534_v27  ;;  %v1539_v19 = vrot.slane %v1534_v27, 4  ;;  %v1515_v38 = vshrl.u32 %v1965_v43, 16 }
 0x1cc   : > { %v1449_v11 = vrot.slane %v1447_v35, 7  ;;  %v1445_v25 = vrot.slane %v2922_v8, 4  ;;  %v1518_v47 = vshll.u32 %v1965_v43, 16  ;;  %v1513_v39 = vrot.slane %v2927_v52, 4 }
 0x1cd   : > { %v1663_v44 = vld [vmem:[%s2909_s12 + $0xc] sm:$0x1]  ;;  %v1538_v26 = vsel %vm2943_vm9, %v1530_v18, %v1537_v31  ;;  %v1644_v16 = vsel %vm2931_vm8, %v1539_v19, %v1643_v50  ;;  %v1517_v0 = vrot.slane %v1515_v38, 7 }
 0x1ce   : > { %v1664_v23 = vsel %vm2931_vm8, 0, %v1663_v44  ;;  %1642 = vst.msk [vmem:[%s2909_s12 + $0x40] sm:$0xf] %vm1598_vm2, %v1538_v26  ;;  %1645 = vst [vmem:[%s2909_s12 + $0x44] sm:$0x1] %v1644_v16  ;;  %v1452_v20 = vor.u32 %v1450_v12, %v1449_v11  ;;  %v1454_v61 = vrot.slane %v1449_v11, 4 }
 0x1cf   : > { %1665 = vst [vmem:[%s2909_s12 + $0xc] sm:$0x1] %v1664_v23  ;;  %v1675_v22 = vld [vmem:[%s2909_s12 + $0x3c] sm:$0x1]  ;;  %v1520_v49 = vor.u32 %v1518_v47, %v1517_v0  ;;  %v1522_v36 = vrot.slane %v1517_v0, 4 }
 0x1d0   : > { %v1676_v46 = vsel %vm2931_vm8, 0, %v1675_v22  ;;  %v1660_v34 = vld [vmem:[%s2909_s12] sm:$0x1]  ;;  %v1453_v48 = vsel %vm2943_vm9, %v1445_v25, %v1452_v20  ;;  %v1609_v30 = vsel %vm2931_vm8, %v1454_v61, %v1608_v17 }
 0x1d1   : > { %1677 = vst [vmem:[%s2909_s12 + $0x3c] sm:$0x1] %v1676_v46  ;;  %v1661_v56 = vsel %vm2931_vm8, 0, %v1660_v34  ;;  %v1672_v28 = vld [vmem:[%s2909_s12 + $0x30] sm:$0x1]  ;;  %v1521_v6 = vsel %vm2943_vm9, %v1513_v39, %v1520_v49  ;;  %v1637_v54 = vsel %vm2931_vm8, %v1522_v36, %v1636_v7 }
 0x1d2   : > { %1662 = vst [vmem:[%s2909_s12] sm:$0x1] %v1661_v56  ;;  %v1673_v8 = vsel %vm2931_vm8, 0, %v1672_v28  ;;  %v1688_v2 = vld [vmem:[%s2909_s12 + $0x14] sm:$0x1]  ;;  %1605 = vst.msk [vmem:[%s2909_s12 + $0x4] sm:$0xf] %vm1598_vm2, %v1453_v48  ;;  %v1995_v51 = vpop.f32.mrf.mxu0 }
 0x1d3   : > { %1610 = vst [vmem:[%s2909_s12 + $0x8] sm:$0x1] %v1609_v30  ;;  %1674 = vst [vmem:[%s2909_s12 + $0x30] sm:$0x1] %v1673_v8  ;;  %v1689_v60 = vsel %vm2981_vm10, 0, %v1688_v2  ;;  %v3011_v52 = vadd.f32 %v1995_v51, %v2867_v45 }
 0x1d4   : > { %1690 = vst [vmem:[%s2909_s12 + $0x14] sm:$0x1] %v1689_v60  ;;  %1635 = vst.msk [vmem:[%s2909_s12 + $0x34] sm:$0xf] %vm1598_vm2, %v1521_v6  ;;  %v2003_v15 = vpop.f32.mrf.mxu1  ;;  %v1244_v33 = vpop.f32.mrf.mxu0 }
 0x1d5   : > { %1638 = vst [vmem:[%s2909_s12 + $0x38] sm:$0x1] %v1637_v54  ;;  %v1297_v55 = vsub.f32 0.0, %v3011_v52  ;;  %v3021_v41 = vadd.f32 %v2003_v15, %v2867_v45  ;;  %v3024_v37 = vadd.f32 %v2867_v45, %v1244_v33  ;;  %v1700_v57 = vld [vmem:[%s2909_s12 + $0x44] sm:$0x1] }
 0x1d6   : > { %v1276_v58 = vpop.f32.mrf.mxu1  ;;  %v1996_v59 = vpop.f32.mrf.mxu0  ;;  %v1701_v29 = vsel %vm2981_vm10, 0, %v1700_v57 }
 0x1d7   : > { %v1319_v63 = vmul.f32 1.442695, %v1297_v55  ;;  %v1305_v3 = vsub.f32 0.0, %v3021_v41  ;;  %v1295_v21 = vsub.f32 0.0, %v3024_v37  ;;  %1702 = vst [vmem:[%s2909_s12 + $0x44] sm:$0x1] %v1701_v29  ;;  %v3033_v42 = vadd.f32 %v2867_v45, %v1276_v58 }
 0x1d8   : > { %v3036_v10 = vadd.f32 %v1996_v59, %v2867_v45  ;;  %v2004_v53 = vpop.f32.mrf.mxu1  ;;  %v1247_v40 = vpop.f32.mrf.mxu0 }
 0x1d9   : > { %2108 = vpow2.f32 %v1319_v63  ;;  %v1335_v9 = vmul.f32 1.442695, %v1305_v3  ;;  %v1315_v5 = vmul.f32 1.442695, %v1295_v21  ;;  %v3040_v13 = vadd.f32 %v2004_v53, %v2867_v45  ;;  %v1625_v53 = vld [vmem:[%s2909_s12 + $0x24] sm:$0xf] }
 0x1da   : > { %v1685_v14 = vld [vmem:[%s2909_s12 + $0x8] sm:$0x1]  ;;  %v1303_v4 = vsub.f32 0.0, %v3033_v42  ;;  %v1298_v50 = vsub.f32 0.0, %v3036_v10  ;;  %v3047_v35 = vadd.f32 %v2867_v45, %v1247_v40  ;;  %v1279_v43 = vpop.f32.mrf.mxu1 }
 0x1db   : > { %v1686_v27 = vsel %vm2981_vm10, 0, %v1685_v14  ;;  %2110 = vpow2.f32 %v1335_v9  ;;  %v1306_v18 = vsub.f32 0.0, %v3040_v13  ;;  %v3052_v31 = vadd.f32 %v2867_v45, %v1279_v43 }
 0x1dc   : > { %1687 = vst [vmem:[%s2909_s12 + $0x8] sm:$0x1] %v1686_v27  ;;  %v1697_v19 = vld [vmem:[%s2909_s12 + $0x38] sm:$0x1]  ;;  %2112 = vpow2.f32 %v1315_v5  ;;  %v1331_v44 = vmul.f32 1.442695, %v1303_v4 }
 0x1dd   : > { %v1321_v11 = vmul.f32 1.442695, %v1298_v50  ;;  %v1698_v12 = vsel %vm2981_vm10, 0, %v1697_v19  ;;  %v1337_v38 = vmul.f32 1.442695, %v1306_v18  ;;  %v1296_v23 = vsub.f32 0.0, %v3047_v35 }
 0x1de   : > { %v1304_v25 = vsub.f32 0.0, %v3052_v31  ;;  %1699 = vst [vmem:[%s2909_s12 + $0x38] sm:$0x1] %v1698_v12  ;;  %2114 = vpow2.f32 %v1331_v44  ;;  %v1653_v4 = vld [vmem:[%s2909_s12 + $0x54] sm:$0xf] }
 0x1df   : > { %2116 = vpow2.f32 %v1321_v11  ;;  %v1317_v26 = vmul.f32 1.442695, %v1296_v23  ;;  %v1618_v11 = vld [vmem:[%s2909_s12 + $0x18] sm:$0xf] }
 0x1e0   : > { %v1333_v16 = vmul.f32 1.442695, %v1304_v25  ;;  %2118 = vpow2.f32 %v1337_v38 }
 0x1e1   : > { %2120 = vpow2.f32 %v1317_v26 }
 0x1e2   : > { %2122 = vpow2.f32 %v1333_v16 }
 0x1e6   : > { %v2109_v45 = vpop.eup %2108 }
 0x1e7   : > { %v1345_v17 = vadd.f32 1.0, %v2109_v45  ;;  %v1646_v45 = vld [vmem:[%s2909_s12 + $0x48] sm:$0xf] }
 0x1e8   : > { %v2111_v22 = vpop.eup %2110 }
 0x1e9   : > { %v2113_v20 = vpop.eup %2112  ;;  %2124 = vrcp.f32 %v1345_v17  ;;  %v1353_v61 = vadd.f32 1.0, %v2111_v22 }
 0x1ea   : > { %v1343_v0 = vadd.f32 1.0, %v2113_v20 }
 0x1eb   : > { %v2115_v47 = vpop.eup %2114  ;;  %2126 = vrcp.f32 %v1353_v61 }
 0x1ec   : > { %v2117_v46 = vpop.eup %2116  ;;  %2128 = vrcp.f32 %v1343_v0  ;;  %v1351_v34 = vadd.f32 1.0, %v2115_v47  ;;  %v1629_v47 = vld [vmem:[%s2909_s12 + $0x2c] sm:$0x1] }
 0x1ed   : > { %v2119_v39 = vpop.eup %2118  ;;  %v1346_v56 = vadd.f32 1.0, %v2117_v46 }
 0x1ee   : > { %v2121_v28 = vpop.eup %2120  ;;  %2130 = vrcp.f32 %v1351_v34  ;;  %v1354_v48 = vadd.f32 1.0, %v2119_v39 }
 0x1ef   : > { %v2123_v30 = vpop.eup %2122  ;;  %2132 = vrcp.f32 %v1346_v56  ;;  %v1344_v49 = vadd.f32 1.0, %v2121_v28 }
 0x1f0   : > { %2134 = vrcp.f32 %v1354_v48  ;;  %v1352_v7 = vadd.f32 1.0, %v2123_v30 }
 0x1f1   : > { %2136 = vrcp.f32 %v1344_v49 }
 0x1f2   : > { %2138 = vrcp.f32 %v1352_v7  ;;  %v1657_v7 = vld [vmem:[%s2909_s12 + $0x5c] sm:$0x1] }
 0x1f6   : > { %v2125_v8 = vpop.eup %2124 }
 0x1f7   : > { %v1377_v2 = vmul.f32 %v2125_v8, %v3011_v52 }
 0x1f8   : > { %v2127_v36 = vpop.eup %2126 }
 0x1f9   : > { %v2129_v51 = vpop.eup %2128  ;;  %v1962_v60 = vpack.c.bf16 %v1377_v2, %v1377_v2  ;;  %v1385_v6 = vmul.f32 %v2127_v36, %v3021_v41 }
 0x1fa   : > { %v1375_v54 = vmul.f32 %v2129_v51, %v3024_v37 }
 0x1fb   : > { %v2131_v15 = vpop.eup %2130  ;;  %v1490_v33 = vshrl.u32 %v1962_v60, 16  ;;  %v1970_v55 = vpack.c.bf16 %v1385_v6, %v1385_v6  ;;  %v1493_v3 = vshll.u32 %v1962_v60, 16 }
 0x1fc   : > { %v2133_v57 = vpop.eup %2132  ;;  %v1960_v58 = vpack.c.bf16 %v1375_v54, %v1375_v54  ;;  %v1383_v59 = vmul.f32 %v2131_v15, %v3033_v42 }
 0x1fd   : > { %v2135_v29 = vpop.eup %2134  ;;  %v1492_v63 = vrot.slane %v1490_v33, 7  ;;  %v1558_v52 = vshrl.u32 %v1970_v55, 16  ;;  %v1378_v21 = vmul.f32 %v2133_v57, %v3036_v10  ;;  %v1561_v5 = vshll.u32 %v1970_v55, 16 }
 0x1fe   : > { %v1473_v40 = vshrl.u32 %v1960_v58, 16  ;;  %v1968_v41 = vpack.c.bf16 %v1383_v59, %v1383_v59  ;;  %v1386_v37 = vmul.f32 %v2135_v29, %v3040_v13  ;;  %v1476_v42 = vshll.u32 %v1960_v58, 16  ;;  %v2137_v19 = vpop.eup %2136  ;;  %v1622_v29 = vld [vmem:[%s2909_s12 + $0x20] sm:$0x1] }
 0x1ff   : > { %v1495_v14 = vor.u32 %v1493_v3, %v1492_v63  ;;  %v1560_v9 = vrot.slane %v1558_v52, 7  ;;  %v1963_v27 = vpack.c.bf16 %v1378_v21, %v1378_v21  ;;  %v2139_v12 = vpop.eup %2138  ;;  %v1496_v38 = vrot.slane %v1492_v63, 4 }
 0x200   : > { %v3068_v50 = vrot.slane %v1473_v40, 7  ;;  %v1541_v43 = vshrl.u32 %v1968_v41, 16  ;;  %v1971_v18 = vpack.c.bf16 %v1386_v37, %v1386_v37  ;;  %v1544_v26 = vshll.u32 %v1968_v41, 16 }
 0x201   : > { %v1626_v10 = vsel %vm2915_vm5, %v1495_v14, %v1625_v53  ;;  %v1563_v44 = vor.u32 %v1561_v5, %v1560_v9  ;;  %v1498_v13 = vshrl.u32 %v1963_v27, 16  ;;  %v1501_v22 = vshll.u32 %v1963_v27, 16  ;;  %v1650_v14 = vld [vmem:[%s2909_s12 + $0x50] sm:$0x1] }
 0x202   : > { %1627 = vst [vmem:[%s2909_s12 + $0x24] sm:$0xf] %v1626_v10  ;;  %v1478_v23 = vor.u32 %v1476_v42, %v3068_v50  ;;  %v3075_v25 = vrot.slane %v1541_v43, 7  ;;  %v1566_v20 = vshrl.u32 %v1971_v18, 16  ;;  %v1569_v46 = vshll.u32 %v1971_v18, 16 }
 0x203   : > { %v1654_v16 = vsel %vm2915_vm5, %v1563_v44, %v1653_v4  ;;  %v1500_v17 = vrot.slane %v1498_v13, 7  ;;  %v1376_v34 = vmul.f32 %v2137_v19, %v3047_v35  ;;  %v1384_v48 = vmul.f32 %v2139_v12, %v3052_v31 }
 0x204   : > { %1655 = vst [vmem:[%s2909_s12 + $0x54] sm:$0xf] %v1654_v16  ;;  %v1619_v61 = vsel %vm2915_vm5, %v1478_v23, %v1618_v11  ;;  %v1546_v0 = vor.u32 %v1544_v26, %v3075_v25  ;;  %v1568_v28 = vrot.slane %v1566_v20, 7  ;;  %v1564_v30 = vrot.slane %v1560_v9, 4 }
 0x205   : > { %1620 = vst [vmem:[%s2909_s12 + $0x18] sm:$0xf] %v1619_v61  ;;  %v1503_v39 = vor.u32 %v1501_v22, %v1500_v17  ;;  %v1505_v56 = vrot.slane %v1500_v17, 4  ;;  %v1961_v8 = vpack.c.bf16 %v1376_v34, %v1376_v34  ;;  %v1969_v31 = vpack.c.bf16 %v1384_v48, %v1384_v48 }
 0x206   : > { %v1647_v49 = vsel %vm2915_vm5, %v1546_v0, %v1646_v45  ;;  %v1571_v36 = vor.u32 %v1569_v46, %v1568_v28  ;;  %v1573_v51 = vrot.slane %v1568_v28, 4  ;;  %v1479_v59 = vrot.slane %v3068_v50, 4 }
 0x207   : > { %1648 = vst [vmem:[%s2909_s12 + $0x48] sm:$0xf] %v1647_v49  ;;  %v1504_v35 = vsel %vm2943_vm9, %v1496_v38, %v1503_v39  ;;  %v1630_v2 = vsel %vm2931_vm8, %v1505_v56, %v1629_v47  ;;  %v1481_v62 = vshrl.u32 %v1961_v8, 16  ;;  %v1484_v55 = vshll.u32 %v1961_v8, 16 }
 0x208   : > { %1628 = vst.msk [vmem:[%s2909_s12 + $0x28] sm:$0xf] %vm1598_vm2, %v1504_v35  ;;  %1631 = vst [vmem:[%s2909_s12 + $0x2c] sm:$0x1] %v1630_v2  ;;  %v1572_v6 = vsel %vm2943_vm9, %v1564_v30, %v1571_v36  ;;  %v1658_v54 = vsel %vm2931_vm8, %v1573_v51, %v1657_v7  ;;  %v1549_v57 = vshrl.u32 %v1969_v31, 16  ;;  %v1552_v63 = vshll.u32 %v1969_v31, 16 }
 0x209   : > { %v1669_v60 = vld [vmem:[%s2909_s12 + $0x24] sm:$0x1]  ;;  %1656 = vst.msk [vmem:[%s2909_s12 + $0x58] sm:$0xf] %vm1598_vm2, %v1572_v6  ;;  %1659 = vst [vmem:[%s2909_s12 + $0x5c] sm:$0x1] %v1658_v54 }
 0x20a   : > { %v1670_v15 = vsel %vm2931_vm8, 0, %v1669_v60  ;;  %v1483_v33 = vrot.slane %v1481_v62, 7  ;;  %v1551_v40 = vrot.slane %v1549_v57, 7  ;;  %v1547_v37 = vrot.slane %v3075_v25, 4 }
 0x20b   : > { %1671 = vst [vmem:[%s2909_s12 + $0x24] sm:$0x1] %v1670_v15  ;;  %v1681_v58 = vld [vmem:[%s2909_s12 + $0x54] sm:$0x1] }
 0x20c   : > { %v1682_v3 = vsel %vm2931_vm8, 0, %v1681_v58  ;;  %v1666_v52 = vld [vmem:[%s2909_s12 + $0x18] sm:$0x1]  ;;  %v1486_v21 = vor.u32 %v1484_v55, %v1483_v33  ;;  %v1488_v53 = vrot.slane %v1483_v33, 4  ;;  %v1554_v4 = vor.u32 %v1552_v63, %v1551_v40 }
 0x20d   : > { %1683 = vst [vmem:[%s2909_s12 + $0x54] sm:$0x1] %v1682_v3  ;;  %v1667_v41 = vsel %vm2931_vm8, 0, %v1666_v52  ;;  %v1556_v50 = vrot.slane %v1551_v40, 4 }
 0x20e   : > { %1668 = vst [vmem:[%s2909_s12 + $0x18] sm:$0x1] %v1667_v41  ;;  %v1678_v9 = vld [vmem:[%s2909_s12 + $0x48] sm:$0x1]  ;;  %v1487_v5 = vsel %vm2943_vm9, %v1479_v59, %v1486_v21  ;;  %v1623_v27 = vsel %vm2931_vm8, %v1488_v53, %v1622_v29  ;;  %v1555_v19 = vsel %vm2943_vm9, %v1547_v37, %v1554_v4 }
 0x20f   : > { %v1679_v42 = vsel %vm2931_vm8, 0, %v1678_v9  ;;  %v1694_v43 = vld [vmem:[%s2909_s12 + $0x2c] sm:$0x1]  ;;  %1621 = vst.msk [vmem:[%s2909_s12 + $0x1c] sm:$0xf] %vm1598_vm2, %v1487_v5  ;;  %v1651_v10 = vsel %vm2931_vm8, %v1556_v50, %v1650_v14 }
 0x210   : > { %1624 = vst [vmem:[%s2909_s12 + $0x20] sm:$0x1] %v1623_v27  ;;  %1680 = vst [vmem:[%s2909_s12 + $0x48] sm:$0x1] %v1679_v42  ;;  %v1695_v18 = vsel %vm2981_vm10, 0, %v1694_v43 }
 0x211   : > { %1696 = vst [vmem:[%s2909_s12 + $0x2c] sm:$0x1] %v1695_v18  ;;  %v1706_v44 = vld [vmem:[%s2909_s12 + $0x5c] sm:$0x1]  ;;  %1649 = vst.msk [vmem:[%s2909_s12 + $0x4c] sm:$0xf] %vm1598_vm2, %v1555_v19 }
 0x212   : > { %1652 = vst [vmem:[%s2909_s12 + $0x50] sm:$0x1] %v1651_v10  ;;  %v1707_v11 = vsel %vm2981_vm10, 0, %v1706_v44 }
 0x213   : > { %1708 = vst [vmem:[%s2909_s12 + $0x5c] sm:$0x1] %v1707_v11 }
 0x217   : > { %v1691_v13 = vld [vmem:[%s2909_s12 + $0x20] sm:$0x1] }
 0x218   : > { %v1692_v12 = vsel %vm2981_vm10, 0, %v1691_v13 }
 0x219   : > { %1693 = vst [vmem:[%s2909_s12 + $0x20] sm:$0x1] %v1692_v12  ;;  %v1703_v38 = vld [vmem:[%s2909_s12 + $0x50] sm:$0x1] }
 0x21a   : > { %v1704_v1 = vsel %vm2981_vm10, 0, %v1703_v38 }
 0x21b   : > { %1705 = vst [vmem:[%s2909_s12 + $0x50] sm:$0x1] %v1704_v1 }
 0x21c PF: > { %s15_s22 = sadd.s32 1, %s2178_s22   ;;  %s3192_s18 = smov %s2170_s20 }
 0x21d   : > { %p12_p12 = scmp.ge.s32.totalorder %s15_s22, 6   ;;  %s3193_s19 = smov %s2174_s21 }
 0x21e   : > { %s3194_s20 = smov %s3197_s23  ;;  %s3195_s21 = smov %s3201_s24 }
 0x21f   :  { %14 = sbr.rel (!%p12_p12) target bundleno = 3 (0x3), region = 76 }

// kernel: a_call__.3
= control target key start
LH: loop header
LB: loop body
LE: loop exit
PB: predicated region body
PF: predicated region fallthrough
CT: control target
= control target key end

     0   :  { %s4213_s24 = smov 0   ;;  %s4215_s25 = smov 0   ;;  %s5189_s0 = inlined_call_operand.vmem [shape: bf16[2,16,18,32], index: 0, kind: input, shape index: {}, may-alias: {0,1,2}]   ;;  %s5190_s1 = inlined_call_operand.vmem [shape: bf16[2,16,18,32], index: 1, kind: input, shape index: {}, may-alias: {0,1,2}]   ;;  %s5191_s2 = inlined_call_operand.vmem [shape: bf16[2,16,18,32], index: 2, kind: input, shape index: {}, may-alias: {0,1,2}]   ;;  %s5192_s3 = inlined_call_operand.vmem [shape: bf16[16,32,32], index: 3, kind: input, shape index: {}]   ;;  %s5193_s4 = inlined_call_operand.vmem [shape: f32[1,32], index: 4, kind: input, shape index: {}]   ;;  %s5194_s5 = inlined_call_operand.vmem [shape: bf16[32,32], index: 5, kind: input, shape index: {}]   ;;  %s5195_s6 = inlined_call_operand.vmem [shape: f32[1,32], index: 6, kind: input, shape index: {}]   ;;  %s5196_s7 = inlined_call_operand.vmem [shape: f32[2,16,2,16,64], index: 7, kind: output, shape index: {}]  }
   0x1   :  { %s4217_s26 = smov 0   ;;  %s4219_s27 = smov 0  }
   0x2   :  { %s4221_s28 = smov 0  }
   0x3 LB: > { %s26_s29 = sadd.s32 1, %s4162_s26  ;;  %s29_s30 = sadd.s32 1, %s4166_s27  ;;  %s4170_s28 = sphi %s4221_s28, %s17_s28   ;;  %s4166_s27 = sphi %s4219_s27, %s5208_s27   ;;  %s4162_s26 = sphi %s4217_s26, %s5207_s26   ;;  %s4158_s25 = sphi %s4215_s25, %s5206_s25   ;;  %s4154_s24 = sphi %s4213_s24, %s5205_s24  }
   0x4   : > { %p27_p0 = scmp.ge.s32.totalorder %s26_s29, 4  ;;  %p3193_p1 = scmp.ge.s32.totalorder %s4170_s28, 1 }
   0x5   : > { %p323_p2 = scmp.lt.s32.totalorder %s4170_s28, 9 }
   0x6   : > { %s5210_s29 = smov (%p27_p0, %s26_s29), 0  ;;  %s5212_s30 = smov (!%p27_p0, %s29_s30), %s4166_s27 }
   0x7   : > { %p324_p3 = pnand %p3193_p1, %p323_p2  ;;  %p31_p4 = scmp.ge.s32.totalorder %s5212_s30, 2 }
   0x9   : > { %s5214_s30 = smov (%p31_p4, %s5212_s30), 0  ;;  %327 = sbr.rel (%p324_p3) target bundleno = 1498 (0x5da), region = 48 }
   0xe   : > { %v3836_v0 = vld [vmem:[%s5192_s3 + $0x8] sm:$0xff]   ;;  %s4249_s10 = sshll.u32 %s4154_s24, 2  ;;  %v3837_v1 = vld [vmem:[%s5192_s3 + $0x18] sm:$0xff]   ;;  %p392_p5 = scmp.lt.s32.totalorder %s4158_s25, 1  ;;  %v3838_v2 = vld [vmem:[%s5192_s3] sm:$0xff]   ;;  %vm723_vm3 = vcmask 261120  }
   0xf   : > { %3563 = vmatprep.subr.bf16.mxu1 %v3836_v0  ;;  %p394_p6 = scmp.lt.s32.totalorder %s4249_s10, 15  ;;  %3551 = vmatprep.subr.bf16.mxu0 %v3837_v1  ;;  %v3839_v3 = vld [vmem:[%s5192_s3 + $0x10] sm:$0xff]   ;;  %s3197_s19 = sadd.s32 4294967295, %s4249_s10  ;;  %v4268_v4 = vld [vmem:[%s5192_s3 + $0x28] sm:$0xff]   ;;  %v4273_v5 = vld [vmem:[%s5192_s3 + $0x38] sm:$0xff]   ;;  %vm591_vm5 = vcmask 1042432  }
  0x10   : > { %3564 = vmatpush3.bf16.msra.mxu1 %v3836_v0  ;;  %s5216_s25 = smov (!%p392_p5, %s4158_s25), 1  ;;  %3552 = vmatpush3.bf16.msra.mxu0 %v3837_v1  ;;  %p404_p7 = scmp.gt.s32.totalorder %s3197_s19, 0  ;;  %vm480_vm0 = vsmask.f32 3328  ;;  %vm481_vm1 = vsmask.f32 7440 }
  0x11   : > { %3565 = vmatprep.subr.bf16.mxu1 %v3838_v2  ;;  %s395_s17 = scalar_select %p394_p6, %s4249_s10, 15  ;;  %3553 = vmatprep.subr.bf16.mxu0 %v3839_v3  ;;  %vm4321_vm4 = vmor %vm480_vm0, %vm481_vm1  ;;  %v3846_v59 = vld [vmem:[%s5192_s3 + $0x30] sm:$0xff]   ;;  %vm592_vm6 = vcmask 1046532   ;;  %v4779_v30 = vld [vmem:[%s5192_s3 + $0xc8] sm:$0xff]   ;;  %vm3024_vm9 = vcmask 523264  }
  0x12   : > { %s4262_s18 = smul.u32 48, %s5216_s25  ;;  %p3198_p8 = scmp.lt.s32.totalorder %s3197_s19, 15  ;;  %vm4491_vm7 = vmor %vm591_vm5, %vm592_vm6 }
  0x13   : > { %s3791_s20 = smul.u32 3, %s395_s17  ;;  %s3210_s9 = sshll.u32 %s395_s17, 2 }
  0x14   : > { %3566 = vmatpush3.bf16.msra.mxu1 %v3838_v2  ;;  %s3211_s12 = sshll.u32 %s5216_s25, 6  ;;  %3554 = vmatpush3.bf16.msra.mxu0 %v3839_v3  ;;  %p448_p9 = scmp.eq.s32.totalorder %s4154_s24, 0 }
  0x15   : > { %s398_s11 = sadd.s32 %s4262_s18, %s3791_s20  ;;  %3587 = vmatprep.subr.bf16.mxu1 %v4273_v5  ;;  %s4277_s14 = sadd.s32 %s3211_s12, %s3210_s9  ;;  %3575 = vmatprep.subr.bf16.mxu0 %v4268_v4 }
  0x16   : > { %s3195_s13 = sshll.u32 %s398_s11, 2  ;;  %p458_p11 = scmp.eq.s32.totalorder %s4154_s24, 3 }
  0x17   : > { %s4283_s21 = scalar_lea.vmem %s5189_s0, %s3195_s13 }
  0x18   : > { %s405_s17 = scalar_select %p404_p7, %s3197_s19, 0  ;;  %v4287_v6 = vld [vmem:[%s4283_s21] sm:$0xf]  ;;  %v4290_v7 = vld [vmem:[%s4283_s21 + $0x4] sm:$0xf] }
  0x19   : > { %v508_v8 = vshrl.u32 %v4287_v6, 16  ;;  %v511_v9 = vshll.u32 %v4287_v6, 16  ;;  %v517_v10 = vshll.u32 %v4290_v7, 16  ;;  %v521_v11 = vshrl.u32 %v4290_v7, 16  ;;  %v4299_v12 = vld [vmem:[%s4283_s21 + $0x8] sm:$0x1] }
  0x1a   : > { %s5218_s17 = smov (!%p3198_p8, %s405_s17), 15  ;;  %v527_v17 = vshll.u32 %v4299_v12, 16  ;;  %v4303_v18 = vld [vmem:[%s4283_s21 + $0xc] sm:$0xf]  ;;  %v4306_v22 = vld [vmem:[%s4283_s21 + $0x10] sm:$0xf]  ;;  %v4334_v39 = vcombine.low %v4287_v6, %v4290_v7 }
  0x1b   : > { %s452_s25 = scalar_select %p448_p9, 1, 0  ;;  %v510_v13 = vrot.slane %v508_v8, 4  ;;  %v513_v14 = vrot.slane %v511_v9, 5  ;;  %v519_v15 = vrot.slane %v517_v10, 5  ;;  %v523_v16 = vrot.slane %v521_v11, 4 }
  0x1c   : > { %s3793_s20 = smul.u32 3, %s5218_s17  ;;  %v4309_v23 = vld [vmem:[%s4283_s21 + $0x14] sm:$0x1]  ;;  %v532_v24 = vshrl.u32 %v4303_v18, 16  ;;  %v535_v26 = vshll.u32 %v4303_v18, 16  ;;  %v541_v27 = vshll.u32 %v4306_v22, 16  ;;  %v4361_v52 = vcombine.low %v4303_v18, %v4306_v22 }
  0x1d   : > { %v453_v19 = vstv %s452_s25  ;;  %v514_v20 = vor.u32 %v513_v14, %v510_v13  ;;  %v524_v21 = vor.u32 %v523_v16, %v519_v15  ;;  %v529_v31 = vrot.slane %v527_v17, 5  ;;  %v4364_v53 = vld [vmem:[%s4283_s21 + $0x18] sm:$0xf]  ;;  %v4367_v54 = vld [vmem:[%s4283_s21 + $0x1c] sm:$0xf] }
  0x1e   : > { %s412_s19 = sadd.s32 %s3793_s20, %s4262_s18  ;;  %vm4313_vm2 = vcmp.eq.s32.totalorder %v453_v19, 1  ;;  %v534_v32 = vrot.slane %v532_v24, 4  ;;  %v537_v33 = vrot.slane %v535_v26, 5  ;;  %v4328_v34 = vrot.slane %v541_v27, 5  ;;  %v4380_v0 = vld [vmem:[%s4283_s21 + $0x20] sm:$0x1] }
  0x1f   : > { %s3203_s22 = sshll.u32 %s412_s19, 2  ;;  %v515_v28 = vrot.slane %v514_v20, 4  ;;  %v525_v29 = vrot.slane %v524_v21, 4  ;;  %v545_v35 = vshrl.u32 %v4306_v22, 16  ;;  %v551_v36 = vshll.u32 %v4309_v23, 16  ;;  %s3430_s20 = sadd.s32 4, %s4249_s10 }
  0x20   : > { %s414_s9 = scalar_lea.vmem %s5190_s1, %s3203_s22  ;;  %v4371_v58 = vcombine.low %v4364_v53, %v4367_v54  ;;  %v538_v63 = vor.u32 %v537_v33, %v534_v32  ;;  %v556_v8 = vshrl.u32 %v4364_v53, 16  ;;  %v4386_v9 = vld [vmem:[%s4283_s21 + $0x24] sm:$0xf]  ;;  %v559_v13 = vshll.u32 %v4364_v53, 16  ;;  %v4399_v25 = vld [vmem:[%s4283_s21 + $0x28] sm:$0xf] }
  0x21   : > { %v449_v37 = vld [vmem:[%s414_s9] sm:$0xf]  ;;  %v450_v38 = vld [vmem:[%s414_s9 + $0x4] sm:$0xf]  ;;  %v451_v40 = vld [vmem:[%s414_s9 + $0x8] sm:$0x1]  ;;  %v520_v44 = vsel %vm4321_vm4, %v515_v28, %v519_v15  ;;  %v530_v48 = vsel %vm4321_vm4, %v525_v29, %v529_v31 }
  0x22   : > { %v4338_v41 = vsel %vm4313_vm2, 0, %v449_v37  ;;  %v4342_v42 = vsel %vm4313_vm2, 0, %v450_v38  ;;  %v4346_v43 = vsel %vm4313_vm2, 0, %v451_v40  ;;  %v4377_v62 = vcombine.low %v520_v44, %v530_v48  ;;  %v4402_v26 = vld [vmem:[%s4283_s21 + $0x2c] sm:$0x1]  ;;  %p421_p10 = scmp.lt.s32.totalorder %s3430_s20, 15 }
  0x23   : > { %v484_v45 = vshrl.u32 %v4338_v41, 16  ;;  %v487_v46 = vshll.u32 %v4338_v41, 16  ;;  %v497_v47 = vshrl.u32 %v4342_v42, 16  ;;  %v3233_v49 = vcombine.low %v4338_v41, %v4342_v42  ;;  %s462_s11 = scalar_select %p458_p11, 1, 0 }
  0x24   : > { %v493_v50 = vshll.u32 %v4342_v42, 16  ;;  %v503_v51 = vshll.u32 %v4346_v43, 16  ;;  %v547_v2 = vrot.slane %v545_v35, 4  ;;  %v553_v3 = vrot.slane %v551_v36, 5  ;;  %s5220_s20 = smov (!%p421_p10, %s3430_s20), 15 }
  0x25   : > { %v486_v55 = vrot.slane %v484_v45, 4  ;;  %v489_v56 = vrot.slane %v487_v46, 5  ;;  %v499_v57 = vrot.slane %v497_v47, 4  ;;  %3567 = vmatprep.mubr.msk.bf16.mxu1 %vm723_vm3, %v3233_v49  ;;  %v539_v11 = vrot.slane %v538_v63, 4  ;;  %v3845_v46 = vld [vmem:[%s5192_s3 + $0x20] sm:$0xff]   ;;  %s5222_s20 = smov (!%p421_p10, %s5220_s20), 15 }
  0x26   : > { %v495_v60 = vrot.slane %v493_v50, 5  ;;  %v505_v61 = vrot.slane %v503_v51, 5  ;;  %3568 = vmatmul.mubr.msk.bf16.vlgmr.msra.gmra.mxu1 %vm723_vm3, %v4334_v39  ;;  %v565_v14 = vshll.u32 %v4367_v54, 16  ;;  %v548_v16 = vor.u32 %v547_v2, %v4328_v34  ;;  %s3794_s19 = smul.u32 3, %s5222_s20 }
  0x27   : > { %v490_v1 = vor.u32 %v489_v56, %v486_v55  ;;  %3588 = vmatpush3.bf16.msra.mxu1 %v4273_v5  ;;  %3571 = vmatprep.mubr.msk.bf16.mxu1 %vm723_vm3, %v4361_v52  ;;  %v558_v17 = vrot.slane %v556_v8, 4  ;;  %v569_v19 = vshrl.u32 %v4367_v54, 16  ;;  %v544_v5 = vsel %vm4321_vm4, %v539_v11, %v4328_v34 }
  0x28   : > { %v500_v10 = vor.u32 %v499_v57, %v495_v60  ;;  %3589 = vmatprep.subr.bf16.mxu1 %v3846_v59  ;;  %v561_v21 = vrot.slane %v559_v13, 5  ;;  %v567_v24 = vrot.slane %v565_v14, 5  ;;  %v549_v28 = vrot.slane %v548_v16, 4  ;;  %s429_s10 = sadd.s32 %s3794_s19, %s4262_s18  ;;  %s4172_s18 = smov 32  }
  0x29   : > { %v491_v15 = vrot.slane %v490_v1, 4  ;;  %v571_v29 = vrot.slane %v569_v19, 4  ;;  %v575_v31 = vshll.u32 %v4380_v0, 16  ;;  %v623_v34 = vshrl.u32 %v4386_v9, 16  ;;  %s3208_s22 = sshll.u32 %s429_s10, 2  ;;  %s3212_s19 = sshll.u32 %s4277_s14, 3 }
  0x2a   : > { %v501_v20 = vrot.slane %v500_v10, 4  ;;  %v562_v33 = vor.u32 %v561_v21, %v558_v17  ;;  %v626_v35 = vshll.u32 %v4386_v9, 16  ;;  %v554_v37 = vsel %vm4321_vm4, %v549_v28, %v553_v3  ;;  %v3850_v17 = vld [vmem:[%s5192_s3 + $0x58] sm:$0xff]   ;;  %s431_s9 = scalar_lea.vmem %s5191_s2, %s3208_s22  ;;  %s4995_s23 = scalar_lea.vmem %s5196_s7, %s3212_s19 }
  0x2b   : > { %v496_v27 = vsel %vm4321_vm4, %v491_v15, %v495_v60  ;;  %3590 = vmatpush3.bf16.msra.mxu1 %v3846_v59  ;;  %v572_v38 = vor.u32 %v571_v29, %v567_v24  ;;  %v577_v40 = vrot.slane %v575_v31, 5  ;;  %v4415_v44 = vcombine.low %v544_v5, %v554_v37  ;;  %v4470_v15 = vld [vmem:[%s5194_s5 + $0x8] sm:$0xff]   ;;  %v4483_v5 = vld [vmem:[%s5194_s5] sm:$0xff]  }
  0x2c   : > { %v506_v32 = vsel %vm4321_vm4, %v501_v20, %v505_v61  ;;  %v563_v45 = vrot.slane %v562_v33, 4  ;;  %v625_v47 = vrot.slane %v623_v34, 4  ;;  %v628_v48 = vrot.slane %v626_v35, 5  ;;  %3611 = vmatprep.subr.bf16.mxu1 %v3850_v17 }
  0x2d   : > { %v4411_v36 = vcombine.low %v496_v27, %v506_v32  ;;  %v573_v49 = vrot.slane %v572_v38, 4  ;;  %v632_v50 = vshll.u32 %v4399_v25, 16  ;;  %v636_v51 = vshrl.u32 %v4399_v25, 16 }
  0x2e   : > { %3572 = vmatmul.mubr.msk.bf16.gmra.mxu1 %vm723_vm3, %v4371_v58  ;;  %v642_v55 = vshll.u32 %v4402_v26, 16  ;;  %v629_v56 = vor.u32 %v628_v48, %v625_v47  ;;  %v568_v57 = vsel %vm4321_vm4, %v563_v45, %v567_v24  ;;  %v4462_v13 = vcombine.low %v4386_v9, %v4399_v25  ;;  %v3851_v24 = vld [vmem:[%s5192_s3 + $0x50] sm:$0xff]  }
  0x2f   : > { %3555 = vmatprep.mubr.msk.bf16.mxu0 %vm723_vm3, %v4411_v36  ;;  %3591 = vmatprep.mubr.msk.bf16.mxu1 %vm723_vm3, %v4377_v62  ;;  %v578_v59 = vsel %vm4321_vm4, %v573_v49, %v577_v40  ;;  %v634_v60 = vrot.slane %v632_v50, 5  ;;  %v638_v61 = vrot.slane %v636_v51, 4  ;;  %v596_v14 = vrot.slane %v4342_v42, 5 }
  0x30   : > { %3556 = vmatmul.mubr.msk.bf16.vlgmr.msra.gmra.mxu0 %vm723_vm3, %v4377_v62  ;;  %v630_v63 = vrot.slane %v629_v56, 4  ;;  %v644_v1 = vrot.slane %v642_v55, 5  ;;  %v4438_v3 = vcombine.low %v568_v57, %v578_v59  ;;  %v603_v16 = vrot.slane %v4290_v7, 5 }
  0x31   : > { %3576 = vmatpush3.bf16.msra.mxu0 %v4268_v4  ;;  %3559 = vmatprep.mubr.msk.bf16.mxu0 %vm723_vm3, %v4415_v44  ;;  %v639_v2 = vor.u32 %v638_v61, %v634_v60  ;;  %v3213_v19 = vrot.slane %v4338_v41, 9  ;;  %v598_v20 = vrot.slane %v596_v14, 4  ;;  %v599_v42 = vrot.slane %v4346_v43, 5 }
  0x32   : > { %3577 = vmatprep.subr.bf16.mxu0 %v3845_v46  ;;  %v635_v4 = vsel %vm4321_vm4, %v630_v63, %v634_v60  ;;  %v3214_v7 = vrot.slane %v4287_v6, 9  ;;  %v605_v21 = vrot.slane %v603_v16, 4  ;;  %v606_v43 = vrot.slane %v4299_v12, 5  ;;  %v4510_v12 = vld [vmem:[%s5192_s3 + $0x48] sm:$0xff]  }
  0x33   : > { %v640_v8 = vrot.slane %v639_v2, 4  ;;  %v597_v6 = vsel %vm4491_vm7, %v3213_v19, %v596_v14  ;;  %v600_v27 = vsel %vm4491_vm7, %v598_v20, %v599_v42  ;;  %v610_v33 = vrot.slane %v4306_v22, 5 }
  0x34   : > { %v3281_v28 = vcombine.low %v597_v6, %v600_v27  ;;  %v604_v29 = vsel %vm4491_vm7, %v3214_v7, %v603_v16  ;;  %v607_v31 = vsel %vm4491_vm7, %v605_v21, %v606_v43  ;;  %v617_v34 = vrot.slane %v4367_v54, 5  ;;  %v4558_v43 = vld [vmem:[%s5193_s4] ss:$0 sm:$0xff] }
  0x35   : > { %3578 = vmatpush3.bf16.msra.mxu0 %v3845_v46  ;;  %v645_v10 = vsel %vm4321_vm4, %v640_v8, %v644_v1  ;;  %v4504_v32 = vcombine.low %v604_v29, %v607_v31  ;;  %v3215_v35 = vrot.slane %v4303_v18, 9  ;;  %v612_v37 = vrot.slane %v610_v33, 4 }
  0x36   : > { %3592 = vmatmul.mubr.msk.bf16.vlgmr.msra.gmra.mxu1 %vm723_vm3, %v4415_v44  ;;  %v4452_v11 = vcombine.low %v635_v4, %v645_v10  ;;  %3599 = vmatprep.subr.bf16.mxu0 %v4470_v15  ;;  %v613_v38 = vrot.slane %v4309_v23, 5  ;;  %v3216_v40 = vrot.slane %v4364_v53, 9  ;;  %v619_v45 = vrot.slane %v617_v34, 4  ;;  %v3854_v23 = vld [vmem:[%s5192_s3 + $0x68] sm:$0xff]  }
  0x37   : > { %3595 = vmatprep.mubr.msk.bf16.mxu1 %vm723_vm3, %v4438_v3  ;;  %3612 = vmatpush3.bf16.msra.mxu1 %v3850_v17  ;;  %v620_v46 = vrot.slane %v4380_v0, 5  ;;  %v611_v47 = vsel %vm4491_vm7, %v3215_v35, %v610_v33  ;;  %v3855_v0 = vld [vmem:[%s5192_s3 + $0x60] sm:$0xff]  }
  0x38   : > { %3560 = vmatmul.mubr.msk.bf16.gmra.mxu0 %vm723_vm3, %v4438_v3  ;;  %3613 = vmatprep.subr.bf16.mxu1 %v3851_v24  ;;  %v614_v22 = vsel %vm4491_vm7, %v612_v37, %v613_v38  ;;  %v618_v54 = vsel %vm4491_vm7, %v3216_v40, %v617_v34 }
  0x39   : > { %3579 = vmatprep.mubr.msk.bf16.mxu0 %vm723_vm3, %v4334_v39  ;;  %v4525_v48 = vcombine.low %v611_v47, %v614_v22  ;;  %v621_v18 = vsel %vm4491_vm7, %v619_v45, %v620_v46 }
  0x3a   : > { %v4534_v53 = vcombine.low %v618_v54, %v621_v18 }
  0x3b   : > { %3614 = vmatpush3.bf16.msra.mxu1 %v3851_v24 }
  0x3c   : > { %3635 = vmatprep.subr.bf16.mxu1 %v3854_v23 }
  0x3e   : > { %3596 = vmatmul.mubr.msk.bf16.gmra.mxu1 %vm723_vm3, %v4452_v11 }
  0x3f   : > { %3615 = vmatprep.mubr.msk.bf16.mxu1 %vm723_vm3, %v3281_v28 }
  0x40   : > { %3580 = vmatmul.mubr.msk.bf16.vlgmr.msra.gmra.mxu0 %vm723_vm3, %v4361_v52 }
  0x41   : > { %3583 = vmatprep.mubr.msk.bf16.mxu0 %vm723_vm3, %v4371_v58  ;;  %3600 = vmatpush3.bf16.msra.mxu0 %v4470_v15 }
  0x42   : > { %3601 = vmatprep.subr.bf16.mxu0 %v4483_v5 }
  0x45   : > { %3602 = vmatpush3.bf16.msra.mxu0 %v4483_v5 }
  0x46   : > { %3616 = vmatmul.mubr.msk.bf16.vlgmr.msra.gmra.mxu1 %vm723_vm3, %v4504_v32  ;;  %3623 = vmatprep.subr.bf16.mxu0 %v4510_v12 }
  0x47   : > { %3619 = vmatprep.mubr.msk.bf16.mxu1 %vm723_vm3, %v4525_v48  ;;  %3636 = vmatpush3.bf16.msra.mxu1 %v3854_v23 }
  0x48   : > { %3584 = vmatmul.mubr.msk.bf16.gmra.mxu0 %vm723_vm3, %v4462_v13  ;;  %3637 = vmatprep.subr.bf16.mxu1 %v3855_v0 }
  0x4b   : > { %3638 = vmatpush3.bf16.msra.mxu1 %v3855_v0 }
  0x4c   : > { %3659 = vmatprep.subr.bf16.mxu1 %v4470_v15 }
  0x4e   : > { %3620 = vmatmul.mubr.msk.bf16.gmra.mxu1 %vm723_vm3, %v4534_v53 }
  0x4f   : > { %3639 = vmatprep.mubr.msk.bf16.mxu1 %vm723_vm3, %v4377_v62 }
  0x56   : > { %3640 = vmatmul.mubr.msk.bf16.vlgmr.msra.gmra.mxu1 %vm723_vm3, %v4415_v44 }
  0x57   : > { %3643 = vmatprep.mubr.msk.bf16.mxu1 %vm723_vm3, %v4438_v3  ;;  %3660 = vmatpush3.bf16.msra.mxu1 %v4470_v15 }
  0x58   : > { %3661 = vmatprep.subr.bf16.mxu1 %v4483_v5 }
  0x5b   : > { %3662 = vmatpush3.bf16.msra.mxu1 %v4483_v5 }
  0x5e   : > { %3644 = vmatmul.mubr.msk.bf16.gmra.mxu1 %vm723_vm3, %v4452_v11 }
  0xe6   : > { %v3569_v49 = vpop.f32.mrf.mxu1 }
  0xe8   : > { %v871_v50 = vpop.f32.mrf.mxu1 }
  0xea   : > { %v3570_v51 = vpop.f32.mrf.mxu1 }
  0xec   : > { %v874_v55 = vpop.f32.mrf.mxu1 }
  0xee   : > { %v3573_v56 = vpop.f32.mrf.mxu1 }
  0xf0   : > { %v3557_v57 = vpop.f32.mrf.mxu0  ;;  %v887_v59 = vpop.f32.mrf.mxu1 }
  0xf1   : > { %v880_v20 = vadd.f32 %v3569_v49, %v3557_v57 }
  0xf2   : > { %v770_v60 = vpop.f32.mrf.mxu0  ;;  %v3574_v61 = vpop.f32.mrf.mxu1 }
  0xf3   : > { %v872_v21 = vadd.f32 %v871_v50, %v770_v60 }
  0xf4   : > { %v3558_v63 = vpop.f32.mrf.mxu0  ;;  %v890_v1 = vpop.f32.mrf.mxu1 }
  0xf5   : > { %v883_v27 = vadd.f32 %v3570_v51, %v3558_v63 }
  0xf6   : > { %v773_v2 = vpop.f32.mrf.mxu0  ;;  %v3593_v8 = vpop.f32.mrf.mxu1 }
  0xf7   : > { %v875_v34 = vadd.f32 %v874_v55, %v773_v2 }
  0xf8   : > { %v3561_v4 = vpop.f32.mrf.mxu0  ;;  %v1055_v10 = vpop.f32.mrf.mxu1 }
  0xf9   : > { %v896_v54 = vadd.f32 %v3573_v56, %v3561_v4 }
  0xfa   : > { %v786_v14 = vpop.f32.mrf.mxu0  ;;  %v3594_v17 = vpop.f32.mrf.mxu1 }
  0xfb   : > { %v888_v55 = vadd.f32 %v887_v59, %v786_v14 }
  0xfc   : > { %v3562_v16 = vpop.f32.mrf.mxu0  ;;  %v1058_v7 = vpop.f32.mrf.mxu1 }
  0xfd   : > { %v899_v63 = vadd.f32 %v3574_v61, %v3562_v16 }
  0xfe   : > { %v789_v19 = vpop.f32.mrf.mxu0  ;;  %v3597_v33 = vpop.f32.mrf.mxu1 }
  0xff   : > { %v891_v56 = vadd.f32 %v890_v1, %v789_v19 }
 0x100   : > { %v3581_v42 = vpop.f32.mrf.mxu0  ;;  %v1071_v18 = vpop.f32.mrf.mxu1 }
 0x101   : > { %v992_v24 = vadd.f32 %v3581_v42, %v880_v20 }
 0x102   : > { %v959_v6 = vpop.f32.mrf.mxu0 }
 0x103   : > { %v1088_v28 = vadd.f32 %v3593_v8, %v992_v24  ;;  %v990_v29 = vadd.f32 %v959_v6, %v872_v21 }
 0x104   : > { %v3582_v31 = vpop.f32.mrf.mxu0 }
 0x105   : > { %v4561_v35 = vadd.f32 %v4558_v43, %v1088_v28  ;;  %v1086_v37 = vadd.f32 %v1055_v10, %v990_v29  ;;  %v993_v38 = vadd.f32 %v3582_v31, %v883_v27 }
 0x106   : > { %v962_v40 = vpop.f32.mrf.mxu0 }
 0x107   : > { %v1111_v45 = vsub.f32 0.0, %v4561_v35  ;;  %v4565_v46 = vadd.f32 %v4558_v43, %v1086_v37  ;;  %v1089_v47 = vadd.f32 %v3594_v17, %v993_v38  ;;  %v991_v22 = vadd.f32 %v962_v40, %v875_v34  ;;  %v3598_v17 = vpop.f32.mrf.mxu1 }
 0x108   : > { %v3585_v23 = vpop.f32.mrf.mxu0 }
 0x109   : > { %v1121_v0 = vmul.f32 1.442695, %v1111_v45  ;;  %v1109_v49 = vsub.f32 0.0, %v4565_v46  ;;  %v4569_v50 = vadd.f32 %v4558_v43, %v1089_v47  ;;  %v1087_v51 = vadd.f32 %v1058_v7, %v991_v22  ;;  %v1074_v28 = vpop.f32.mrf.mxu1 }
 0x10a   : > { %v996_v57 = vadd.f32 %v3585_v23, %v896_v54  ;;  %v975_v60 = vpop.f32.mrf.mxu0 }
 0x10b   : > { %v1117_v2 = vmul.f32 1.442695, %v1109_v49  ;;  %v1112_v8 = vsub.f32 0.0, %v4569_v50  ;;  %v4573_v10 = vadd.f32 %v4558_v43, %v1087_v51  ;;  %3874 = vpow2.f32 %v1121_v0 }
 0x10c   : > { %v1092_v4 = vadd.f32 %v3597_v33, %v996_v57  ;;  %v994_v20 = vadd.f32 %v975_v60, %v888_v55  ;;  %v3586_v42 = vpop.f32.mrf.mxu0 }
 0x10d   : > { %3876 = vpow2.f32 %v1117_v2  ;;  %v1123_v21 = vmul.f32 1.442695, %v1112_v8  ;;  %v1110_v7 = vsub.f32 0.0, %v4573_v10  ;;  %v997_v59 = vadd.f32 %v3586_v42, %v899_v63 }
 0x10e   : > { %v4577_v14 = vadd.f32 %v4558_v43, %v1092_v4  ;;  %v1090_v61 = vadd.f32 %v1071_v18, %v994_v20  ;;  %v978_v16 = vpop.f32.mrf.mxu0 }
 0x10f   : > { %3878 = vpow2.f32 %v1123_v21  ;;  %v1119_v24 = vmul.f32 1.442695, %v1110_v7  ;;  %v1093_v6 = vadd.f32 %v3598_v17, %v997_v59  ;;  %v995_v27 = vadd.f32 %v978_v16, %v891_v56 }
 0x110   : > { %v1115_v1 = vsub.f32 0.0, %v4577_v14  ;;  %v1105_v19 = vadd.f32 %v4558_v43, %v1090_v61 }
 0x111   : > { %3880 = vpow2.f32 %v1119_v24  ;;  %v1108_v29 = vadd.f32 %v4558_v43, %v1093_v6  ;;  %v1091_v31 = vadd.f32 %v1074_v28, %v995_v27  ;;  %v3853_v28 = vld [vmem:[%s5192_s3 + $0x40] sm:$0xff]  }
 0x112   : > { %v1129_v33 = vmul.f32 1.442695, %v1115_v1  ;;  %v1113_v34 = vsub.f32 0.0, %v1105_v19 }
 0x113   : > { %v1116_v37 = vsub.f32 0.0, %v1108_v29  ;;  %v1106_v38 = vadd.f32 %v4558_v43, %v1091_v31 }
 0x114   : > { %3882 = vpow2.f32 %v1129_v33  ;;  %v1125_v40 = vmul.f32 1.442695, %v1113_v34 }
 0x115   : > { %v1131_v45 = vmul.f32 1.442695, %v1116_v37  ;;  %v1114_v47 = vsub.f32 0.0, %v1106_v38 }
 0x116   : > { %3884 = vpow2.f32 %v1125_v40 }
 0x117   : > { %3886 = vpow2.f32 %v1131_v45  ;;  %v1127_v22 = vmul.f32 1.442695, %v1114_v47 }
 0x118   : > { %v3875_v54 = vpop.eup %3874 }
 0x119   : > { %3888 = vpow2.f32 %v1127_v22  ;;  %v1135_v49 = vadd.f32 1.0, %v3875_v54 }
 0x11a   : > { %v3877_v18 = vpop.eup %3876 }
 0x11b   : > { %v1133_v23 = vadd.f32 1.0, %v3877_v18  ;;  %v3862_v18 = vld [vmem:[%s5192_s3 + $0xa8] sm:$0xff]  }
 0x11c   : > { %v3879_v0 = vpop.eup %3878 }
 0x11d   : > { %v1136_v51 = vadd.f32 1.0, %v3879_v0  ;;  %3890 = vrcp.f32 %v1133_v23  ;;  %v3863_v23 = vld [vmem:[%s5192_s3 + $0xa0] sm:$0xff]  }
 0x11e   : > { %v3881_v55 = vpop.eup %3880  ;;  %v459_v0 = vld [vmem:[%s431_s9] sm:$0xf] }
 0x11f   : > { %3892 = vrcp.f32 %v1136_v51  ;;  %v1134_v57 = vadd.f32 1.0, %v3881_v55  ;;  %v463_v51 = vstv %s462_s11 }
 0x120   : > { %3894 = vrcp.f32 %v1135_v49  ;;  %v460_v49 = vld [vmem:[%s431_s9 + $0x4] sm:$0xf]  ;;  %vm464_vm8 = vcmp.eq.s32.totalorder %v463_v51, 1 }
 0x121   : > { %v3883_v60 = vpop.eup %3882  ;;  %3896 = vrcp.f32 %v1134_v57  ;;  %v4669_v55 = vsel %vm464_vm8, 0, %v459_v0  ;;  %v4671_v57 = vsel %vm464_vm8, 0, %v460_v49 }
 0x122   : > { %v1139_v8 = vadd.f32 1.0, %v3883_v60  ;;  %v3346_v60 = vcombine.low %v4669_v55, %v4671_v57 }
 0x123   : > { %v3885_v63 = vpop.eup %3884 }
 0x124   : > { %v3887_v2 = vpop.eup %3886  ;;  %v1137_v56 = vadd.f32 1.0, %v3885_v63  ;;  %v3617_v63 = vpop.f32.mrf.mxu1 }
 0x125   : > { %v1140_v4 = vadd.f32 1.0, %v3887_v2  ;;  %v461_v2 = vld [vmem:[%s431_s9 + $0x8] sm:$0x1] }
 0x126   : > { %v3889_v17 = vpop.eup %3888  ;;  %3898 = vrcp.f32 %v1137_v56  ;;  %v4676_v56 = vsel %vm464_vm8, 0, %v461_v2 }
 0x127   : > { %3900 = vrcp.f32 %v1140_v4  ;;  %v1138_v20 = vadd.f32 1.0, %v3889_v17 }
 0x128   : > { %3902 = vrcp.f32 %v1139_v8  ;;  %v1389_v8 = vpop.f32.mrf.mxu1 }
 0x129   : > { %3904 = vrcp.f32 %v1138_v20 }
 0x12a   : > { %v3891_v42 = vpop.eup %3890  ;;  %v3618_v4 = vpop.f32.mrf.mxu1 }
 0x12b   : > { %v1149_v16 = vmul.f32 %v3891_v42, %v4565_v46 }
 0x12c   : > { %v3893_v21 = vpop.eup %3892  ;;  %v1392_v17 = vpop.f32.mrf.mxu1 }
 0x12d   : > { %v3895_v7 = vpop.eup %3894  ;;  %v1152_v61 = vmul.f32 %v3893_v21, %v4569_v50 }
 0x12e   : > { %v3897_v59 = vpop.eup %3896  ;;  %v1151_v6 = vmul.f32 %v3895_v7, %v4561_v35  ;;  %v3856_v35 = vld [vmem:[%s5192_s3 + $0x78] sm:$0xff]   ;;  %v3621_v20 = vpop.f32.mrf.mxu1 }
 0x12f   : > { %v1150_v24 = vmul.f32 %v3897_v59, %v4573_v10 }
 0x130   : > { %v1158_v1 = vpack.c.bf16 %v1152_v61, %v1151_v6  ;;  %v1405_v7 = vpop.f32.mrf.mxu1 }
 0x131   : > { %v1157_v27 = vpack.c.bf16 %v1150_v24, %v1149_v16 }
 0x132   : > { %v3622_v16 = vpop.f32.mrf.mxu1 }
 0x133   : > { %v3899_v31 = vpop.eup %3898  ;;  %3603 = vmatprep.mubr.msk.bf16.mxu0 %vm723_vm3, %v1157_v27 }
 0x134   : > { %v3901_v33 = vpop.eup %3900  ;;  %3604 = vmatmul.mubr.msk.bf16.vlgmr.msra.gmra.mxu0 %vm723_vm3, %v1158_v1  ;;  %v1153_v10 = vmul.f32 %v3899_v31, %v1105_v19  ;;  %v1408_v27 = vpop.f32.mrf.mxu1 }
 0x135   : > { %v3903_v34 = vpop.eup %3902  ;;  %3624 = vmatpush3.bf16.msra.mxu0 %v4510_v12  ;;  %v1156_v50 = vmul.f32 %v3901_v33, %v1108_v29  ;;  %v3857_v12 = vld [vmem:[%s5192_s3 + $0x70] sm:$0xff]   ;;  %v654_v29 = vrot.slane %v4402_v26, 5  ;;  %v4642_v26 = vld [vmem:[%s5192_s3 + $0x88] sm:$0xff]  }
 0x136   : > { %v3905_v46 = vpop.eup %3904  ;;  %3625 = vmatprep.subr.bf16.mxu0 %v3853_v28  ;;  %v1155_v40 = vmul.f32 %v3903_v34, %v4577_v14  ;;  %v3217_v14 = vrot.slane %v4386_v9, 9  ;;  %v3858_v9 = vld [vmem:[%s5192_s3 + $0x98] sm:$0xff]   ;;  %3683 = vmatprep.subr.bf16.mxu1 %v4642_v26  ;;  %v3641_v31 = vpop.f32.mrf.mxu1 }
 0x137   : > { %v1154_v37 = vmul.f32 %v3905_v46, %v1106_v38 }
 0x138   : > { %v1160_v47 = vpack.c.bf16 %v1156_v50, %v1155_v40  ;;  %v1548_v46 = vpop.f32.mrf.mxu1 }
 0x139   : > { %v1159_v45 = vpack.c.bf16 %v1154_v37, %v1153_v10  ;;  %3626 = vmatpush3.bf16.msra.mxu0 %v3853_v28 }
 0x13a   : > { %3647 = vmatprep.subr.bf16.mxu0 %v3856_v35  ;;  %v3642_v10 = vpop.f32.mrf.mxu1 }
 0x13b   : > { %3607 = vmatprep.mubr.msk.bf16.mxu0 %vm723_vm3, %v1159_v45 }
 0x13c   : > { %3608 = vmatmul.mubr.msk.bf16.gmra.mxu0 %vm723_vm3, %v1160_v47  ;;  %v1551_v47 = vpop.f32.mrf.mxu1 }
 0x13d   : > { %3627 = vmatprep.mubr.msk.bf16.mxu0 %vm723_vm3, %v4411_v36  ;;  %v651_v36 = vrot.slane %v4399_v25, 5  ;;  %v3859_v25 = vld [vmem:[%s5192_s3 + $0x90] sm:$0xff]  }
 0x13f   : > { %v653_v19 = vrot.slane %v651_v36, 4  ;;  %v652_v38 = vsel %vm4491_vm7, %v3217_v14, %v651_v36 }
 0x141   : > { %v655_v22 = vsel %vm4491_vm7, %v653_v19, %v654_v29  ;;  %v3645_v29 = vpop.f32.mrf.mxu1 }
 0x142   : > { %v4623_v54 = vcombine.low %v652_v38, %v655_v22 }
 0x143   : > { %v1564_v0 = vpop.f32.mrf.mxu1 }
 0x144   : > { %3628 = vmatmul.mubr.msk.bf16.vlgmr.msra.gmra.mxu0 %vm723_vm3, %v4377_v62 }
 0x145   : > { %3648 = vmatpush3.bf16.msra.mxu0 %v3856_v35  ;;  %3631 = vmatprep.mubr.msk.bf16.mxu0 %vm723_vm3, %v4415_v44 }
 0x146   : > { %3649 = vmatprep.subr.bf16.mxu0 %v3857_v12 }
 0x149   : > { %3650 = vmatpush3.bf16.msra.mxu0 %v3857_v12 }
 0x14a   : > { %3671 = vmatprep.subr.bf16.mxu0 %v3858_v9 }
 0x14c   : > { %3632 = vmatmul.mubr.msk.bf16.gmra.mxu0 %vm723_vm3, %v4438_v3 }
 0x14d   : > { %3651 = vmatprep.mubr.msk.bf16.mxu0 %vm723_vm3, %v4504_v32 }
 0x154   : > { %3652 = vmatmul.mubr.msk.bf16.vlgmr.msra.gmra.mxu0 %vm723_vm3, %v4525_v48 }
 0x155   : > { %3655 = vmatprep.mubr.msk.bf16.mxu0 %vm723_vm3, %v4534_v53  ;;  %3672 = vmatpush3.bf16.msra.mxu0 %v3858_v9 }
 0x156   : > { %3673 = vmatprep.subr.bf16.mxu0 %v3859_v25 }
 0x159   : > { %3674 = vmatpush3.bf16.msra.mxu0 %v3859_v25 }
 0x15a   : > { %3695 = vmatprep.subr.bf16.mxu0 %v3862_v18 }
 0x15c   : > { %3656 = vmatmul.mubr.msk.bf16.gmra.mxu0 %vm723_vm3, %v4623_v54 }
 0x15d   : > { %3675 = vmatprep.mubr.msk.bf16.mxu0 %vm723_vm3, %v4377_v62 }
 0x164   : > { %3676 = vmatmul.mubr.msk.bf16.vlgmr.msra.gmra.mxu0 %vm723_vm3, %v4415_v44 }
 0x165   : > { %3679 = vmatprep.mubr.msk.bf16.mxu0 %vm723_vm3, %v4438_v3  ;;  %3696 = vmatpush3.bf16.msra.mxu0 %v3862_v18 }
 0x166   : > { %3697 = vmatprep.subr.bf16.mxu0 %v3863_v23 }
 0x169   : > { %3698 = vmatpush3.bf16.msra.mxu0 %v3863_v23 }
 0x16a   : > { %3719 = vmatprep.subr.bf16.mxu0 %v4470_v15 }
 0x16c   : > { %3680 = vmatmul.mubr.msk.bf16.gmra.mxu0 %vm723_vm3, %v4452_v11 }
 0x16d   : > { %3699 = vmatprep.mubr.msk.bf16.mxu0 %vm723_vm3, %v4361_v52 }
 0x174   : > { %3700 = vmatmul.mubr.msk.bf16.vlgmr.msra.gmra.mxu0 %vm723_vm3, %v4371_v58 }
 0x175   : > { %3703 = vmatprep.mubr.msk.bf16.mxu0 %vm723_vm3, %v4462_v13  ;;  %3720 = vmatpush3.bf16.msra.mxu0 %v4470_v15 }
 0x176   : > { %3721 = vmatprep.subr.bf16.mxu0 %v4483_v5 }
 0x179   : > { %3722 = vmatpush3.bf16.msra.mxu0 %v4483_v5 }
 0x17a   : > { %3743 = vmatprep.subr.bf16.mxu0 %v4779_v30 }
 0x17c   : > { %3704 = vmatmul.mubr.msk.bf16.gmra.mxu0 %vm723_vm3, %v3346_v60 }
 0x1f4   : > { %v4678_v42 = vpop.f32.mrf.mxu0 }
 0x1f6   : > { %v4680_v21 = vpop.f32.mrf.mxu0 }
 0x1f8   : > { %v4682_v59 = vpop.f32.mrf.mxu0 }
 0x1fa   : > { %v4684_v61 = vpop.f32.mrf.mxu0 }
 0x1fc   : > { %v4686_v24 = vpop.f32.mrf.mxu0 }
 0x1fe   : > { %v4688_v6 = vpop.f32.mrf.mxu0 }
 0x200   : > { %v4690_v1 = vpop.f32.mrf.mxu0 }
 0x202   : > { %v4692_v28 = vpop.f32.mrf.mxu0 }
 0x203   : > { %5203 = vst [vmem:[#allocation2_spill] sm:$0xff] %v4692_v28 }
 0x204   : > { %v3629_v33 = vpop.f32.mrf.mxu0 }
 0x205   : > { %v1475_v45 = vadd.f32 %v3629_v33, %v3617_v63 }
 0x206   : > { %v1466_v34 = vpop.f32.mrf.mxu0 }
 0x207   : > { %v1467_v36 = vadd.f32 %v1466_v34, %v1389_v8  ;;  %v1581_v19 = vadd.f32 %v3641_v31, %v1475_v45 }
 0x208   : > { %v3630_v50 = vpop.f32.mrf.mxu0 }
 0x209   : > { %v1478_v38 = vadd.f32 %v3630_v50, %v3618_v4  ;;  %v1579_v9 = vadd.f32 %v1548_v46, %v1467_v36  ;;  %v3646_v46 = vpop.f32.mrf.mxu1 }
 0x20a   : > { %v1469_v35 = vpop.f32.mrf.mxu0 }
 0x20b   : > { %v1470_v25 = vadd.f32 %v1469_v35, %v1392_v17  ;;  %v1582_v60 = vadd.f32 %v3642_v10, %v1478_v38 }
 0x20c   : > { %v3633_v37 = vpop.f32.mrf.mxu0 }
 0x20d   : > { %v1491_v2 = vadd.f32 %v3633_v37, %v3621_v20  ;;  %v1580_v33 = vadd.f32 %v1551_v47, %v1470_v25 }
 0x20e   : > { %v1482_v40 = vpop.f32.mrf.mxu0 }
 0x20f   : > { %v1483_v28 = vadd.f32 %v1482_v40, %v1405_v7  ;;  %v1585_v36 = vadd.f32 %v3645_v29, %v1491_v2 }
 0x210   : > { %v3634_v12 = vpop.f32.mrf.mxu0 }
 0x211   : > { %v1494_v17 = vadd.f32 %v3634_v12, %v3622_v16  ;;  %v1583_v37 = vadd.f32 %v1564_v0, %v1483_v28 }
 0x212   : > { %v1485_v14 = vpop.f32.mrf.mxu0 }
 0x213   : > { %v1486_v47 = vadd.f32 %v1485_v14, %v1408_v27  ;;  %v1586_v38 = vadd.f32 %v3646_v46, %v1494_v17 }
 0x214   : > { %v3653_v22 = vpop.f32.mrf.mxu0 }
 0x215   : > { %v1677_v18 = vadd.f32 %v3653_v22, %v1581_v19  ;;  %v1567_v22 = vpop.f32.mrf.mxu1 }
 0x216   : > { %v1644_v23 = vpop.f32.mrf.mxu0  ;;  %v1584_v14 = vadd.f32 %v1567_v22, %v1486_v47 }
 0x217   : > { %v4695_v49 = vadd.f32 %v4558_v43, %v1677_v18  ;;  %v1675_v51 = vadd.f32 %v1644_v23, %v1579_v9 }
 0x218   : > { %v3654_v63 = vpop.f32.mrf.mxu0 }
 0x219   : > { %v1693_v8 = vsub.f32 0.0, %v4695_v49  ;;  %v4699_v31 = vadd.f32 %v4558_v43, %v1675_v51  ;;  %v1678_v4 = vadd.f32 %v3654_v63, %v1582_v60 }
 0x21a   : > { %v1647_v34 = vpop.f32.mrf.mxu0 }
 0x21b   : > { %v1703_v50 = vmul.f32 1.442695, %v1693_v8  ;;  %v1691_v35 = vsub.f32 0.0, %v4699_v31  ;;  %v1676_v45 = vadd.f32 %v1647_v34, %v1580_v33  ;;  %v4703_v10 = vadd.f32 %v4558_v43, %v1678_v4 }
 0x21c   : > { %v3657_v20 = vpop.f32.mrf.mxu0 }
 0x21d   : > { %3906 = vpow2.f32 %v1703_v50  ;;  %v1699_v7 = vmul.f32 1.442695, %v1691_v35  ;;  %v4706_v40 = vadd.f32 %v4558_v43, %v1676_v45  ;;  %v1694_v19 = vsub.f32 0.0, %v4703_v10 }
 0x21e   : > { %v1681_v16 = vadd.f32 %v3657_v20, %v1585_v36  ;;  %v1660_v12 = vpop.f32.mrf.mxu0 }
 0x21f   : > { %3908 = vpow2.f32 %v1699_v7  ;;  %v1692_v29 = vsub.f32 0.0, %v4706_v40  ;;  %v1679_v9 = vadd.f32 %v1660_v12, %v1583_v37  ;;  %v1705_v25 = vmul.f32 1.442695, %v1694_v19 }
 0x220   : > { %v4711_v18 = vadd.f32 %v4558_v43, %v1681_v16  ;;  %v3658_v28 = vpop.f32.mrf.mxu0 }
 0x221   : > { %v1701_v23 = vmul.f32 1.442695, %v1692_v29  ;;  %v4714_v0 = vadd.f32 %v4558_v43, %v1679_v9  ;;  %v1682_v27 = vadd.f32 %v3658_v28, %v1586_v38  ;;  %3910 = vpow2.f32 %v1705_v25 }
 0x222   : > { %v1697_v51 = vsub.f32 0.0, %v4711_v18  ;;  %v1663_v60 = vpop.f32.mrf.mxu0 }
 0x223   : > { %3912 = vpow2.f32 %v1701_v23  ;;  %v1695_v2 = vsub.f32 0.0, %v4714_v0  ;;  %v1690_v63 = vadd.f32 %v4558_v43, %v1682_v27  ;;  %v1680_v8 = vadd.f32 %v1663_v60, %v1584_v14 }
 0x224   : > { %v1711_v33 = vmul.f32 1.442695, %v1697_v51 }
 0x225   : > { %v1707_v4 = vmul.f32 1.442695, %v1695_v2  ;;  %v1698_v34 = vsub.f32 0.0, %v1690_v63  ;;  %v1688_v17 = vadd.f32 %v4558_v43, %v1680_v8 }
 0x226   : > { %3914 = vpow2.f32 %v1711_v33 }
 0x227   : > { %3916 = vpow2.f32 %v1707_v4  ;;  %v1713_v46 = vmul.f32 1.442695, %v1698_v34  ;;  %v1696_v50 = vsub.f32 0.0, %v1688_v17 }
 0x229   : > { %3918 = vpow2.f32 %v1713_v46  ;;  %v1709_v45 = vmul.f32 1.442695, %v1696_v50  ;;  %v3861_v50 = vld [vmem:[%s5192_s3 + $0x80] sm:$0xff]  }
 0x22a   : > { %v3907_v35 = vpop.eup %3906 }
 0x22b   : > { %v1717_v20 = vadd.f32 1.0, %v3907_v35  ;;  %3920 = vpow2.f32 %v1709_v45 }
 0x22c   : > { %v3909_v36 = vpop.eup %3908 }
 0x22d   : > { %v1715_v37 = vadd.f32 1.0, %v3909_v36  ;;  %3922 = vrcp.f32 %v1717_v20 }
 0x22e   : > { %v3911_v7 = vpop.eup %3910 }
 0x22f   : > { %v1718_v19 = vadd.f32 1.0, %v3911_v7  ;;  %3924 = vrcp.f32 %v1715_v37 }
 0x230   : > { %v3913_v47 = vpop.eup %3912 }
 0x231   : > { %v1716_v16 = vadd.f32 1.0, %v3913_v47  ;;  %3926 = vrcp.f32 %v1718_v19 }
 0x233   : > { %v3915_v12 = vpop.eup %3914  ;;  %3928 = vrcp.f32 %v1716_v16 }
 0x234   : > { %v3917_v38 = vpop.eup %3916  ;;  %v1721_v9 = vadd.f32 1.0, %v3915_v12 }
 0x235   : > { %v1719_v29 = vadd.f32 1.0, %v3917_v38  ;;  %v676_v38 = vshll.u32 %v4676_v56, 16 }
 0x236   : > { %v3919_v22 = vpop.eup %3918 }
 0x237   : > { %v1722_v25 = vadd.f32 1.0, %v3919_v22 }
 0x238   : > { %v3921_v28 = vpop.eup %3920 }
 0x239   : > { %3930 = vrcp.f32 %v1722_v25  ;;  %v1720_v23 = vadd.f32 1.0, %v3921_v28 }
 0x23a   : > { %3932 = vrcp.f32 %v1719_v29  ;;  %v3923_v27 = vpop.eup %3922 }
 0x23b   : > { %3934 = vrcp.f32 %v1721_v9  ;;  %v1733_v4 = vmul.f32 %v3923_v27, %v4695_v49  ;;  %v3864_v49 = vld [vmem:[%s5192_s3 + $0xb8] sm:$0xff]   ;;  %v678_v9 = vrot.slane %v676_v38, 5  ;;  %v3867_v27 = vld [vmem:[%s5192_s3 + $0xd0] sm:$0xff]  }
 0x23c   : > { %3936 = vrcp.f32 %v1720_v23  ;;  %v3925_v14 = vpop.eup %3924  ;;  %v3866_v23 = vld [vmem:[%s5192_s3 + $0xd8] sm:$0xff]  }
 0x23d   : > { %v1731_v33 = vmul.f32 %v3925_v14, %v4699_v31  ;;  %v3871_v14 = vld [vmem:[%s5192_s3 + $0xe0] sm:$0xff]  }
 0x23e   : > { %v3927_v51 = vpop.eup %3926 }
 0x23f   : > { %v1734_v2 = vmul.f32 %v3927_v51, %v4703_v10  ;;  %v4801_v51 = vpop.f32.mrf.mxu0 }
 0x240   : > { %v3929_v60 = vpop.eup %3928 }
 0x241   : > { %v1732_v8 = vmul.f32 %v3929_v60, %v4706_v40  ;;  %v1740_v46 = vpack.c.bf16 %v1734_v2, %v1733_v4  ;;  %v4803_v60 = vpop.f32.mrf.mxu0 }
 0x243   : > { %v1739_v34 = vpack.c.bf16 %v1732_v8, %v1731_v33  ;;  %v4805_v2 = vpop.f32.mrf.mxu0 }
 0x245   : > { %3663 = vmatprep.mubr.msk.bf16.mxu1 %vm723_vm3, %v1739_v34  ;;  %v4807_v33 = vpop.f32.mrf.mxu0 }
 0x246   : > { %v3931_v35 = vpop.eup %3930  ;;  %3664 = vmatmul.mubr.msk.bf16.vlgmr.msra.gmra.mxu1 %vm723_vm3, %v1740_v46 }
 0x247   : > { %v3933_v45 = vpop.eup %3932  ;;  %3684 = vmatpush3.bf16.msra.mxu1 %v4642_v26  ;;  %v1738_v40 = vmul.f32 %v3931_v35, %v1690_v63  ;;  %v3865_v26 = vld [vmem:[%s5192_s3 + $0xb0] sm:$0xff]   ;;  %v670_v63 = vshrl.u32 %v4671_v57, 16  ;;  %v4809_v8 = vpop.f32.mrf.mxu0 }
 0x248   : > { %v3935_v10 = vpop.eup %3934  ;;  %3685 = vmatprep.subr.bf16.mxu1 %v3861_v50  ;;  %v1735_v36 = vmul.f32 %v3933_v45, %v4714_v0  ;;  %v660_v0 = vshll.u32 %v4669_v55, 16 }
 0x249   : > { %v3937_v31 = vpop.eup %3936  ;;  %v1737_v37 = vmul.f32 %v3935_v10, %v4711_v18  ;;  %v657_v18 = vshrl.u32 %v4669_v55, 16  ;;  %v672_v12 = vrot.slane %v670_v63, 4  ;;  %v4823_v35 = vpop.f32.mrf.mxu0 }
 0x24a   : > { %v1736_v20 = vmul.f32 %v3937_v31, %v1688_v17  ;;  %v666_v17 = vshll.u32 %v4671_v57, 16  ;;  %v662_v19 = vrot.slane %v660_v0, 5 }
 0x24b   : > { %3686 = vmatpush3.bf16.msra.mxu1 %v3861_v50  ;;  %v1742_v47 = vpack.c.bf16 %v1738_v40, %v1737_v37 }
 0x24c   : > { %v1741_v7 = vpack.c.bf16 %v1736_v20, %v1735_v36  ;;  %3707 = vmatprep.subr.bf16.mxu1 %v3864_v49  ;;  %v668_v16 = vrot.slane %v666_v17, 5 }
 0x24e   : > { %3667 = vmatprep.mubr.msk.bf16.mxu1 %vm723_vm3, %v1741_v7  ;;  %v4833_v7 = vpop.f32.mrf.mxu0 }
 0x24f   : > { %3668 = vmatmul.mubr.msk.bf16.gmra.mxu1 %vm723_vm3, %v1742_v47 }
 0x250   : > { %3687 = vmatprep.mubr.msk.bf16.mxu1 %vm723_vm3, %v4334_v39  ;;  %v659_v39 = vrot.slane %v657_v18, 4 }
 0x257   : > { %3688 = vmatmul.mubr.msk.bf16.vlgmr.msra.gmra.mxu1 %vm723_vm3, %v4361_v52  ;;  %v663_v52 = vor.u32 %v662_v19, %v659_v39  ;;  %v4839_v39 = vpop.f32.mrf.mxu0 }
 0x258   : > { %3708 = vmatpush3.bf16.msra.mxu1 %v3864_v49  ;;  %3691 = vmatprep.mubr.msk.bf16.mxu1 %vm723_vm3, %v4371_v58  ;;  %v673_v58 = vor.u32 %v672_v12, %v668_v16 }
 0x259   : > { %3709 = vmatprep.subr.bf16.mxu1 %v3865_v26  ;;  %v664_v22 = vrot.slane %v663_v52, 4 }
 0x25a   : > { %v674_v29 = vrot.slane %v673_v58, 4 }
 0x25b   : > { %v669_v25 = vsel %vm4321_vm4, %v664_v22, %v668_v16 }
 0x25c   : > { %3710 = vmatpush3.bf16.msra.mxu1 %v3865_v26 }
 0x25d   : > { %3731 = vmatprep.subr.bf16.mxu1 %v3866_v23 }
 0x25f   : > { %3692 = vmatmul.mubr.msk.bf16.gmra.mxu1 %vm723_vm3, %v4462_v13  ;;  %v679_v13 = vsel %vm4321_vm4, %v674_v29, %v678_v9  ;;  %v3701_v29 = vpop.f32.mrf.mxu0 }
 0x260   : > { %3711 = vmatprep.mubr.msk.bf16.mxu1 %vm723_vm3, %v4415_v44  ;;  %v3357_v28 = vcombine.low %v669_v25, %v679_v13 }
 0x267   : > { %3712 = vmatmul.mubr.msk.bf16.vlgmr.msra.gmra.mxu1 %vm723_vm3, %v4438_v3 }
 0x268   : > { %3715 = vmatprep.mubr.msk.bf16.mxu1 %vm723_vm3, %v4452_v11  ;;  %3732 = vmatpush3.bf16.msra.mxu1 %v3866_v23 }
 0x269   : > { %3733 = vmatprep.subr.bf16.mxu1 %v3867_v27 }
 0x26c   : > { %3734 = vmatpush3.bf16.msra.mxu1 %v3867_v27 }
 0x26f   : > { %3716 = vmatmul.mubr.msk.bf16.gmra.mxu1 %vm723_vm3, %v3357_v28 }
 0x270   : > { %3735 = vmatprep.mubr.msk.bf16.mxu1 %vm723_vm3, %v4504_v32  ;;  %v3870_v32 = vld [vmem:[%s5192_s3 + $0xe8] sm:$0xff]  }
 0x271   : > { %3755 = vmatprep.subr.bf16.mxu1 %v3870_v32 }
 0x277   : > { %3736 = vmatmul.mubr.msk.bf16.vlgmr.msra.gmra.mxu1 %vm723_vm3, %v4525_v48 }
 0x278   : > { %3739 = vmatprep.mubr.msk.bf16.mxu1 %vm723_vm3, %v4534_v53  ;;  %3756 = vmatpush3.bf16.msra.mxu1 %v3870_v32 }
 0x279   : > { %3757 = vmatprep.subr.bf16.mxu1 %v3871_v14 }
 0x27c   : > { %3758 = vmatpush3.bf16.msra.mxu1 %v3871_v14  ;;  %v2089_v14 = vpop.f32.mrf.mxu0 }
 0x27d   : > { %3779 = vmatprep.subr.bf16.mxu1 %v4470_v15 }
 0x27f   : > { %3740 = vmatmul.mubr.msk.bf16.gmra.mxu1 %vm723_vm3, %v4623_v54 }
 0x280   : > { %3759 = vmatprep.mubr.msk.bf16.mxu1 %vm723_vm3, %v4415_v44 }
 0x287   : > { %3760 = vmatmul.mubr.msk.bf16.vlgmr.msra.gmra.mxu1 %vm723_vm3, %v4438_v3 }
 0x288   : > { %3763 = vmatprep.mubr.msk.bf16.mxu1 %vm723_vm3, %v4452_v11  ;;  %3780 = vmatpush3.bf16.msra.mxu1 %v4470_v15  ;;  %v4814_v15 = vld [vmem:[%s5195_s6] ss:$0 sm:$0xff] }
 0x289   : > { %3781 = vmatprep.subr.bf16.mxu1 %v4483_v5 }
 0x28c   : > { %3782 = vmatpush3.bf16.msra.mxu1 %v4483_v5 }
 0x28f   : > { %3764 = vmatmul.mubr.msk.bf16.gmra.mxu1 %vm723_vm3, %v3357_v28 }
 0x306   : > { %v3665_v4 = vpop.f32.mrf.mxu1 }
 0x307   : > { %v4817_v5 = vadd.f32 %v3665_v4, %v4814_v15 }
 0x308   : > { %v1789_v34 = vpop.f32.mrf.mxu1 }
 0x309   : > { %v1822_v46 = vsub.f32 0.0, %v4817_v5  ;;  %v4821_v50 = vadd.f32 %v4814_v15, %v1789_v34 }
 0x30a   : > { %v3666_v45 = vpop.f32.mrf.mxu1 }
 0x30b   : > { %v1832_v10 = vmul.f32 1.442695, %v1822_v46  ;;  %v1820_v49 = vsub.f32 0.0, %v4821_v50  ;;  %v4827_v31 = vadd.f32 %v3666_v45, %v4814_v15 }
 0x30c   : > { %v1792_v40 = vpop.f32.mrf.mxu1 }
 0x30d   : > { %3938 = vpow2.f32 %v1832_v10  ;;  %v1828_v36 = vmul.f32 1.442695, %v1820_v49  ;;  %v1823_v20 = vsub.f32 0.0, %v4827_v31  ;;  %v4831_v37 = vadd.f32 %v4814_v15, %v1792_v40 }
 0x30f   : > { %3940 = vpow2.f32 %v1828_v36  ;;  %v1834_v47 = vmul.f32 1.442695, %v1823_v20  ;;  %v1821_v26 = vsub.f32 0.0, %v4831_v37  ;;  %v3669_v18 = vpop.f32.mrf.mxu1  ;;  %v3702_v36 = vpop.f32.mrf.mxu0 }
 0x310   : > { %v4837_v0 = vadd.f32 %v3669_v18, %v4814_v15 }
 0x311   : > { %3942 = vpow2.f32 %v1834_v47  ;;  %v1830_v63 = vmul.f32 1.442695, %v1821_v26  ;;  %v1805_v17 = vpop.f32.mrf.mxu1 }
 0x312   : > { %v1826_v19 = vsub.f32 0.0, %v4837_v0  ;;  %v4843_v16 = vadd.f32 %v4814_v15, %v1805_v17  ;;  %v2092_v17 = vpop.f32.mrf.mxu0 }
 0x313   : > { %3944 = vpow2.f32 %v1830_v63  ;;  %v3670_v12 = vpop.f32.mrf.mxu1 }
 0x314   : > { %v1840_v52 = vmul.f32 1.442695, %v1826_v19  ;;  %v1824_v58 = vsub.f32 0.0, %v4843_v16  ;;  %v4847_v38 = vadd.f32 %v3670_v12, %v4814_v15 }
 0x315   : > { %v1808_v22 = vpop.f32.mrf.mxu1 }
 0x316   : > { %3946 = vpow2.f32 %v1840_v52  ;;  %v1836_v9 = vmul.f32 1.442695, %v1824_v58  ;;  %v1827_v25 = vsub.f32 0.0, %v4847_v38  ;;  %v4851_v13 = vadd.f32 %v4814_v15, %v1808_v22 }
 0x317   : > { %v3689_v28 = vpop.f32.mrf.mxu1 }
 0x318   : > { %3948 = vpow2.f32 %v1836_v9  ;;  %v1842_v23 = vmul.f32 1.442695, %v1827_v25  ;;  %v1825_v27 = vsub.f32 0.0, %v4851_v13  ;;  %v2010_v12 = vadd.f32 %v3689_v28, %v4801_v51 }
 0x319   : > { %v2001_v32 = vpop.f32.mrf.mxu1 }
 0x31a   : > { %v3939_v4 = vpop.eup %3938  ;;  %3950 = vpow2.f32 %v1842_v23  ;;  %v1838_v34 = vmul.f32 1.442695, %v1825_v27  ;;  %v2002_v9 = vadd.f32 %v2001_v32, %v4803_v60  ;;  %v3705_v27 = vpop.f32.mrf.mxu0 }
 0x31b   : > { %v1846_v46 = vadd.f32 1.0, %v3939_v4  ;;  %v3690_v45 = vpop.f32.mrf.mxu1 }
 0x31c   : > { %v3941_v10 = vpop.eup %3940  ;;  %3952 = vpow2.f32 %v1838_v34  ;;  %v2013_v23 = vadd.f32 %v3690_v45, %v4805_v2  ;;  %v2120_v51 = vadd.f32 %v2089_v14, %v2002_v9 }
 0x31d   : > { %3954 = vrcp.f32 %v1846_v46  ;;  %v1844_v49 = vadd.f32 1.0, %v3941_v10  ;;  %v2004_v40 = vpop.f32.mrf.mxu1  ;;  %v2122_v46 = vadd.f32 %v3701_v29, %v2010_v12 }
 0x31e   : > { %v3943_v20 = vpop.eup %3942 }
 0x31f   : > { %3956 = vrcp.f32 %v1844_v49  ;;  %v1847_v47 = vadd.f32 1.0, %v3943_v20  ;;  %v3693_v26 = vpop.f32.mrf.mxu1  ;;  %v2005_v49 = vadd.f32 %v2004_v40, %v4807_v33 }
 0x320   : > { %v3945_v18 = vpop.eup %3944  ;;  %v2026_v29 = vadd.f32 %v3693_v26, %v4809_v8 }
 0x321   : > { %3958 = vrcp.f32 %v1847_v47  ;;  %v1845_v63 = vadd.f32 1.0, %v3945_v18  ;;  %v2017_v19 = vpop.f32.mrf.mxu1  ;;  %v2121_v12 = vadd.f32 %v2092_v17, %v2005_v49 }
 0x322   : > { %v2018_v33 = vadd.f32 %v2017_v19, %v4823_v35  ;;  %v2126_v49 = vadd.f32 %v3705_v27, %v2026_v29 }
 0x323   : > { %v3947_v52 = vpop.eup %3946  ;;  %3960 = vrcp.f32 %v1845_v63  ;;  %v3694_v58 = vpop.f32.mrf.mxu1  ;;  %v2123_v63 = vadd.f32 %v3702_v36, %v2013_v23 }
 0x324   : > { %v1850_v22 = vadd.f32 1.0, %v3947_v52  ;;  %v2105_v52 = vpop.f32.mrf.mxu0 }
 0x325   : > { %v3949_v25 = vpop.eup %3948  ;;  %v2020_v4 = vpop.f32.mrf.mxu1 }
 0x326   : > { %3962 = vrcp.f32 %v1850_v22  ;;  %v1848_v34 = vadd.f32 1.0, %v3949_v25 }
 0x327   : > { %v3951_v10 = vpop.eup %3950  ;;  %v3713_v20 = vpop.f32.mrf.mxu1 }
 0x328   : > { %v1851_v47 = vadd.f32 1.0, %v3951_v10  ;;  %v2218_v28 = vadd.f32 %v3713_v20, %v2122_v46  ;;  %3964 = vrcp.f32 %v1848_v34  ;;  %v3706_v34 = vpop.f32.mrf.mxu0  ;;  %v2029_v20 = vadd.f32 %v3694_v58, %v4833_v7 }
 0x329   : > { %v3953_v18 = vpop.eup %3952  ;;  %v2185_v60 = vpop.f32.mrf.mxu1 }
 0x32a   : > { %v3955_v32 = vpop.eup %3954  ;;  %3966 = vrcp.f32 %v1851_v47  ;;  %v1849_v2 = vadd.f32 1.0, %v3953_v18  ;;  %v4859_v45 = vadd.f32 %v4558_v43, %v2218_v28  ;;  %v2216_v22 = vadd.f32 %v2185_v60, %v2120_v51  ;;  %v2108_v58 = vpop.f32.mrf.mxu0 }
 0x32b   : > { %v3714_v40 = vpop.f32.mrf.mxu1  ;;  %v1862_v14 = vmul.f32 %v3955_v32, %v4817_v5  ;;  %v2124_v47 = vadd.f32 %v2105_v52, %v2018_v33 }
 0x32c   : > { %v3957_v9 = vpop.eup %3956  ;;  %3968 = vrcp.f32 %v1849_v2  ;;  %v2234_v36 = vsub.f32 0.0, %v4859_v45  ;;  %v4866_v25 = vadd.f32 %v4558_v43, %v2216_v22  ;;  %v2219_v23 = vadd.f32 %v3714_v40, %v2123_v63 }
 0x32d   : > { %v2188_v46 = vpop.f32.mrf.mxu1  ;;  %2956 = vrot.lane.b32.xlu1 %v1862_v14, %s4172_s18  ;;  %v1860_v8 = vmul.f32 %v3957_v9, %v4821_v50  ;;  %v2021_v50 = vadd.f32 %v2020_v4, %v4839_v39  ;;  %v2127_v2 = vadd.f32 %v3706_v34, %v2029_v20 }
 0x32e   : > { %v3959_v26 = vpop.eup %3958  ;;  %v2244_v35 = vmul.f32 1.442695, %v2234_v36  ;;  %v2232_v17 = vsub.f32 0.0, %v4866_v25  ;;  %v4872_v5 = vadd.f32 %v4558_v43, %v2219_v23  ;;  %v2217_v19 = vadd.f32 %v2188_v46, %v2121_v12  ;;  %v4882_v43 = vld [vmem:[%s5193_s4] ss:$0 sm:$0xff] }
 0x32f   : > { %v1863_v10 = vmul.f32 %v3959_v26, %v4827_v31  ;;  %v3717_v51 = vpop.f32.mrf.mxu1  ;;  %2952 = vrot.lane.b32.xlu0 %v1860_v8, %s4172_s18 }
 0x330   : > { %v3961_v28 = vpop.eup %3960  ;;  %v2240_v18 = vmul.f32 1.442695, %v2232_v17  ;;  %v2235_v63 = vsub.f32 0.0, %v4872_v5  ;;  %v4885_v31 = vadd.f32 %v4882_v43, %v2217_v19  ;;  %3970 = vpow2.f32 %v2244_v35 }
 0x331   : > { %v1861_v7 = vmul.f32 %v3961_v28, %v4831_v37  ;;  %v2222_v27 = vadd.f32 %v3717_v51, %v2126_v49  ;;  %v2201_v52 = vpop.f32.mrf.mxu1  ;;  %2958 = vrot.lane.b32.xlu1 %v1863_v10, %s4172_s18  ;;  %v2125_v37 = vadd.f32 %v2108_v58, %v2021_v50 }
 0x332   : > { %3972 = vpow2.f32 %v2240_v18  ;;  %v2246_v39 = vmul.f32 1.442695, %v2235_v63  ;;  %v2233_v4 = vsub.f32 0.0, %v4885_v31  ;;  %v2220_v60 = vadd.f32 %v2201_v52, %v2124_v47 }
 0x333   : > { %v3963_v32 = vpop.eup %3962  ;;  %v4891_v22 = vadd.f32 %v4882_v43, %v2222_v27  ;;  %v3718_v29 = vpop.f32.mrf.mxu1  ;;  %2954 = vrot.lane.b32.xlu0 %v1861_v7, %s4172_s18 }
 0x334   : > { %3974 = vpow2.f32 %v2246_v39  ;;  %v2242_v12 = vmul.f32 1.442695, %v2233_v4  ;;  %v4895_v33 = vadd.f32 %v4882_v43, %v2220_v60  ;;  %v1866_v40 = vmul.f32 %v3963_v32, %v4837_v0 }
 0x335   : > { %v2238_v14 = vsub.f32 0.0, %v4891_v22  ;;  %v2223_v9 = vadd.f32 %v3718_v29, %v2127_v2  ;;  %v2204_v36 = vpop.f32.mrf.mxu1  ;;  %v3965_v23 = vpop.eup %3964 }
 0x336   : > { %3976 = vpow2.f32 %v2242_v12  ;;  %v2236_v34 = vsub.f32 0.0, %v4895_v33  ;;  %v2221_v46 = vadd.f32 %v2204_v36, %v2125_v37  ;;  %v1864_v49 = vmul.f32 %v3965_v23, %v4843_v16 }
 0x337   : > { %v3967_v8 = vpop.eup %3966  ;;  %v2252_v26 = vmul.f32 1.442695, %v2238_v14  ;;  %v2231_v35 = vadd.f32 %v4882_v43, %v2223_v9  ;;  %2964 = vrot.lane.b32.xlu0 %v1866_v40, %s4172_s18 }
 0x338   : > { %v1867_v17 = vmul.f32 %v3967_v8, %v4847_v38  ;;  %v2248_v19 = vmul.f32 1.442695, %v2236_v34  ;;  %v2229_v0 = vadd.f32 %v4882_v43, %v2221_v46 }
 0x339   : > { %v3969_v10 = vpop.eup %3968  ;;  %3978 = vpow2.f32 %v2252_v26  ;;  %v2239_v20 = vsub.f32 0.0, %v2231_v35 }
 0x33a   : > { %3980 = vpow2.f32 %v2248_v19  ;;  %v2237_v47 = vsub.f32 0.0, %v2229_v0  ;;  %2966 = vrot.lane.b32.xlu1 %v1867_v17, %s4172_s18  ;;  %v1865_v28 = vmul.f32 %v3969_v10, %v4851_v13  ;;  %v3869_v17 = vld [vmem:[%s5192_s3 + $0xc0] sm:$0xff]  }
 0x33b   : > { %v2254_v51 = vmul.f32 1.442695, %v2239_v20  ;;  %2960 = vrot.lane.b32.xlu0 %v1864_v49, %s4172_s18 }
 0x33c   : > { %v2250_v50 = vmul.f32 1.442695, %v2237_v47 }
 0x33d   : > { %3982 = vpow2.f32 %v2254_v51  ;;  %v3971_v38 = vpop.eup %3970 }
 0x33e   : > { %3984 = vpow2.f32 %v2250_v50  ;;  %2962 = vrot.lane.b32.xlu1 %v1865_v28, %s4172_s18  ;;  %v2258_v7 = vadd.f32 1.0, %v3971_v38 }
 0x33f   : > { %v3973_v18 = vpop.eup %3972 }
 0x340   : > { %v2256_v63 = vadd.f32 1.0, %v3973_v18 }
 0x341   : > { %v3975_v16 = vpop.eup %3974 }
 0x342   : > { %v2259_v58 = vadd.f32 1.0, %v3975_v16  ;;  %3986 = vrcp.f32 %v2256_v63 }
 0x343   : > { %v3977_v27 = vpop.eup %3976 }
 0x344   : > { %3988 = vrcp.f32 %v2259_v58  ;;  %v2257_v52 = vadd.f32 1.0, %v3977_v27 }
 0x345   : > { %3990 = vrcp.f32 %v2258_v7  ;;  %v5204_v7 = vld [vmem:[#allocation2_spill] sm:$0xff] }
 0x346   : > { %v3979_v39 = vpop.eup %3978  ;;  %3992 = vrcp.f32 %v2257_v52  ;;  %v4986_v41 = vadd.f32 %v4814_v15, %v5204_v7 }
 0x347   : > { %v3981_v4 = vpop.eup %3980  ;;  %v2262_v13 = vadd.f32 1.0, %v3979_v39 }
 0x348   : > { %v2260_v60 = vadd.f32 1.0, %v3981_v4  ;;  %v1266_v52 = vsub.f32 0.0, %v4986_v41 }
 0x349   : > { %3994 = vrcp.f32 %v2262_v13 }
 0x34a   : > { %v3983_v32 = vpop.eup %3982  ;;  %3996 = vrcp.f32 %v2260_v60  ;;  %v1279_v4 = vmul.f32 1.442695, %v1266_v52 }
 0x34b   : > { %v3985_v2 = vpop.eup %3984  ;;  %v2263_v29 = vadd.f32 1.0, %v3983_v32 }
 0x34c   : > { %v2261_v37 = vadd.f32 1.0, %v3985_v2 }
 0x34d   : > { %3998 = vrcp.f32 %v2263_v29 }
 0x34e   : > { %4000 = vrcp.f32 %v2261_v37 }
 0x34f   : > { %v3987_v12 = vpop.eup %3986 }
 0x350   : > { %v2272_v23 = vmul.f32 %v3987_v12, %v4866_v25 }
 0x351   : > { %v3989_v40 = vpop.eup %3988 }
 0x352   : > { %v3991_v14 = vpop.eup %3990  ;;  %v2275_v36 = vmul.f32 %v3989_v40, %v4872_v5 }
 0x353   : > { %v3993_v9 = vpop.eup %3992  ;;  %v2274_v46 = vmul.f32 %v3991_v14, %v4859_v45  ;;  %v3872_v45 = vld [vmem:[%s5192_s3 + $0xf8] sm:$0xff]  }
 0x354   : > { %v2273_v34 = vmul.f32 %v3993_v9, %v4885_v31 }
 0x355   : > { %v2281_v26 = vpack.c.bf16 %v2275_v36, %v2274_v46 }
 0x356   : > { %v2280_v8 = vpack.c.bf16 %v2273_v34, %v2272_v23  ;;  %v3995_v19 = vpop.eup %3994 }
 0x357   : > { %v3997_v10 = vpop.eup %3996  ;;  %v2278_v47 = vmul.f32 %v3995_v19, %v4891_v22  ;;  %v4937_v22 = vadd.f32 %v4678_v42, %v4814_v15 }
 0x358   : > { %3723 = vmatprep.mubr.msk.bf16.mxu0 %vm723_vm3, %v2280_v8  ;;  %v2276_v31 = vmul.f32 %v3997_v10, %v4895_v33 }
 0x359   : > { %3724 = vmatmul.mubr.msk.bf16.vlgmr.msra.gmra.mxu0 %vm723_vm3, %v2281_v26  ;;  %v1263_v33 = vsub.f32 0.0, %v4937_v22 }
 0x35a   : > { %v3999_v49 = vpop.eup %3998  ;;  %3744 = vmatpush3.bf16.msra.mxu0 %v4779_v30  ;;  %v3873_v30 = vld [vmem:[%s5192_s3 + $0xf0] sm:$0xff]  }
 0x35b   : > { %v4001_v25 = vpop.eup %4000  ;;  %v2279_v5 = vmul.f32 %v3999_v49, %v2231_v35  ;;  %3745 = vmatprep.subr.bf16.mxu0 %v3869_v17  ;;  %v1273_v35 = vmul.f32 1.442695, %v1263_v33 }
 0x35c   : > { %v2277_v20 = vmul.f32 %v4001_v25, %v2229_v0 }
 0x35d   : > { %v2283_v28 = vpack.c.bf16 %v2279_v5, %v2278_v47  ;;  %4002 = vpow2.f32 %v1273_v35 }
 0x35e   : > { %v2282_v51 = vpack.c.bf16 %v2277_v20, %v2276_v31  ;;  %3746 = vmatpush3.bf16.msra.mxu0 %v3869_v17 }
 0x35f   : > { %3767 = vmatprep.subr.bf16.mxu0 %v3872_v45 }
 0x360   : > { %3727 = vmatprep.mubr.msk.bf16.mxu0 %vm723_vm3, %v2282_v51 }
 0x361   : > { %3728 = vmatmul.mubr.msk.bf16.gmra.mxu0 %vm723_vm3, %v2283_v28 }
 0x362   : > { %3747 = vmatprep.mubr.msk.bf16.mxu0 %vm723_vm3, %v4377_v62  ;;  %v4941_v62 = vadd.f32 %v4814_v15, %v4680_v21  ;;  %v4956_v21 = vadd.f32 %v4814_v15, %v4684_v61  ;;  %v4976_v61 = vadd.f32 %v4690_v1, %v4814_v15 }
 0x364   : > { %v1261_v42 = vsub.f32 0.0, %v4941_v62  ;;  %v1262_v18 = vsub.f32 0.0, %v4956_v21 }
 0x366   : > { %v1269_v38 = vmul.f32 1.442695, %v1261_v42 }
 0x368   : > { %4004 = vpow2.f32 %v1269_v38 }
 0x369   : > { %3748 = vmatmul.mubr.msk.bf16.vlgmr.msra.gmra.mxu0 %vm723_vm3, %v4415_v44  ;;  %v4948_v44 = vadd.f32 %v4682_v59, %v4814_v15  ;;  %v688_v59 = vrot.slane %v4676_v56, 5 }
 0x36a   : > { %3768 = vmatpush3.bf16.msra.mxu0 %v3872_v45  ;;  %3751 = vmatprep.mubr.msk.bf16.mxu0 %vm723_vm3, %v4438_v3  ;;  %v685_v3 = vrot.slane %v4671_v57, 5  ;;  %v4003_v39 = vpop.eup %4002 }
 0x36b   : > { %3769 = vmatprep.subr.bf16.mxu0 %v3873_v30  ;;  %v1264_v0 = vsub.f32 0.0, %v4948_v44  ;;  %v1287_v60 = vadd.f32 1.0, %v4003_v39 }
 0x36c   : > { %v687_v50 = vrot.slane %v685_v3, 4 }
 0x36d   : > { %v1275_v57 = vmul.f32 1.442695, %v1264_v0 }
 0x36e   : > { %3770 = vmatpush3.bf16.msra.mxu0 %v3873_v30  ;;  %v689_v56 = vsel %vm4491_vm7, %v687_v50, %v688_v59 }
 0x36f   : > { %4006 = vpow2.f32 %v1275_v57 }
 0x371   : > { %3752 = vmatmul.mubr.msk.bf16.gmra.mxu0 %vm723_vm3, %v4452_v11  ;;  %v3218_v11 = vrot.slane %v4669_v55, 9 }
 0x372   : > { %3771 = vmatprep.mubr.msk.bf16.mxu0 %vm723_vm3, %v4525_v48  ;;  %v4964_v48 = vadd.f32 %v4686_v24, %v4814_v15  ;;  %v1271_v24 = vmul.f32 1.442695, %v1262_v18 }
 0x373   : > { %v686_v55 = vsel %vm4491_vm7, %v3218_v11, %v685_v3 }
 0x374   : > { %v1267_v63 = vsub.f32 0.0, %v4964_v48  ;;  %v3402_v16 = vcombine.low %v686_v55, %v689_v56  ;;  %4008 = vpow2.f32 %v1271_v24 }
 0x375   : > { %v4005_v13 = vpop.eup %4004 }
 0x376   : > { %v1281_v58 = vmul.f32 1.442695, %v1267_v63  ;;  %v1285_v2 = vadd.f32 1.0, %v4005_v13 }
 0x378   : > { %4010 = vpow2.f32 %v1281_v58 }
 0x379   : > { %3772 = vmatmul.mubr.msk.bf16.vlgmr.msra.gmra.mxu0 %vm723_vm3, %v4534_v53  ;;  %v4981_v53 = vadd.f32 %v4814_v15, %v4688_v6 }
 0x37a   : > { %3775 = vmatprep.mubr.msk.bf16.mxu0 %vm723_vm3, %v4623_v54  ;;  %v1268_v54 = vsub.f32 0.0, %v4976_v61 }
 0x37b   : > { %v1265_v1 = vsub.f32 0.0, %v4981_v53 }
 0x37c   : > { %v1283_v27 = vmul.f32 1.442695, %v1268_v54  ;;  %v4007_v32 = vpop.eup %4006 }
 0x37d   : > { %v1277_v6 = vmul.f32 1.442695, %v1265_v1  ;;  %v1288_v37 = vadd.f32 1.0, %v4007_v32 }
 0x37e   : > { %4012 = vpow2.f32 %v1283_v27 }
 0x37f   : > { %4014 = vpow2.f32 %v1277_v6 }
 0x380   : > { %4016 = vpow2.f32 %v1279_v4 }
 0x381   : > { %3776 = vmatmul.mubr.msk.bf16.gmra.mxu0 %vm723_vm3, %v3402_v16  ;;  %v4009_v29 = vpop.eup %4008  ;;  %4018 = vrcp.f32 %v1287_v60 }
 0x382   : > { %4020 = vrcp.f32 %v1285_v2  ;;  %v1286_v12 = vadd.f32 1.0, %v4009_v29 }
 0x383   : > { %4022 = vrcp.f32 %v1288_v37 }
 0x384   : > { %4024 = vrcp.f32 %v1286_v12 }
 0x385   : > { %v4011_v40 = vpop.eup %4010 }
 0x386   : > { %v1291_v9 = vadd.f32 1.0, %v4011_v40 }
 0x388   : > { %4026 = vrcp.f32 %v1291_v9 }
 0x38b   : > { %v4013_v14 = vpop.eup %4012 }
 0x38c   : > { %v4015_v36 = vpop.eup %4014  ;;  %v1292_v23 = vadd.f32 1.0, %v4013_v14 }
 0x38d   : > { %v4017_v34 = vpop.eup %4016  ;;  %v1289_v46 = vadd.f32 1.0, %v4015_v36 }
 0x38e   : > { %v4019_v8 = vpop.eup %4018  ;;  %4028 = vrcp.f32 %v1292_v23  ;;  %v1290_v26 = vadd.f32 1.0, %v4017_v34 }
 0x38f   : > { %4030 = vrcp.f32 %v1289_v46  ;;  %v4021_v17 = vpop.eup %4020  ;;  %v1303_v19 = vmul.f32 %v4019_v8, %v4937_v22 }
 0x390   : > { %v4023_v10 = vpop.eup %4022  ;;  %4032 = vrcp.f32 %v1290_v26  ;;  %v1301_v25 = vmul.f32 %v4021_v17, %v4941_v62 }
 0x391   : > { %v4025_v45 = vpop.eup %4024  ;;  %v1304_v20 = vmul.f32 %v4023_v10, %v4948_v44 }
 0x392   : > { %v1302_v28 = vmul.f32 %v4025_v45, %v4956_v21 }
 0x395   : > { %v4027_v22 = vpop.eup %4026 }
 0x396   : > { %v1307_v3 = vmul.f32 %v4027_v22, %v4964_v48 }
 0x39b   : > { %v4029_v44 = vpop.eup %4028 }
 0x39c   : > { %v4031_v42 = vpop.eup %4030  ;;  %v1308_v0 = vmul.f32 %v4029_v44, %v4976_v61  ;;  %v3737_v61 = vpop.f32.mrf.mxu1 }
 0x39d   : > { %v4033_v11 = vpop.eup %4032  ;;  %v1305_v50 = vmul.f32 %v4031_v42, %v4981_v53 }
 0x39e   : > { %v1306_v57 = vmul.f32 %v4033_v11, %v4986_v41  ;;  %v2465_v24 = vpop.f32.mrf.mxu1 }
 0x39f   : > { %v2957_v49 = vpop.permute.xlu1 %2956 }
 0x3a0   : > { %v2978_v5 = vsel %vm723_vm3, %v1303_v19, %v2957_v49  ;;  %v3738_v63 = vpop.f32.mrf.mxu1 }
 0x3a1   : > { %3027 = vst.msk [vmem:[%s4995_s23 + $0x20] sm:$0xff] %vm3024_vm9, %v2978_v5  ;;  %v2953_v31 = vpop.permute.xlu0 %2952 }
 0x3a2   : > { %v2976_v47 = vsel %vm723_vm3, %v1301_v25, %v2953_v31  ;;  %v2468_v53 = vpop.f32.mrf.mxu1 }
 0x3a3   : > { %3025 = vst.msk [vmem:[%s4995_s23] sm:$0xff] %vm3024_vm9, %v2976_v47  ;;  %v2959_v51 = vpop.permute.xlu1 %2958 }
 0x3a4   : > { %v2979_v30 = vsel %vm723_vm3, %v1304_v20, %v2959_v51  ;;  %v3741_v16 = vpop.f32.mrf.mxu1 }
 0x3a5   : > { %3028 = vst.msk [vmem:[%s4995_s23 + $0x28] sm:$0xff] %vm3024_vm9, %v2979_v30  ;;  %v2955_v62 = vpop.permute.xlu0 %2954 }
 0x3a6   : > { %v2977_v33 = vsel %vm723_vm3, %v1302_v28, %v2955_v62  ;;  %v2481_v58 = vpop.f32.mrf.mxu1 }
 0x3a7   : > { %3026 = vst.msk [vmem:[%s4995_s23 + $0x8] sm:$0xff] %vm3024_vm9, %v2977_v33 }
 0x3a8   : > { %v3742_v27 = vpop.f32.mrf.mxu1 }
 0x3a9   : > { %v2965_v35 = vpop.permute.xlu0 %2964 }
 0x3aa   : > { %v2982_v21 = vsel %vm723_vm3, %v1307_v3, %v2965_v35  ;;  %v2484_v39 = vpop.f32.mrf.mxu1 }
 0x3ab   : > { %3031 = vst.msk [vmem:[%s4995_s23 + $0x60] sm:$0xff] %vm3024_vm9, %v2982_v21 }
 0x3ac   : > { %v2967_v59 = vpop.permute.xlu1 %2966  ;;  %v3761_v60 = vpop.f32.mrf.mxu1 }
 0x3ad   : > { %v2983_v38 = vsel %vm723_vm3, %v1308_v0, %v2967_v59  ;;  %v2961_v18 = vpop.permute.xlu0 %2960 }
 0x3ae   : > { %3032 = vst.msk [vmem:[%s4995_s23 + $0x68] sm:$0xff] %vm3024_vm9, %v2983_v38  ;;  %v2980_v48 = vsel %vm723_vm3, %v1305_v50, %v2961_v18  ;;  %v2624_v29 = vpop.f32.mrf.mxu1 }
 0x3af   : > { %3029 = vst.msk [vmem:[%s4995_s23 + $0x40] sm:$0xff] %vm3024_vm9, %v2980_v48 }
 0x3b0   : > { %v2963_v55 = vpop.permute.xlu1 %2962  ;;  %v3762_v40 = vpop.f32.mrf.mxu1 }
 0x3b1   : > { %v2981_v56 = vsel %vm723_vm3, %v1306_v57, %v2963_v55 }
 0x3b2   : > { %3030 = vst.msk [vmem:[%s4995_s23 + $0x48] sm:$0xff] %vm3024_vm9, %v2981_v56  ;;  %v2627_v23 = vpop.f32.mrf.mxu1 }
 0x3b4   : > { %v3765_v17 = vpop.f32.mrf.mxu1 }
 0x3b6   : > { %v2640_v31 = vpop.f32.mrf.mxu1 }
 0x3b8   : > { %v3766_v21 = vpop.f32.mrf.mxu1 }
 0x419   : > { %v5029_v54 = vpop.f32.mrf.mxu0 }
 0x41b   : > { %v5031_v7 = vpop.f32.mrf.mxu0 }
 0x41d   : > { %v5033_v1 = vpop.f32.mrf.mxu0 }
 0x41f   : > { %v5035_v41 = vpop.f32.mrf.mxu0 }
 0x421   : > { %v5037_v52 = vpop.f32.mrf.mxu0 }
 0x423   : > { %v5039_v6 = vpop.f32.mrf.mxu0 }
 0x425   : > { %v5041_v4 = vpop.f32.mrf.mxu0 }
 0x427   : > { %v5043_v13 = vpop.f32.mrf.mxu0 }
 0x429   : > { %v3749_v32 = vpop.f32.mrf.mxu0 }
 0x42a   : > { %v2551_v36 = vadd.f32 %v3749_v32, %v3737_v61 }
 0x42b   : > { %v2542_v2 = vpop.f32.mrf.mxu0 }
 0x42c   : > { %v2543_v46 = vadd.f32 %v2542_v2, %v2465_v24  ;;  %v2657_v26 = vadd.f32 %v3761_v60, %v2551_v36 }
 0x42d   : > { %v3750_v37 = vpop.f32.mrf.mxu0 }
 0x42e   : > { %v2554_v19 = vadd.f32 %v3750_v37, %v3738_v63  ;;  %v2655_v49 = vadd.f32 %v2624_v29, %v2543_v46 }
 0x42f   : > { %v2545_v12 = vpop.f32.mrf.mxu0 }
 0x430   : > { %v2546_v25 = vadd.f32 %v2545_v12, %v2468_v53  ;;  %v2658_v51 = vadd.f32 %v3762_v40, %v2554_v19 }
 0x431   : > { %v3753_v14 = vpop.f32.mrf.mxu0 }
 0x432   : > { %v2567_v28 = vadd.f32 %v3753_v14, %v3741_v16  ;;  %v2656_v22 = vadd.f32 %v2627_v23, %v2546_v25  ;;  %v2643_v16 = vpop.f32.mrf.mxu1 }
 0x433   : > { %v2558_v9 = vpop.f32.mrf.mxu0 }
 0x434   : > { %v2559_v62 = vadd.f32 %v2558_v9, %v2481_v58  ;;  %v2661_v59 = vadd.f32 %v3765_v17, %v2567_v28 }
 0x435   : > { %v3754_v34 = vpop.f32.mrf.mxu0 }
 0x436   : > { %v2570_v35 = vadd.f32 %v3754_v34, %v3742_v27  ;;  %v2659_v48 = vadd.f32 %v2640_v31, %v2559_v62 }
 0x437   : > { %v2561_v8 = vpop.f32.mrf.mxu0 }
 0x438   : > { %v2562_v56 = vadd.f32 %v2561_v8, %v2484_v39  ;;  %v2662_v53 = vadd.f32 %v3766_v21, %v2570_v35 }
 0x439   : > { %v3773_v10 = vpop.f32.mrf.mxu0 }
 0x43a   : > { %v2753_v5 = vadd.f32 %v3773_v10, %v2657_v26  ;;  %v2660_v39 = vadd.f32 %v2643_v16, %v2562_v56 }
 0x43b   : > { %v2720_v45 = vpop.f32.mrf.mxu0 }
 0x43c   : > { %v5046_v20 = vadd.f32 %v4882_v43, %v2753_v5  ;;  %v2751_v47 = vadd.f32 %v2720_v45, %v2655_v49 }
 0x43d   : > { %v3774_v30 = vpop.f32.mrf.mxu0 }
 0x43e   : > { %v2769_v33 = vsub.f32 0.0, %v5046_v20  ;;  %v5050_v44 = vadd.f32 %v4882_v43, %v2751_v47  ;;  %v2754_v3 = vadd.f32 %v3774_v30, %v2658_v51 }
 0x43f   : > { %v2723_v42 = vpop.f32.mrf.mxu0 }
 0x440   : > { %v2779_v0 = vmul.f32 1.442695, %v2769_v33  ;;  %v2767_v11 = vsub.f32 0.0, %v5050_v44  ;;  %v2752_v50 = vadd.f32 %v2723_v42, %v2656_v22  ;;  %v5054_v38 = vadd.f32 %v4882_v43, %v2754_v3 }
 0x441   : > { %v3777_v18 = vpop.f32.mrf.mxu0 }
 0x442   : > { %4034 = vpow2.f32 %v2779_v0  ;;  %v2775_v57 = vmul.f32 1.442695, %v2767_v11  ;;  %v5057_v55 = vadd.f32 %v4882_v43, %v2752_v50  ;;  %v2770_v61 = vsub.f32 0.0, %v5054_v38 }
 0x443   : > { %v2757_v24 = vadd.f32 %v3777_v18, %v2661_v59  ;;  %v2736_v63 = vpop.f32.mrf.mxu0 }
 0x444   : > { %4036 = vpow2.f32 %v2775_v57  ;;  %v2768_v58 = vsub.f32 0.0, %v5057_v55  ;;  %v2755_v27 = vadd.f32 %v2736_v63, %v2659_v48  ;;  %v2781_v60 = vmul.f32 1.442695, %v2770_v61 }
 0x445   : > { %v5062_v32 = vadd.f32 %v4882_v43, %v2757_v24  ;;  %v3778_v2 = vpop.f32.mrf.mxu0 }
 0x446   : > { %v2777_v29 = vmul.f32 1.442695, %v2768_v58  ;;  %v2763_v37 = vadd.f32 %v4882_v43, %v2755_v27  ;;  %v2758_v12 = vadd.f32 %v3778_v2, %v2662_v53  ;;  %4038 = vpow2.f32 %v2781_v60 }
 0x447   : > { %v2773_v40 = vsub.f32 0.0, %v5062_v32  ;;  %v2739_v14 = vpop.f32.mrf.mxu0 }
 0x448   : > { %4040 = vpow2.f32 %v2777_v29  ;;  %v2771_v9 = vsub.f32 0.0, %v2763_v37  ;;  %v2766_v36 = vadd.f32 %v4882_v43, %v2758_v12  ;;  %v2756_v34 = vadd.f32 %v2739_v14, %v2660_v39 }
 0x449   : > { %v2787_v23 = vmul.f32 1.442695, %v2773_v40 }
 0x44a   : > { %v2783_v46 = vmul.f32 1.442695, %v2771_v9  ;;  %v2774_v8 = vsub.f32 0.0, %v2766_v36  ;;  %v2764_v26 = vadd.f32 %v4882_v43, %v2756_v34 }
 0x44b   : > { %4042 = vpow2.f32 %v2787_v23 }
 0x44c   : > { %4044 = vpow2.f32 %v2783_v46  ;;  %v2789_v17 = vmul.f32 1.442695, %v2774_v8  ;;  %v2772_v19 = vsub.f32 0.0, %v2764_v26 }
 0x44e   : > { %4046 = vpow2.f32 %v2789_v17  ;;  %v2785_v49 = vmul.f32 1.442695, %v2772_v19 }
 0x44f   : > { %v4035_v10 = vpop.eup %4034 }
 0x450   : > { %v2793_v5 = vadd.f32 1.0, %v4035_v10  ;;  %4048 = vpow2.f32 %v2785_v49 }
 0x451   : > { %v4037_v25 = vpop.eup %4036 }
 0x452   : > { %v2791_v45 = vadd.f32 1.0, %v4037_v25  ;;  %4050 = vrcp.f32 %v2793_v5  ;;  %v5097_v25 = vld [vmem:[%s5195_s6] ss:$0 sm:$0xff] }
 0x453   : > { %v4039_v31 = vpop.eup %4038 }
 0x454   : > { %v2794_v51 = vadd.f32 1.0, %v4039_v31  ;;  %4052 = vrcp.f32 %v2791_v45 }
 0x455   : > { %v4041_v47 = vpop.eup %4040 }
 0x456   : > { %v2792_v28 = vadd.f32 1.0, %v4041_v47  ;;  %4054 = vrcp.f32 %v2794_v51 }
 0x458   : > { %v4043_v30 = vpop.eup %4042  ;;  %4056 = vrcp.f32 %v2792_v28 }
 0x459   : > { %v4045_v43 = vpop.eup %4044  ;;  %v2797_v33 = vadd.f32 1.0, %v4043_v30 }
 0x45a   : > { %v2795_v62 = vadd.f32 1.0, %v4045_v43 }
 0x45b   : > { %v4047_v22 = vpop.eup %4046 }
 0x45c   : > { %v2798_v3 = vadd.f32 1.0, %v4047_v22 }
 0x45d   : > { %v4049_v42 = vpop.eup %4048 }
 0x45e   : > { %4058 = vrcp.f32 %v2798_v3  ;;  %v2796_v35 = vadd.f32 1.0, %v4049_v42 }
 0x45f   : > { %4060 = vrcp.f32 %v2795_v62  ;;  %v4051_v21 = vpop.eup %4050 }
 0x460   : > { %4062 = vrcp.f32 %v2797_v33  ;;  %v2809_v57 = vmul.f32 %v4051_v21, %v5046_v20 }
 0x461   : > { %4064 = vrcp.f32 %v2796_v35  ;;  %v4053_v0 = vpop.eup %4052 }
 0x462   : > { %v2807_v18 = vmul.f32 %v4053_v0, %v5050_v44 }
 0x463   : > { %v4055_v11 = vpop.eup %4054 }
 0x464   : > { %v2810_v59 = vmul.f32 %v4055_v11, %v5054_v38 }
 0x465   : > { %v4057_v50 = vpop.eup %4056 }
 0x466   : > { %v2808_v48 = vmul.f32 %v4057_v50, %v5057_v55  ;;  %v2816_v61 = vpack.c.bf16 %v2810_v59, %v2809_v57 }
 0x468   : > { %v2815_v56 = vpack.c.bf16 %v2808_v48, %v2807_v18 }
 0x46a   : > { %3783 = vmatprep.mubr.msk.bf16.mxu1 %vm723_vm3, %v2815_v56 }
 0x46b   : > { %v4059_v24 = vpop.eup %4058  ;;  %3784 = vmatmul.mubr.msk.bf16.vlgmr.msra.gmra.mxu1 %vm723_vm3, %v2816_v61 }
 0x46c   : > { %v4061_v63 = vpop.eup %4060  ;;  %v2814_v58 = vmul.f32 %v4059_v24, %v2766_v36 }
 0x46d   : > { %v4063_v53 = vpop.eup %4062  ;;  %v2811_v27 = vmul.f32 %v4061_v63, %v2763_v37 }
 0x46e   : > { %v4065_v16 = vpop.eup %4064  ;;  %v2813_v38 = vmul.f32 %v4063_v53, %v5062_v32 }
 0x46f   : > { %v2812_v60 = vmul.f32 %v4065_v16, %v2764_v26 }
 0x470   : > { %v2818_v2 = vpack.c.bf16 %v2814_v58, %v2813_v38 }
 0x471   : > { %v2817_v44 = vpack.c.bf16 %v2812_v60, %v2811_v27 }
 0x473   : > { %3787 = vmatprep.mubr.msk.bf16.mxu1 %vm723_vm3, %v2817_v44 }
 0x474   : > { %3788 = vmatmul.mubr.msk.bf16.gmra.mxu1 %vm723_vm3, %v2818_v2 }
 0x52b   : > { %v3785_v20 = vpop.f32.mrf.mxu1 }
 0x52c   : > { %v5078_v55 = vadd.f32 %v3785_v20, %v4814_v15 }
 0x52d   : > { %v2865_v29 = vpop.f32.mrf.mxu1 }
 0x52e   : > { %v2898_v12 = vsub.f32 0.0, %v5078_v55  ;;  %v5082_v39 = vadd.f32 %v4814_v15, %v2865_v29 }
 0x52f   : > { %v3786_v37 = vpop.f32.mrf.mxu1 }
 0x530   : > { %v2908_v40 = vmul.f32 1.442695, %v2898_v12  ;;  %v2896_v32 = vsub.f32 0.0, %v5082_v39  ;;  %v5086_v14 = vadd.f32 %v3786_v37, %v4814_v15 }
 0x531   : > { %v2868_v9 = vpop.f32.mrf.mxu1 }
 0x532   : > { %4066 = vpow2.f32 %v2908_v40  ;;  %v2904_v36 = vmul.f32 1.442695, %v2896_v32  ;;  %v2899_v23 = vsub.f32 0.0, %v5086_v14  ;;  %v2869_v34 = vadd.f32 %v4814_v15, %v2868_v9 }
 0x533   : > { %v2339_v9 = vadd.f32 %v5097_v25, %v5029_v54 }
 0x534   : > { %4068 = vpow2.f32 %v2904_v36  ;;  %v2910_v46 = vmul.f32 1.442695, %v2899_v23  ;;  %v2897_v8 = vsub.f32 0.0, %v2869_v34  ;;  %v3789_v26 = vpop.f32.mrf.mxu1  ;;  %v2331_v36 = vadd.f32 %v5097_v25, %v5031_v7 }
 0x535   : > { %v5091_v17 = vadd.f32 %v3789_v26, %v4814_v15  ;;  %v2363_v23 = vsub.f32 0.0, %v2339_v9 }
 0x536   : > { %4070 = vpow2.f32 %v2910_v46  ;;  %v2906_v19 = vmul.f32 1.442695, %v2897_v8  ;;  %v2881_v10 = vpop.f32.mrf.mxu1  ;;  %v2361_v46 = vsub.f32 0.0, %v2331_v36 }
 0x537   : > { %v2902_v49 = vsub.f32 0.0, %v5091_v17  ;;  %v2882_v5 = vadd.f32 %v5097_v25, %v2881_v10  ;;  %v2373_v8 = vmul.f32 1.442695, %v2363_v23  ;;  %v5126_v10 = vadd.f32 %v5097_v25, %v5039_v6 }
 0x538   : > { %4072 = vpow2.f32 %v2906_v19  ;;  %v3790_v45 = vpop.f32.mrf.mxu1  ;;  %v2369_v19 = vmul.f32 1.442695, %v2361_v46 }
 0x539   : > { %v2916_v31 = vmul.f32 1.442695, %v2902_v49  ;;  %v2900_v47 = vsub.f32 0.0, %v2882_v5  ;;  %v2893_v51 = vadd.f32 %v5097_v25, %v3790_v45  ;;  %v5131_v49 = vadd.f32 %v5097_v25, %v5037_v52 }
 0x53a   : > { %v2884_v15 = vpop.f32.mrf.mxu1 }
 0x53b   : > { %4074 = vpow2.f32 %v2916_v31  ;;  %v2912_v28 = vmul.f32 1.442695, %v2900_v47  ;;  %v2903_v30 = vsub.f32 0.0, %v2893_v51  ;;  %v2885_v43 = vadd.f32 %v5097_v25, %v2884_v15 }
 0x53c   : > { %v2367_v6 = vsub.f32 0.0, %v5131_v49  ;;  %v5141_v31 = vadd.f32 %v5097_v25, %v5041_v4 }
 0x53d   : > { %4076 = vpow2.f32 %v2912_v28  ;;  %v2918_v22 = vmul.f32 1.442695, %v2903_v30  ;;  %v2901_v62 = vsub.f32 0.0, %v2885_v43 }
 0x53e   : > { %v2381_v52 = vmul.f32 1.442695, %v2367_v6 }
 0x53f   : > { %v4067_v33 = vpop.eup %4066  ;;  %4078 = vpow2.f32 %v2918_v22  ;;  %v2914_v3 = vmul.f32 1.442695, %v2901_v62 }
 0x540   : > { %v2922_v42 = vadd.f32 1.0, %v4067_v33 }
 0x541   : > { %v4069_v35 = vpop.eup %4068  ;;  %4080 = vpow2.f32 %v2914_v3 }
 0x542   : > { %4082 = vrcp.f32 %v2922_v42  ;;  %v2920_v21 = vadd.f32 1.0, %v4069_v35 }
 0x543   : > { %v4071_v0 = vpop.eup %4070 }
 0x544   : > { %4084 = vrcp.f32 %v2920_v21  ;;  %v2923_v11 = vadd.f32 1.0, %v4071_v0 }
 0x545   : > { %v4073_v50 = vpop.eup %4072 }
 0x546   : > { %4086 = vrcp.f32 %v2923_v11  ;;  %v2921_v59 = vadd.f32 1.0, %v4073_v50 }
 0x548   : > { %v4075_v18 = vpop.eup %4074  ;;  %4088 = vrcp.f32 %v2921_v59 }
 0x549   : > { %v2926_v57 = vadd.f32 1.0, %v4075_v18 }
 0x54a   : > { %v4077_v48 = vpop.eup %4076 }
 0x54b   : > { %v2924_v56 = vadd.f32 1.0, %v4077_v48 }
 0x54c   : > { %v4079_v61 = vpop.eup %4078 }
 0x54d   : > { %4090 = vrcp.f32 %v2924_v56  ;;  %v2927_v53 = vadd.f32 1.0, %v4079_v61 }
 0x54e   : > { %v4081_v24 = vpop.eup %4080  ;;  %4092 = vrcp.f32 %v2926_v57 }
 0x54f   : > { %v4083_v63 = vpop.eup %4082  ;;  %v2925_v16 = vadd.f32 1.0, %v4081_v24 }
 0x550   : > { %v2938_v58 = vmul.f32 %v4083_v63, %v5078_v55 }
 0x551   : > { %v4085_v27 = vpop.eup %4084  ;;  %4094 = vrcp.f32 %v2925_v16 }
 0x552   : > { %2996 = vrot.lane.b32.xlu0 %v2938_v58, %s4172_s18  ;;  %4096 = vrcp.f32 %v2927_v53  ;;  %v2936_v38 = vmul.f32 %v4085_v27, %v5082_v39 }
 0x553   : > { %v4087_v60 = vpop.eup %4086  ;;  %4098 = vpow2.f32 %v2373_v8 }
 0x554   : > { %v2939_v44 = vmul.f32 %v4087_v60, %v5086_v14  ;;  %4100 = vpow2.f32 %v2369_v19 }
 0x555   : > { %v4089_v2 = vpop.eup %4088 }
 0x556   : > { %2998 = vrot.lane.b32.xlu1 %v2939_v44, %s4172_s18  ;;  %2992 = vrot.lane.b32.xlu0 %v2936_v38, %s4172_s18  ;;  %v2937_v20 = vmul.f32 %v4089_v2, %v2869_v34  ;;  %v2342_v34 = vadd.f32 %v5097_v25, %v5033_v1  ;;  %v2365_v1 = vsub.f32 0.0, %v5126_v10 }
 0x558   : > { %v2364_v26 = vsub.f32 0.0, %v2342_v34  ;;  %v2377_v45 = vmul.f32 1.442695, %v2365_v1 }
 0x55a   : > { %v4091_v29 = vpop.eup %4090  ;;  %2994 = vrot.lane.b32.xlu1 %v2937_v20, %s4172_s18  ;;  %v2375_v54 = vmul.f32 1.442695, %v2364_v26 }
 0x55b   : > { %v2940_v55 = vmul.f32 %v4091_v29, %v2882_v5  ;;  %v4093_v12 = vpop.eup %4092 }
 0x55c   : > { %v2942_v40 = vmul.f32 %v4093_v12, %v5091_v17  ;;  %v5122_v17 = vadd.f32 %v5097_v25, %v5035_v41  ;;  %v5136_v41 = vadd.f32 %v5097_v25, %v5043_v13  ;;  %4102 = vpow2.f32 %v2375_v54 }
 0x55d   : > { %3000 = vrot.lane.b32.xlu0 %v2940_v55, %s4172_s18 }
 0x55e   : > { %v4095_v37 = vpop.eup %4094  ;;  %v2362_v7 = vsub.f32 0.0, %v5122_v17  ;;  %v2366_v47 = vsub.f32 0.0, %v5136_v41 }
 0x55f   : > { %v2941_v32 = vmul.f32 %v4095_v37, %v2885_v43  ;;  %v4097_v39 = vpop.eup %4096 }
 0x560   : > { %v2943_v14 = vmul.f32 %v4097_v39, %v2893_v51  ;;  %v2371_v5 = vmul.f32 1.442695, %v2362_v7  ;;  %v2368_v51 = vsub.f32 0.0, %v5141_v31  ;;  %v2379_v15 = vmul.f32 1.442695, %v2366_v47  ;;  %v4099_v28 = vpop.eup %4098 }
 0x561   : > { %3002 = vrot.lane.b32.xlu1 %v2941_v32, %s4172_s18  ;;  %3004 = vrot.lane.b32.xlu0 %v2942_v40, %s4172_s18  ;;  %v4101_v30 = vpop.eup %4100  ;;  %v2387_v43 = vadd.f32 1.0, %v4099_v28 }
 0x562   : > { %4104 = vpow2.f32 %v2371_v5  ;;  %v2383_v13 = vmul.f32 1.442695, %v2368_v51  ;;  %v2385_v62 = vadd.f32 1.0, %v4101_v30 }
 0x563   : > { %4106 = vpow2.f32 %v2377_v45 }
 0x564   : > { %4108 = vpow2.f32 %v2381_v52 }
 0x565   : > { %3006 = vrot.lane.b32.xlu1 %v2943_v14, %s4172_s18  ;;  %4110 = vpow2.f32 %v2379_v15 }
 0x566   : > { %4112 = vpow2.f32 %v2383_v13 }
 0x567   : > { %4114 = vrcp.f32 %v2387_v43 }
 0x568   : > { %4116 = vrcp.f32 %v2385_v62 }
 0x569   : > { %v4103_v22 = vpop.eup %4102 }
 0x56a   : > { %v2388_v4 = vadd.f32 1.0, %v4103_v22 }
 0x56c   : > { %4118 = vrcp.f32 %v2388_v4 }
 0x56f   : > { %v4105_v25 = vpop.eup %4104 }
 0x570   : > { %v4107_v33 = vpop.eup %4106  ;;  %v2386_v3 = vadd.f32 1.0, %v4105_v25 }
 0x571   : > { %v4109_v42 = vpop.eup %4108  ;;  %v2389_v35 = vadd.f32 1.0, %v4107_v33 }
 0x572   : > { %v4111_v21 = vpop.eup %4110  ;;  %4120 = vrcp.f32 %v2386_v3  ;;  %v2391_v0 = vadd.f32 1.0, %v4109_v42 }
 0x573   : > { %4122 = vrcp.f32 %v2389_v35  ;;  %v2390_v11 = vadd.f32 1.0, %v4111_v21  ;;  %v4113_v50 = vpop.eup %4112 }
 0x574   : > { %v4115_v59 = vpop.eup %4114  ;;  %4124 = vrcp.f32 %v2391_v0  ;;  %v2392_v18 = vadd.f32 1.0, %v4113_v50 }
 0x575   : > { %4126 = vrcp.f32 %v2390_v11  ;;  %v4117_v48 = vpop.eup %4116  ;;  %v2403_v57 = vmul.f32 %v4115_v59, %v2339_v9 }
 0x576   : > { %4128 = vrcp.f32 %v2392_v18  ;;  %v2401_v63 = vmul.f32 %v4117_v48, %v2331_v36 }
 0x579   : > { %v4119_v56 = vpop.eup %4118 }
 0x57a   : > { %v2404_v53 = vmul.f32 %v4119_v56, %v2342_v34 }
 0x57f   : > { %v4121_v16 = vpop.eup %4120 }
 0x580   : > { %v4123_v44 = vpop.eup %4122  ;;  %v2402_v2 = vmul.f32 %v4121_v16, %v5122_v17 }
 0x581   : > { %v4125_v55 = vpop.eup %4124  ;;  %v2405_v12 = vmul.f32 %v4123_v44, %v5126_v10 }
 0x582   : > { %v4127_v37 = vpop.eup %4126  ;;  %v2407_v39 = vmul.f32 %v4125_v55, %v5131_v49 }
 0x583   : > { %v2406_v14 = vmul.f32 %v4127_v37, %v5136_v41  ;;  %v4129_v9 = vpop.eup %4128 }
 0x584   : > { %v2408_v8 = vmul.f32 %v4129_v9, %v5141_v31 }
 0x5c4   : > { %v2997_v61 = vpop.permute.xlu0 %2996 }
 0x5c5   : > { %v3018_v24 = vsel %vm723_vm3, %v2403_v57, %v2997_v61 }
 0x5c6   : > { %3415 = vst.msk [vmem:[%s4995_s23 + $0x30] sm:$0xff] %vm3024_vm9, %v3018_v24 }
 0x5c8   : > { %v2999_v58 = vpop.permute.xlu1 %2998  ;;  %v2993_v27 = vpop.permute.xlu0 %2992 }
 0x5c9   : > { %v3019_v60 = vsel %vm723_vm3, %v2404_v53, %v2999_v58  ;;  %v3016_v38 = vsel %vm723_vm3, %v2401_v63, %v2993_v27 }
 0x5ca   : > { %3416 = vst.msk [vmem:[%s4995_s23 + $0x38] sm:$0xff] %vm3024_vm9, %v3019_v60  ;;  %3413 = vst.msk [vmem:[%s4995_s23 + $0x10] sm:$0xff] %vm3024_vm9, %v3016_v38 }
 0x5cc   : > { %v2995_v20 = vpop.permute.xlu1 %2994 }
 0x5cd   : > { %v3017_v29 = vsel %vm723_vm3, %v2402_v2, %v2995_v20 }
 0x5ce   : > { %3414 = vst.msk [vmem:[%s4995_s23 + $0x18] sm:$0xff] %vm3024_vm9, %v3017_v29 }
 0x5cf   : > { %v3001_v40 = vpop.permute.xlu0 %3000 }
 0x5d0   : > { %v3020_v32 = vsel %vm723_vm3, %v2405_v12, %v3001_v40 }
 0x5d1   : > { %3417 = vst.msk [vmem:[%s4995_s23 + $0x50] sm:$0xff] %vm3024_vm9, %v3020_v32 }
 0x5d3   : > { %v3003_v36 = vpop.permute.xlu1 %3002  ;;  %v3005_v23 = vpop.permute.xlu0 %3004 }
 0x5d4   : > { %v3021_v34 = vsel %vm723_vm3, %v2406_v14, %v3003_v36  ;;  %v3022_v46 = vsel %vm723_vm3, %v2407_v39, %v3005_v23 }
 0x5d5   : > { %3418 = vst.msk [vmem:[%s4995_s23 + $0x58] sm:$0xff] %vm3024_vm9, %v3021_v34  ;;  %3419 = vst.msk [vmem:[%s4995_s23 + $0x70] sm:$0xff] %vm3024_vm9, %v3022_v46 }
 0x5d7   : > { %v3007_v26 = vpop.permute.xlu1 %3006 }
 0x5d8   : > { %v3023_v17 = vsel %vm723_vm3, %v2408_v8, %v3007_v26 }
 0x5d9   : > { %3420 = vst.msk [vmem:[%s4995_s23 + $0x78] sm:$0xff] %vm3024_vm9, %v3023_v17 }
 0x5da PF: > { %s17_s28 = sadd.s32 1, %s4170_s28   ;;  %s5205_s24 = smov %s4162_s26 }
 0x5db   : > { %p14_p12 = scmp.ge.s32.totalorder %s17_s28, 10   ;;  %s5206_s25 = smov %s4166_s27 }
 0x5dc   : > { %s5207_s26 = smov %s5210_s29  ;;  %s5208_s27 = smov %s5214_s30 }
 0x5dd   :  { %16 = sbr.rel (!%p14_p12) target bundleno = 3 (0x3), region = 100 }

</bundles_post_ra>
